<compile_context>
chip_gen: v5e
topology: v5e:2x2
jax: 0.10.0
libtpu: 0.0.40
codegen_flags: <defaults>
</compile_context>

<pallas_src>
import jax
import jax.numpy as jnp
from jax.experimental import pallas as pl
from jax.experimental.pallas import tpu as pltpu

LATENT = 100
LATENT_PAD = 128            # lane-aligned latent dim (zero-padded)
LAYER_SIZES = [256, 512, 1024]
OUT_DIM = 28 * 28           # 784
OUT_PAD = 896               # 7 * 128, lane-aligned output dim (zero-padded)


def _round_up(n, m):
    return ((n + m - 1) // m) * m


def generator_kernel(x_ref,
                     w1_ref, b1_ref,
                     w2_ref, b2_ref,
                     w3_ref, b3_ref,
                     w4_ref, b4_ref,
                     o_ref):
    def leaky(v):
        # LeakyReLU(0.2): identical to where(v>0, v, 0.2*v) for slope in (0,1).
        return jnp.maximum(v, 0.2 * v)

    # bf16 operands into the MXU, f32 accumulation, f32 bias add + activation.
    h = jnp.dot(x_ref[...].astype(jnp.bfloat16), w1_ref[...],
                preferred_element_type=jnp.float32) + b1_ref[...]
    h = leaky(h)
    h = jnp.dot(h.astype(jnp.bfloat16), w2_ref[...],
                preferred_element_type=jnp.float32) + b2_ref[...]
    h = leaky(h)
    h = jnp.dot(h.astype(jnp.bfloat16), w3_ref[...],
                preferred_element_type=jnp.float32) + b3_ref[...]
    h = leaky(h)
    h = jnp.dot(h.astype(jnp.bfloat16), w4_ref[...],
                preferred_element_type=jnp.float32) + b4_ref[...]
    o_ref[...] = jnp.tanh(h)


def init_params(key):
    """Mirrors `weights_init`: Linear weights ~ N(0, 0.02); biases keep PyTorch's
    default U(-1/sqrt(fan_in), 1/sqrt(fan_in)) (weights_init leaves Linear bias alone).
    Weights are stored as (in, out) so the kernel computes x @ W (== x @ W_pt^T)."""
    dims = [LATENT] + LAYER_SIZES + [OUT_DIM]
    params = []
    for i in range(len(dims) - 1):
        d_in, d_out = dims[i], dims[i + 1]
        key, kw, kb = jax.random.split(key, 3)
        w = 0.02 * jax.random.normal(kw, (d_in, d_out), dtype=jnp.float32)
        bound = 1.0 / jnp.sqrt(jnp.float32(d_in))
        b = jax.random.uniform(kb, (1, d_out), dtype=jnp.float32,
                               minval=-bound, maxval=bound)
        params.append((w, b))
    return params


def prepare_params(params):
    """One-time prep: zero-pad to lane-aligned shapes and cast weights to bf16."""
    (w1, b1), (w2, b2), (w3, b3), (w4, b4) = params
    w1p = jnp.zeros((LATENT_PAD, LAYER_SIZES[0]), jnp.float32).at[:LATENT, :].set(w1)
    w4p = jnp.zeros((LAYER_SIZES[2], OUT_PAD), jnp.float32).at[:, :OUT_DIM].set(w4)
    b4p = jnp.zeros((1, OUT_PAD), jnp.float32).at[:, :OUT_DIM].set(b4)
    return (w1p.astype(jnp.bfloat16), b1,
            w2.astype(jnp.bfloat16), b2,
            w3.astype(jnp.bfloat16), b3,
            w4p.astype(jnp.bfloat16), b4p)


def generator_forward(x, prep):
    """x: (B, 100) float32 latent -> (B, 1, 28, 28) float32 image."""
    w1, b1, w2, b2, w3, b3, w4, b4 = prep
    B = x.shape[0]

    # Batch tile: 256 rows for large batches (fills the 256-wide MXU on v6e/v7x),
    # otherwise round the batch up to a sublane multiple of 8.
    TB = 256 if B >= 256 else _round_up(B, 8)
    B_pad = _round_up(B, TB)

    # Zero-pad latent to 128 lanes and batch to a multiple of TB.
    x_pad = jnp.zeros((B_pad, LATENT_PAD), jnp.float32).at[:B, :LATENT].set(x)

    const = lambda i: (0, 0)   # weights/biases: same block every step -> fetched once
    in_specs = [
        pl.BlockSpec((TB, LATENT_PAD), lambda i: (i, 0)),
        pl.BlockSpec((LATENT_PAD, LAYER_SIZES[0]), const),
        pl.BlockSpec((1, LAYER_SIZES[0]), const),
        pl.BlockSpec((LAYER_SIZES[0], LAYER_SIZES[1]), const),
        pl.BlockSpec((1, LAYER_SIZES[1]), const),
        pl.BlockSpec((LAYER_SIZES[1], LAYER_SIZES[2]), const),
        pl.BlockSpec((1, LAYER_SIZES[2]), const),
        pl.BlockSpec((LAYER_SIZES[2], OUT_PAD), const),
        pl.BlockSpec((1, OUT_PAD), const),
    ]

    out = pl.pallas_call(
        generator_kernel,
        out_shape=jax.ShapeDtypeStruct((B_pad, OUT_PAD), jnp.float32),
        grid=(B_pad // TB,),
        in_specs=in_specs,
        out_specs=pl.BlockSpec((TB, OUT_PAD), lambda i: (i, 0)),
        compiler_params=pltpu.CompilerParams(
            dimension_semantics=("parallel",),
            vmem_limit_bytes=32 * 1024 * 1024),
    )(x_pad, w1, b1, w2, b2, w3, b3, w4, b4)

    return out[:B, :OUT_DIM].reshape(B, 1, 28, 28)


def generator_ref(x, params):
    """Pure-JAX reference, using the same bf16-weight / f32-accumulate recipe."""
    h = x
    for i, (w, bias) in enumerate(params):
        h = jnp.dot(h.astype(jnp.bfloat16), w.astype(jnp.bfloat16),
                    preferred_element_type=jnp.float32) + bias
        if i < len(params) - 1:
            h = jnp.maximum(h, 0.2 * h)
        else:
            h = jnp.tanh(h)
    return h.reshape(x.shape[0], 1, 28, 28)


if __name__ == "__main__":
    key = jax.random.PRNGKey(0)
    key, kx1, kx2 = jax.random.split(key, 3)

    params = init_params(key)
    prep = prepare_params(params)

    # Small batch (spec-consistent): B=2.
    x_small = jax.random.normal(kx1, (2, LATENT), dtype=jnp.float32)
    out_small = jax.block_until_ready(generator_forward(x_small, prep))
    ref_small = generator_ref(x_small, params)
    assert out_small.shape == (2, 1, 28, 28), out_small.shape
    assert out_small.dtype == jnp.float32
    assert jnp.allclose(out_small, ref_small, atol=1e-3, rtol=1e-3), \
        float(jnp.max(jnp.abs(out_small - ref_small)))

    # Larger, non-multiple batch to exercise the batch grid + padding path.
    x_big = jax.random.normal(kx2, (300, LATENT), dtype=jnp.float32)
    out_big = jax.block_until_ready(generator_forward(x_big, prep))
    ref_big = generator_ref(x_big, params)
    assert out_big.shape == (300, 1, 28, 28), out_big.shape
    assert jnp.allclose(out_big, ref_big, atol=1e-3, rtol=1e-3), \
        float(jnp.max(jnp.abs(out_big - ref_big)))

    print("KERNEL_OK")
</pallas_src>

<mosaic_0001>
module attributes {stable_mosaic.version = 11 : i64} {
  func.func @generator_kernel(%arg0: i32, %arg1: memref<8x128xf32, #tpu.memory_space<vmem>>, %arg2: memref<128x256xbf16, #tpu.memory_space<vmem>>, %arg3: memref<1x256xf32, #tpu.memory_space<vmem>>, %arg4: memref<256x512xbf16, #tpu.memory_space<vmem>>, %arg5: memref<1x512xf32, #tpu.memory_space<vmem>>, %arg6: memref<512x1024xbf16, #tpu.memory_space<vmem>>, %arg7: memref<1x1024xf32, #tpu.memory_space<vmem>>, %arg8: memref<1024x896xbf16, #tpu.memory_space<vmem>>, %arg9: memref<1x896xf32, #tpu.memory_space<vmem>>, %arg10: memref<8x896xf32, #tpu.memory_space<vmem>>) attributes {dimension_semantics = [#tpu.dimension_semantics<parallel>], iteration_bounds = array<i64: 1>, scalar_prefetch = 0 : i64, scratch_operands = 0 : i64, tpu.core_type = #tpu.core_type<tc>, window_params = [{transform_indices = @transform_0, window_bounds = array<i64: 8, 128>}, {pipeline_mode = #tpu.pipeline_mode<synchronous>, transform_indices = @transform_1, window_bounds = array<i64: 128, 256>}, {pipeline_mode = #tpu.pipeline_mode<synchronous>, transform_indices = @transform_2, window_bounds = array<i64: 1, 256>}, {pipeline_mode = #tpu.pipeline_mode<synchronous>, transform_indices = @transform_3, window_bounds = array<i64: 256, 512>}, {pipeline_mode = #tpu.pipeline_mode<synchronous>, transform_indices = @transform_4, window_bounds = array<i64: 1, 512>}, {pipeline_mode = #tpu.pipeline_mode<synchronous>, transform_indices = @transform_5, window_bounds = array<i64: 512, 1024>}, {pipeline_mode = #tpu.pipeline_mode<synchronous>, transform_indices = @transform_6, window_bounds = array<i64: 1, 1024>}, {pipeline_mode = #tpu.pipeline_mode<synchronous>, transform_indices = @transform_7, window_bounds = array<i64: 1024, 896>}, {pipeline_mode = #tpu.pipeline_mode<synchronous>, transform_indices = @transform_8, window_bounds = array<i64: 1, 896>}, {transform_indices = @transform_9, window_bounds = array<i64: 8, 896>}]} {
    %c0 = arith.constant 0 : index
    %c0_0 = arith.constant 0 : index
    %0 = vector.load %arg1[%c0, %c0_0] : memref<8x128xf32, #tpu.memory_space<vmem>>, vector<8x128xf32>
    %1 = arith.truncf %0 : vector<8x128xf32> to vector<8x128xbf16>
    %c0_1 = arith.constant 0 : index
    %c0_2 = arith.constant 0 : index
    %2 = vector.load %arg2[%c0_1, %c0_2] : memref<128x256xbf16, #tpu.memory_space<vmem>>, vector<128x256xbf16>
    %cst = arith.constant dense<0.000000e+00> : vector<8x256xf32>
    %3 = tpu.matmul %1, %2, %cst {dimension_numbers = #tpu.dot_dimension_numbers<[1], [0], [0], [1], [0, 0, 1, 1], [], []>} : vector<8x128xbf16>, vector<128x256xbf16>, vector<8x256xf32> -> vector<8x256xf32>
    %c0_3 = arith.constant 0 : index
    %c0_4 = arith.constant 0 : index
    %4 = vector.load %arg3[%c0_3, %c0_4] : memref<1x256xf32, #tpu.memory_space<vmem>>, vector<1x256xf32>
    %5 = vector.broadcast %4 : vector<1x256xf32> to vector<8x256xf32>
    %6 = arith.addf %3, %5 : vector<8x256xf32>
    %cst_5 = arith.constant 2.000000e-01 : f32
    %7 = vector.broadcast %cst_5 : f32 to vector<8x256xf32>
    %8 = arith.mulf %7, %6 : vector<8x256xf32>
    %9 = arith.maximumf %6, %8 : vector<8x256xf32>
    %10 = arith.truncf %9 : vector<8x256xf32> to vector<8x256xbf16>
    %c0_6 = arith.constant 0 : index
    %c0_7 = arith.constant 0 : index
    %11 = vector.load %arg4[%c0_6, %c0_7] : memref<256x512xbf16, #tpu.memory_space<vmem>>, vector<256x512xbf16>
    %cst_8 = arith.constant dense<0.000000e+00> : vector<8x512xf32>
    %12 = tpu.matmul %10, %11, %cst_8 {dimension_numbers = #tpu.dot_dimension_numbers<[1], [0], [0], [1], [0, 0, 1, 1], [], []>} : vector<8x256xbf16>, vector<256x512xbf16>, vector<8x512xf32> -> vector<8x512xf32>
    %c0_9 = arith.constant 0 : index
    %c0_10 = arith.constant 0 : index
    %13 = vector.load %arg5[%c0_9, %c0_10] : memref<1x512xf32, #tpu.memory_space<vmem>>, vector<1x512xf32>
    %14 = vector.broadcast %13 : vector<1x512xf32> to vector<8x512xf32>
    %15 = arith.addf %12, %14 : vector<8x512xf32>
    %cst_11 = arith.constant 2.000000e-01 : f32
    %16 = vector.broadcast %cst_11 : f32 to vector<8x512xf32>
    %17 = arith.mulf %16, %15 : vector<8x512xf32>
    %18 = arith.maximumf %15, %17 : vector<8x512xf32>
    %19 = arith.truncf %18 : vector<8x512xf32> to vector<8x512xbf16>
    %c0_12 = arith.constant 0 : index
    %c0_13 = arith.constant 0 : index
    %20 = vector.load %arg6[%c0_12, %c0_13] : memref<512x1024xbf16, #tpu.memory_space<vmem>>, vector<512x1024xbf16>
    %cst_14 = arith.constant dense<0.000000e+00> : vector<8x1024xf32>
    %21 = tpu.matmul %19, %20, %cst_14 {dimension_numbers = #tpu.dot_dimension_numbers<[1], [0], [0], [1], [0, 0, 1, 1], [], []>} : vector<8x512xbf16>, vector<512x1024xbf16>, vector<8x1024xf32> -> vector<8x1024xf32>
    %c0_15 = arith.constant 0 : index
    %c0_16 = arith.constant 0 : index
    %22 = vector.load %arg7[%c0_15, %c0_16] : memref<1x1024xf32, #tpu.memory_space<vmem>>, vector<1x1024xf32>
    %23 = vector.broadcast %22 : vector<1x1024xf32> to vector<8x1024xf32>
    %24 = arith.addf %21, %23 : vector<8x1024xf32>
    %cst_17 = arith.constant 2.000000e-01 : f32
    %25 = vector.broadcast %cst_17 : f32 to vector<8x1024xf32>
    %26 = arith.mulf %25, %24 : vector<8x1024xf32>
    %27 = arith.maximumf %24, %26 : vector<8x1024xf32>
    %28 = arith.truncf %27 : vector<8x1024xf32> to vector<8x1024xbf16>
    %c0_18 = arith.constant 0 : index
    %c0_19 = arith.constant 0 : index
    %29 = vector.load %arg8[%c0_18, %c0_19] : memref<1024x896xbf16, #tpu.memory_space<vmem>>, vector<1024x896xbf16>
    %cst_20 = arith.constant dense<0.000000e+00> : vector<8x896xf32>
    %30 = tpu.matmul %28, %29, %cst_20 {dimension_numbers = #tpu.dot_dimension_numbers<[1], [0], [0], [1], [0, 0, 1, 1], [], []>} : vector<8x1024xbf16>, vector<1024x896xbf16>, vector<8x896xf32> -> vector<8x896xf32>
    %c0_21 = arith.constant 0 : index
    %c0_22 = arith.constant 0 : index
    %31 = vector.load %arg9[%c0_21, %c0_22] : memref<1x896xf32, #tpu.memory_space<vmem>>, vector<1x896xf32>
    %32 = vector.broadcast %31 : vector<1x896xf32> to vector<8x896xf32>
    %33 = arith.addf %30, %32 : vector<8x896xf32>
    %34 = math.tanh %33 : vector<8x896xf32>
    %c0_23 = arith.constant 0 : index
    %c0_24 = arith.constant 0 : index
    %35 = vector.load %arg10[%c0_23, %c0_24] : memref<8x896xf32, #tpu.memory_space<vmem>>, vector<8x896xf32>
    tpu.vector_store %arg10[%c0_23, %c0_24], %34 {strides = array<i32>} : memref<8x896xf32, #tpu.memory_space<vmem>>, vector<8x896xf32>,
    return
  }
  func.func @transform_0(%arg0: i32) -> (i32, i32) {
    %c0_i32 = arith.constant 0 : i32
    %c0_i32_0 = arith.constant 0 : i32
    return %arg0, %c0_i32 : i32, i32
  }
  func.func @transform_1(%arg0: i32) -> (i32, i32) {
    %c0_i32 = arith.constant 0 : i32
    %c0_i32_0 = arith.constant 0 : i32
    %c0_i32_1 = arith.constant 0 : i32
    return %c0_i32, %c0_i32_0 : i32, i32
  }
  func.func @transform_2(%arg0: i32) -> (i32, i32) {
    %c0_i32 = arith.constant 0 : i32
    %c0_i32_0 = arith.constant 0 : i32
    %c0_i32_1 = arith.constant 0 : i32
    return %c0_i32, %c0_i32_0 : i32, i32
  }
  func.func @transform_3(%arg0: i32) -> (i32, i32) {
    %c0_i32 = arith.constant 0 : i32
    %c0_i32_0 = arith.constant 0 : i32
    %c0_i32_1 = arith.constant 0 : i32
    return %c0_i32, %c0_i32_0 : i32, i32
  }
  func.func @transform_4(%arg0: i32) -> (i32, i32) {
    %c0_i32 = arith.constant 0 : i32
    %c0_i32_0 = arith.constant 0 : i32
    %c0_i32_1 = arith.constant 0 : i32
    return %c0_i32, %c0_i32_0 : i32, i32
  }
  func.func @transform_5(%arg0: i32) -> (i32, i32) {
    %c0_i32 = arith.constant 0 : i32
    %c0_i32_0 = arith.constant 0 : i32
    %c0_i32_1 = arith.constant 0 : i32
    return %c0_i32, %c0_i32_0 : i32, i32
  }
  func.func @transform_6(%arg0: i32) -> (i32, i32) {
    %c0_i32 = arith.constant 0 : i32
    %c0_i32_0 = arith.constant 0 : i32
    %c0_i32_1 = arith.constant 0 : i32
    return %c0_i32, %c0_i32_0 : i32, i32
  }
  func.func @transform_7(%arg0: i32) -> (i32, i32) {
    %c0_i32 = arith.constant 0 : i32
    %c0_i32_0 = arith.constant 0 : i32
    %c0_i32_1 = arith.constant 0 : i32
    return %c0_i32, %c0_i32_0 : i32, i32
  }
  func.func @transform_8(%arg0: i32) -> (i32, i32) {
    %c0_i32 = arith.constant 0 : i32
    %c0_i32_0 = arith.constant 0 : i32
    %c0_i32_1 = arith.constant 0 : i32
    return %c0_i32, %c0_i32_0 : i32, i32
  }
  func.func @transform_9(%arg0: i32) -> (i32, i32) {
    %c0_i32 = arith.constant 0 : i32
    %c0_i32_0 = arith.constant 0 : i32
    return %arg0, %c0_i32 : i32, i32
  }
}

</mosaic_0001>

<bundles_post_ra>
// kernel: tpu_custom_call.1
= control target key start
LH: loop header
LB: loop body
LE: loop exit
PB: predicated region body
PF: predicated region fallthrough
CT: control target
= control target key end

     0   :  { %14 = vsyncpa [#allocation3], 0  ;;  %s10976_s0 = inlined_call_operand.hbm [shape: f32[8,128], index: 0, kind: input, shape index: {}]   ;;  %s10977_s1 = inlined_call_operand.hbm [shape: bf16[128,256], index: 1, kind: input, shape index: {}]   ;;  %s10978_s2 = inlined_call_operand.hbm [shape: f32[1,256], index: 2, kind: input, shape index: {}]   ;;  %s10979_s3 = inlined_call_operand.hbm [shape: bf16[256,512], index: 3, kind: input, shape index: {}]   ;;  %s10980_s4 = inlined_call_operand.hbm [shape: f32[1,512], index: 4, kind: input, shape index: {}]   ;;  %s10981_s5 = inlined_call_operand.hbm [shape: bf16[512,1024], index: 5, kind: input, shape index: {}]   ;;  %s10982_s6 = inlined_call_operand.hbm [shape: f32[1,1024], index: 6, kind: input, shape index: {}]   ;;  %s10983_s7 = inlined_call_operand.hbm [shape: bf16[1024,896], index: 7, kind: input, shape index: {}]   ;;  %s10984_s8 = inlined_call_operand.hbm [shape: f32[1,896], index: 8, kind: input, shape index: {}]   ;;  %s10985_s9 = inlined_call_operand.hbm [shape: f32[8,896], index: 9, kind: output, shape index: {}]  }
   0x1   :  { %15 = vsyncpa [#allocation6], 0 }
   0x2   :  { %16 = vsyncpa [#allocation9], 0 }
   0x3   :  { %17 = vsyncpa [#allocation12], 0 }
   0x4   :  { %18 = vsyncpa [#allocation15], 0  ;;  %s35_s11 = sshll.u32 %s10977_s1, 4  ;;  %s36_s11 = int_to_ptr.hbm [resolvable:$true] %s35_s11 }
   0x5   :  { %19 = vsyncpa [#allocation4], 0  ;;  %s10605_s12 = smov [#allocation5]   ;;  %s59_s16 = sshll.u32 %s10979_s3, 4  ;;  %s60_s16 = int_to_ptr.hbm [resolvable:$true] %s59_s16 }
   0x6   :  { %s37_s13 = sshll.u32 %s10605_s12, 4  ;;  %s10606_s17 = smov 128   ;;  %s38_s13 = int_to_ptr.vmem [resolvable:$true] %s37_s13 }
   0x7   :  { %s10607_s18 = smov 8   ;;  %s10608_s19 = smov [#allocation8]  }
   0x8   :  { %43 = dma.hbm_to_vmem [thread:$0]  %s36_s11, 2048, %s38_s13, [#allocation6], %s10606_s17, %s10606_s17, %s10607_s18  }
   0x9   :  { %s61_s20 = sshll.u32 %s10608_s19, 4  ;;  %s10609_s21 = smov 256   ;;  %s62_s20 = int_to_ptr.vmem [resolvable:$true] %s61_s20 }
   0xa   :  { %s10610_s22 = smov 16   ;;  %s83_s24 = sshll.u32 %s10981_s5, 4  ;;  %s84_s24 = int_to_ptr.hbm [resolvable:$true] %s83_s24 }
   0xb   :  { %67 = dma.hbm_to_vmem [thread:$0]  %s60_s16, 8192, %s62_s20, [#allocation9], %s10609_s21, %s10609_s21, %s10610_s22  }
   0xc   :  { %s10611_s25 = smov [#allocation11]   ;;  %s107_s28 = sshll.u32 %s10983_s7, 4  ;;  %s108_s28 = int_to_ptr.hbm [resolvable:$true] %s107_s28 }
   0xd   :  { %s85_s26 = sshll.u32 %s10611_s25, 4  ;;  %s10612_s29 = smov 512   ;;  %s86_s26 = int_to_ptr.vmem [resolvable:$true] %s85_s26 }
   0xe   :  { %s10613_s30 = smov 32   ;;  %s10614_s10 = smov [#allocation14]  }
   0xf   :  { %91 = dma.hbm_to_vmem [thread:$0]  %s84_s24, 32768, %s86_s26, [#allocation12], %s10612_s29, %s10612_s29, %s10613_s30  }
  0x10   :  { %s109_s11 = sshll.u32 %s10614_s10, 4  ;;  %s10615_s12 = smov 448   ;;  %s110_s11 = int_to_ptr.vmem [resolvable:$true] %s109_s11 }
  0x11   :  { %s10616_s13 = smov 28   ;;  %s25_s15 = sshll.u32 %s10976_s0, 4  ;;  %s26_s15 = int_to_ptr.hbm [resolvable:$true] %s25_s15 }
  0x12   :  { %115 = dma.hbm_to_vmem [thread:$0]  %s108_s28, 57344, %s110_s11, [#allocation15], %s10615_s12, %s10615_s12, %s10616_s13  }
  0x13   :  { %s10617_s16 = smov [#allocation2]   ;;  %s49_s19 = sshll.u32 %s10978_s2, 4  ;;  %s50_s19 = int_to_ptr.hbm [resolvable:$true] %s49_s19 }
  0x14   :  { %s27_s17 = sshll.u32 %s10617_s16, 4  ;;  %s10618_s20 = smov [#allocation7]   ;;  %s28_s17 = int_to_ptr.vmem [resolvable:$true] %s27_s17 }
  0x15   :  { %30 = dma.hbm_to_vmem [thread:$0]  %s26_s15, 128, %s28_s17, [#allocation3]  }
  0x16   :  { %s51_s21 = sshll.u32 %s10618_s20, 4  ;;  %s73_s23 = sshll.u32 %s10980_s4, 4  ;;  %s52_s21 = int_to_ptr.vmem [resolvable:$true] %s51_s21  ;;  %s74_s23 = int_to_ptr.hbm [resolvable:$true] %s73_s23 }
  0x17   :  { %54 = dma.hbm_to_vmem [thread:$0]  %s50_s19, 32, %s52_s21, [#allocation6]  }
  0x18   :  { %s97_s25 = sshll.u32 %s10982_s6, 4  ;;  %s10619_s26 = smov [#allocation10]   ;;  %s98_s25 = int_to_ptr.hbm [resolvable:$true] %s97_s25 }
  0x19   :  { %s75_s27 = sshll.u32 %s10619_s26, 4  ;;  %s10620_s2 = smov [#allocation13]   ;;  %s76_s27 = int_to_ptr.vmem [resolvable:$true] %s75_s27 }
  0x1a   :  { %78 = dma.hbm_to_vmem [thread:$0]  %s74_s23, 64, %s76_s27, [#allocation9]  }
  0x1b   :  { %s99_s3 = sshll.u32 %s10620_s2, 4  ;;  %s121_s30 = sshll.u32 %s10984_s8, 4  ;;  %s100_s3 = int_to_ptr.vmem [resolvable:$true] %s99_s3  ;;  %s122_s30 = int_to_ptr.hbm [resolvable:$true] %s121_s30 }
  0x1c   :  { %102 = dma.hbm_to_vmem [thread:$0]  %s98_s25, 128, %s100_s3, [#allocation12]  }
  0x1d   :  { %s10621_s4 = smov [#allocation16]  }
  0x1e   :  { %s123_s10 = sshll.u32 %s10621_s4, 4  ;;  %s124_s10 = int_to_ptr.vmem [resolvable:$true] %s123_s10 }
  0x1f   :  { %126 = dma.hbm_to_vmem [thread:$0]  %s122_s30, 112, %s124_s10, [#allocation15]  }
  0x20   :  { %10593 = dma.done.wait [#allocation3], 128  }
  0x21   :  { %10594 = vsyncadd [#allocation3], 4294967168 }
  0x22   :  { %10595 = dma.done.wait [#allocation6], 2080  }
  0x23   :  { %10596 = vsyncadd [#allocation6], 4294965216 }
  0x24   :  { %10597 = dma.done.wait [#allocation9], 8256  }
  0x25   :  { %10598 = vsyncadd [#allocation9], 4294959040 }
  0x26   :  { %10599 = dma.done.wait [#allocation12], 32896  }
  0x27   :  { %10600 = vsyncadd [#allocation12], 4294934400 }
  0x28   :  { %10601 = dma.done.wait [#allocation15], 57456  }
  0x29   :  { %10602 = vsyncadd [#allocation15], 4294909840  ;;  %v6456_v0 = vld [vmem:[#allocation5 + $0x70] sm:$0xf]  ;;  %v9549_v1 = vld [vmem:[#allocation5 + $0x74] sm:$0xf0] }
  0x2a   :  { %v9548_v2 = vld [vmem:[#allocation5 + $0x74] sm:$0xf]  ;;  %v6457_v3 = vor.u32 %v9549_v1, %v6456_v0  ;;  %v6458_v4 = vld [vmem:[#allocation5 + $0x78] sm:$0xf0]  ;;  %v6448_v5 = vld [vmem:[#allocation5 + $0x60] sm:$0xf] }
  0x2b   :  { %v9547_v6 = vld [vmem:[#allocation5 + $0x64] sm:$0xf0]  ;;  %v6461_v7 = vor.u32 %v9548_v2, %v6458_v4  ;;  %v9546_v8 = vld [vmem:[#allocation5 + $0x64] sm:$0xf]  ;;  %v6450_v9 = vld [vmem:[#allocation5 + $0x68] sm:$0xf0] }
  0x2c   :  { %267 = vmatpush.bf16.msra.mxu0 %v6457_v3  ;;  %v6449_v10 = vor.u32 %v9547_v6, %v6448_v5  ;;  %v6453_v11 = vor.u32 %v9546_v8, %v6450_v9  ;;  %v6440_v12 = vld [vmem:[#allocation5 + $0x50] sm:$0xf]  ;;  %v9545_v13 = vld [vmem:[#allocation5 + $0x54] sm:$0xf0]  ;;  %v9544_v14 = vld [vmem:[#allocation5 + $0x54] sm:$0xf] }
  0x2d   :  { %280 = vmatpush.bf16.msra.mxu1 %v6461_v7  ;;  %v6442_v15 = vld [vmem:[#allocation5 + $0x58] sm:$0xf0]  ;;  %v6441_v16 = vor.u32 %v9545_v13, %v6440_v12  ;;  %v6432_v18 = vld [vmem:[#allocation5 + $0x40] sm:$0xf]  ;;  %v9543_v19 = vld [vmem:[#allocation5 + $0x44] sm:$0xf0] }
  0x2e   :  { %v6445_v17 = vor.u32 %v9544_v14, %v6442_v15  ;;  %v9542_v20 = vld [vmem:[#allocation5 + $0x44] sm:$0xf]  ;;  %v6434_v21 = vld [vmem:[#allocation5 + $0x48] sm:$0xf0]  ;;  %v6433_v22 = vor.u32 %v9543_v19, %v6432_v18  ;;  %v9580_v24 = vld [vmem:[#allocation8 + $0xec] sm:$0xf0] }
  0x2f   :  { %v6576_v23 = vld [vmem:[#allocation8 + $0xe0] sm:$0xf]  ;;  %v6437_v26 = vor.u32 %v9542_v20, %v6434_v21  ;;  %v6424_v27 = vld [vmem:[#allocation5 + $0x30] sm:$0xf]  ;;  %v9541_v28 = vld [vmem:[#allocation5 + $0x34] sm:$0xf0] }
  0x30   :  { %268 = vmatpush.bf16.msra.mxu0 %v6449_v10  ;;  %v6704_v25 = vld [vmem:[#allocation8 + $0x1e0] sm:$0xf]  ;;  %v6577_v29 = vor.u32 %v9580_v24, %v6576_v23  ;;  %v9612_v30 = vld [vmem:[#allocation8 + $0x1ec] sm:$0xf0]  ;;  %v6426_v32 = vld [vmem:[#allocation5 + $0x38] sm:$0xf0]  ;;  %v6425_v38 = vor.u32 %v9541_v28, %v6424_v27 }
  0x31   :  { %281 = vmatpush.bf16.msra.mxu1 %v6453_v11  ;;  %v9540_v31 = vld [vmem:[#allocation5 + $0x34] sm:$0xf]  ;;  %v6705_v33 = vor.u32 %v9612_v30, %v6704_v25  ;;  %v6560_v34 = vld [vmem:[#allocation8 + $0xc0] sm:$0xf]  ;;  %v9539_v40 = vld [vmem:[#allocation5 + $0x24] sm:$0xf0] }
  0x32   :  { %693 = vmatpush.bf16.msra.mxu2 %v6577_v29  ;;  %v9576_v35 = vld [vmem:[#allocation8 + $0xcc] sm:$0xf0]  ;;  %v6688_v36 = vld [vmem:[#allocation8 + $0x1c0] sm:$0xf]  ;;  %v6429_v43 = vor.u32 %v9540_v31, %v6426_v32  ;;  %v6418_v47 = vld [vmem:[#allocation5 + $0x28] sm:$0xf0] }
  0x33   :  { %v9608_v37 = vld [vmem:[#allocation8 + $0x1cc] sm:$0xf0]  ;;  %v6416_v39 = vld [vmem:[#allocation5 + $0x20] sm:$0xf]  ;;  %706 = vmatpush.bf16.msra.mxu3 %v6705_v33  ;;  %v6561_v41 = vor.u32 %v9576_v35, %v6560_v34  ;;  %v9538_v44 = vld [vmem:[#allocation5 + $0x24] sm:$0xf] }
  0x34   :  { %269 = vmatpush.bf16.msra.mxu0 %v6441_v16  ;;  %v6689_v42 = vor.u32 %v9608_v37, %v6688_v36  ;;  %v6544_v45 = vld [vmem:[#allocation8 + $0xa0] sm:$0xf]  ;;  %v9572_v46 = vld [vmem:[#allocation8 + $0xac] sm:$0xf0]  ;;  %v6417_v51 = vor.u32 %v9539_v40, %v6416_v39  ;;  %v6421_v56 = vor.u32 %v9538_v44, %v6418_v47  ;;  %v9537_v57 = vld [vmem:[#allocation5 + $0x14] sm:$0xf0] }
  0x35   :  { %282 = vmatpush.bf16.msra.mxu1 %v6445_v17  ;;  %v6672_v48 = vld [vmem:[#allocation8 + $0x1a0] sm:$0xf]  ;;  %v9604_v49 = vld [vmem:[#allocation8 + $0x1ac] sm:$0xf0]  ;;  %v6545_v50 = vor.u32 %v9572_v46, %v6544_v45  ;;  %v6410_v61 = vld [vmem:[#allocation5 + $0x18] sm:$0xf0] }
  0x36   :  { %694 = vmatpush.bf16.msra.mxu2 %v6561_v41  ;;  %v6408_v52 = vld [vmem:[#allocation5 + $0x10] sm:$0xf]  ;;  %v6673_v53 = vor.u32 %v9604_v49, %v6672_v48  ;;  %v6528_v54 = vld [vmem:[#allocation8 + $0x80] sm:$0xf]  ;;  %v9536_v60 = vld [vmem:[#allocation5 + $0x14] sm:$0xf] }
  0x37   :  { %707 = vmatpush.bf16.msra.mxu3 %v6689_v42  ;;  %v9568_v55 = vld [vmem:[#allocation8 + $0x8c] sm:$0xf0]  ;;  %v6656_v58 = vld [vmem:[#allocation8 + $0x180] sm:$0xf]  ;;  %v6409_v0 = vor.u32 %v9537_v57, %v6408_v52  ;;  %v9535_v1 = vld [vmem:[#allocation5 + $0x4] sm:$0xf0]  ;;  %v6413_v5 = vor.u32 %v9536_v60, %v6410_v61 }
  0x38   :  { %270 = vmatpush.bf16.msra.mxu0 %v6433_v22  ;;  %v9600_v59 = vld [vmem:[#allocation8 + $0x18c] sm:$0xf0]  ;;  %v6400_v62 = vld [vmem:[#allocation5] sm:$0xf]  ;;  %v6529_v63 = vor.u32 %v9568_v55, %v6528_v54  ;;  %v9534_v6 = vld [vmem:[#allocation5 + $0x4] sm:$0xf] }
  0x39   :  { %283 = vmatpush.bf16.msra.mxu1 %v6437_v26  ;;  %v6657_v2 = vor.u32 %v9600_v59, %v6656_v58  ;;  %v6512_v3 = vld [vmem:[#allocation8 + $0x60] sm:$0xf]  ;;  %v9564_v4 = vld [vmem:[#allocation8 + $0x6c] sm:$0xf0]  ;;  %v6402_v9 = vld [vmem:[#allocation5 + $0x8] sm:$0xf0]  ;;  %v6401_v15 = vor.u32 %v9535_v1, %v6400_v62 }
  0x3a   :  { %695 = vmatpush.bf16.msra.mxu2 %v6545_v50  ;;  %v6640_v7 = vld [vmem:[#allocation8 + $0x160] sm:$0xf]  ;;  %v9596_v8 = vld [vmem:[#allocation8 + $0x16c] sm:$0xf0]  ;;  %v9578_v10 = vld [vmem:[#allocation8 + $0xe4] sm:$0xf]  ;;  %v6513_v14 = vor.u32 %v9564_v4, %v6512_v3  ;;  %v6405_v20 = vor.u32 %v9534_v6, %v6402_v9 }
  0x3b   :  { %708 = vmatpush.bf16.msra.mxu3 %v6673_v53  ;;  %v6578_v11 = vld [vmem:[#allocation8 + $0xf0] sm:$0xf0]  ;;  %v9610_v12 = vld [vmem:[#allocation8 + $0x1e4] sm:$0xf]  ;;  %v6641_v17 = vor.u32 %v9596_v8, %v6640_v7  ;;  %v6496_v18 = vld [vmem:[#allocation8 + $0x40] sm:$0xf] }
  0x3c   :  { %271 = vmatpush.bf16.msra.mxu0 %v6425_v38  ;;  %v6706_v13 = vld [vmem:[#allocation8 + $0x1f0] sm:$0xf0]  ;;  %v9560_v19 = vld [vmem:[#allocation8 + $0x4c] sm:$0xf0]  ;;  %v6581_v21 = vor.u32 %v9578_v10, %v6578_v11  ;;  %v6624_v22 = vld [vmem:[#allocation8 + $0x140] sm:$0xf] }
  0x3d   :  { %284 = vmatpush.bf16.msra.mxu1 %v6429_v43  ;;  %v163_v16 = vld [vmem:[#allocation2] sm:$0xff]  ;;  %v9592_v23 = vld [vmem:[#allocation8 + $0x14c] sm:$0xf0]  ;;  %v6709_v24 = vor.u32 %v9610_v12, %v6706_v13  ;;  %v9574_v25 = vld [vmem:[#allocation8 + $0xc4] sm:$0xf]  ;;  %v6497_v30 = vor.u32 %v9560_v19, %v6496_v18  ;;  %s10622_s6 = smov [#allocation17]  }
  0x3e   :  { %696 = vmatpush.bf16.msra.mxu2 %v6529_v63  ;;  %v6562_v26 = vld [vmem:[#allocation8 + $0xd0] sm:$0xf0]  ;;  %v164_v27 = vpack.c.bf16 %v163_v16, %v163_v16  ;;  %v9606_v28 = vld [vmem:[#allocation8 + $0x1c4] sm:$0xf]  ;;  %v6625_v31 = vor.u32 %v9592_v23, %v6624_v22  ;;  %v6480_v32 = vld [vmem:[#allocation8 + $0x20] sm:$0xf] }
  0x3f   :  { %709 = vmatpush.bf16.msra.mxu3 %v6657_v2  ;;  %v6690_v29 = vld [vmem:[#allocation8 + $0x1d0] sm:$0xf0]  ;;  %v9556_v33 = vld [vmem:[#allocation8 + $0x2c] sm:$0xf0]  ;;  %v6565_v34 = vor.u32 %v9574_v25, %v6562_v26  ;;  %v6608_v35 = vld [vmem:[#allocation8 + $0x120] sm:$0xf] }
  0x40   :  { %272 = vmatpush.bf16.msra.mxu0 %v6417_v51  ;;  %v9588_v36 = vld [vmem:[#allocation8 + $0x12c] sm:$0xf0]  ;;  %v6693_v37 = vor.u32 %v9606_v28, %v6690_v29  ;;  %v9570_v38 = vld [vmem:[#allocation8 + $0xa4] sm:$0xf]  ;;  %v6546_v39 = vld [vmem:[#allocation8 + $0xb0] sm:$0xf0]  ;;  %v6481_v42 = vor.u32 %v9556_v33, %v6480_v32 }
  0x41   :  { %285 = vmatpush.bf16.msra.mxu1 %v6421_v56  ;;  %v9602_v40 = vld [vmem:[#allocation8 + $0x1a4] sm:$0xf]  ;;  %v6674_v41 = vld [vmem:[#allocation8 + $0x1b0] sm:$0xf0]  ;;  %v6609_v44 = vor.u32 %v9588_v36, %v6608_v35  ;;  %v6464_v45 = vld [vmem:[#allocation8] sm:$0xf]  ;;  %v6549_v48 = vor.u32 %v9570_v38, %v6546_v39 }
  0x42   :  { %697 = vmatpush.bf16.msra.mxu2 %v6513_v14  ;;  %v9566_v43 = vld [vmem:[#allocation8 + $0x84] sm:$0xf]  ;;  %v9552_v46 = vld [vmem:[#allocation8 + $0xc] sm:$0xf0]  ;;  %v6592_v47 = vld [vmem:[#allocation8 + $0x100] sm:$0xf]  ;;  %v6677_v52 = vor.u32 %v9602_v40, %v6674_v41 }
  0x43   :  { %710 = vmatpush.bf16.msra.mxu3 %v6641_v17  ;;  %v9584_v49 = vld [vmem:[#allocation8 + $0x10c] sm:$0xf0]  ;;  %v6584_v50 = vld [vmem:[#allocation8 + $0xe8] sm:$0xf]  ;;  %v9581_v51 = vld [vmem:[#allocation8 + $0xf4] sm:$0xf0]  ;;  %v6465_v58 = vor.u32 %v9552_v46, %v6464_v45 }
  0x44   :  { %273 = vmatpush.bf16.msra.mxu0 %v6409_v0  ;;  %v6530_v53 = vld [vmem:[#allocation8 + $0x90] sm:$0xf0]  ;;  %v6712_v54 = vld [vmem:[#allocation8 + $0x1e8] sm:$0xf]  ;;  %v9613_v55 = vld [vmem:[#allocation8 + $0x1f4] sm:$0xf0]  ;;  %v6593_v59 = vor.u32 %v9584_v49, %v6592_v47  ;;  %v6585_v60 = vor.u32 %v9581_v51, %v6584_v50 }
  0x45   :  { %286 = vmatpush.bf16.msra.mxu1 %v6413_v5  ;;  %v9598_v56 = vld [vmem:[#allocation8 + $0x184] sm:$0xf]  ;;  %v6658_v57 = vld [vmem:[#allocation8 + $0x190] sm:$0xf0]  ;;  %v6533_v61 = vor.u32 %v9566_v43, %v6530_v53  ;;  %v6713_v63 = vor.u32 %v9613_v55, %v6712_v54  ;;  %v6568_v0 = vld [vmem:[#allocation8 + $0xc8] sm:$0xf] }
  0x46   :  { %698 = vmatpush.bf16.msra.mxu2 %v6497_v30  ;;  %v9562_v62 = vld [vmem:[#allocation8 + $0x64] sm:$0xf]  ;;  %v9577_v1 = vld [vmem:[#allocation8 + $0xd4] sm:$0xf0]  ;;  %v6661_v2 = vor.u32 %v9598_v56, %v6658_v57  ;;  %v6514_v3 = vld [vmem:[#allocation8 + $0x70] sm:$0xf0] }
  0x47   :  { %711 = vmatpush.bf16.msra.mxu3 %v6625_v31  ;;  %v6696_v4 = vld [vmem:[#allocation8 + $0x1c8] sm:$0xf]  ;;  %v9609_v5 = vld [vmem:[#allocation8 + $0x1d4] sm:$0xf0]  ;;  %v9594_v6 = vld [vmem:[#allocation8 + $0x164] sm:$0xf]  ;;  %v6569_v8 = vor.u32 %v9577_v1, %v6568_v0  ;;  %v6517_v9 = vor.u32 %v9562_v62, %v6514_v3 }
  0x48   :  { %274 = vmatpush.bf16.msra.mxu0 %v6401_v15  ;;  %v6642_v7 = vld [vmem:[#allocation8 + $0x170] sm:$0xf0]  ;;  %v6697_v10 = vor.u32 %v9609_v5, %v6696_v4  ;;  %v9558_v12 = vld [vmem:[#allocation8 + $0x44] sm:$0xf]  ;;  %v9579_v28 = vld [vmem:[#allocation8 + $0xec] sm:$0xf] }
  0x49   :  { %287 = vmatpush.bf16.msra.mxu1 %v6405_v20  ;;  %v6645_v11 = vor.u32 %v9594_v6, %v6642_v7  ;;  %v6498_v13 = vld [vmem:[#allocation8 + $0x50] sm:$0xf0]  ;;  %v9590_v14 = vld [vmem:[#allocation8 + $0x144] sm:$0xf]  ;;  %v6586_v29 = vld [vmem:[#allocation8 + $0xf8] sm:$0xf0] }
  0x4a   :  { %699 = vmatpush.bf16.msra.mxu2 %v6481_v42  ;;  %v6626_v15 = vld [vmem:[#allocation8 + $0x150] sm:$0xf0]  ;;  %v6501_v16 = vor.u32 %v9558_v12, %v6498_v13  ;;  %v9554_v18 = vld [vmem:[#allocation8 + $0x24] sm:$0xf]  ;;  %v9611_v30 = vld [vmem:[#allocation8 + $0x1ec] sm:$0xf] }
  0x4b   :  { %275 = vmatmul.bf16.vlgmr.msra.gmra.mxu0 %v164_v27  ;;  %712 = vmatpush.bf16.msra.mxu3 %v6609_v44  ;;  %v6629_v17 = vor.u32 %v9590_v14, %v6626_v15  ;;  %v6482_v19 = vld [vmem:[#allocation8 + $0x30] sm:$0xf0]  ;;  %v9586_v20 = vld [vmem:[#allocation8 + $0x124] sm:$0xf]  ;;  %v6714_v31 = vld [vmem:[#allocation8 + $0x1f8] sm:$0xf0] }
  0x4c   :  { %719 = vmatpush.bf16.msrb.mxu0 %v6581_v21  ;;  %288 = vmatmul.bf16.vlgmr.msra.gmra.mxu1 %v164_v27  ;;  %v6610_v21 = vld [vmem:[#allocation8 + $0x130] sm:$0xf0]  ;;  %v6485_v22 = vor.u32 %v9554_v18, %v6482_v19  ;;  %v9582_v26 = vld [vmem:[#allocation8 + $0x104] sm:$0xf]  ;;  %v6717_v35 = vor.u32 %v9611_v30, %v6714_v31  ;;  %v9575_v36 = vld [vmem:[#allocation8 + $0xcc] sm:$0xf] }
  0x4d   :  { %732 = vmatpush.bf16.msrb.mxu1 %v6709_v24  ;;  %v6613_v23 = vor.u32 %v9586_v20, %v6610_v21  ;;  %v9550_v24 = vld [vmem:[#allocation8 + $0x4] sm:$0xf]  ;;  %v6466_v25 = vld [vmem:[#allocation8 + $0x10] sm:$0xf0]  ;;  %v9607_v38 = vld [vmem:[#allocation8 + $0x1cc] sm:$0xf] }
  0x4e   :  { %700 = vmatpush.bf16.msra.mxu2 %v6465_v58  ;;  %v6594_v27 = vld [vmem:[#allocation8 + $0x110] sm:$0xf0]  ;;  %v6469_v32 = vor.u32 %v9550_v24, %v6466_v25  ;;  %v6698_v39 = vld [vmem:[#allocation8 + $0x1d8] sm:$0xf0]  ;;  %v6552_v42 = vld [vmem:[#allocation8 + $0xa8] sm:$0xf] }
  0x4f   :  { %713 = vmatpush.bf16.msra.mxu3 %v6593_v59  ;;  %v6597_v33 = vor.u32 %v9582_v26, %v6594_v27  ;;  %v6701_v41 = vor.u32 %v9607_v38, %v6698_v39  ;;  %v9573_v43 = vld [vmem:[#allocation8 + $0xb4] sm:$0xf0]  ;;  %v6680_v45 = vld [vmem:[#allocation8 + $0x1a8] sm:$0xf]  ;;  %v9571_v47 = vld [vmem:[#allocation8 + $0xac] sm:$0xf] }
  0x50   :  { %720 = vmatpush.bf16.msrb.mxu0 %v6565_v34  ;;  %v6589_v34 = vor.u32 %v9579_v28, %v6586_v29  ;;  %v6553_v44 = vor.u32 %v9573_v43, %v6552_v42  ;;  %v9605_v46 = vld [vmem:[#allocation8 + $0x1b4] sm:$0xf0]  ;;  %v6554_v49 = vld [vmem:[#allocation8 + $0xb8] sm:$0xf0]  ;;  %v9603_v50 = vld [vmem:[#allocation8 + $0x1ac] sm:$0xf] }
  0x51   :  { %733 = vmatpush.bf16.msrb.mxu1 %v6693_v37  ;;  %v6570_v37 = vld [vmem:[#allocation8 + $0xd8] sm:$0xf0]  ;;  %v6536_v54 = vld [vmem:[#allocation8 + $0x88] sm:$0xf]  ;;  %v9569_v55 = vld [vmem:[#allocation8 + $0x94] sm:$0xf0] }
  0x52   :  { %745 = vmatpush.bf16.msrb.mxu2 %v6585_v60  ;;  %v6573_v40 = vor.u32 %v9575_v36, %v6570_v37  ;;  %v6682_v51 = vld [vmem:[#allocation8 + $0x1b8] sm:$0xf0]  ;;  %v6664_v56 = vld [vmem:[#allocation8 + $0x188] sm:$0xf]  ;;  %v6537_v57 = vor.u32 %v9569_v55, %v6536_v54  ;;  %v9601_v58 = vld [vmem:[#allocation8 + $0x194] sm:$0xf0] }
  0x53   :  { %758 = vmatpush.bf16.msrb.mxu3 %v6713_v63  ;;  %v6685_v53 = vor.u32 %v9603_v50, %v6682_v51  ;;  %v9567_v59 = vld [vmem:[#allocation8 + $0x8c] sm:$0xf]  ;;  %v6538_v60 = vld [vmem:[#allocation8 + $0x98] sm:$0xf0]  ;;  %v9565_v3 = vld [vmem:[#allocation8 + $0x74] sm:$0xf0] }
  0x54   :  { %721 = vmatpush.bf16.msrb.mxu0 %v6549_v48  ;;  %v6681_v48 = vor.u32 %v9605_v46, %v6680_v45  ;;  %v6541_v62 = vor.u32 %v9567_v59, %v6538_v60  ;;  %v9599_v63 = vld [vmem:[#allocation8 + $0x18c] sm:$0xf]  ;;  %v6666_v0 = vld [vmem:[#allocation8 + $0x198] sm:$0xf0]  ;;  %v6648_v4 = vld [vmem:[#allocation8 + $0x168] sm:$0xf] }
  0x55   :  { %734 = vmatpush.bf16.msrb.mxu1 %v6677_v52  ;;  %v6557_v52 = vor.u32 %v9571_v47, %v6554_v49  ;;  %v6669_v1 = vor.u32 %v9599_v63, %v6666_v0  ;;  %v9597_v6 = vld [vmem:[#allocation8 + $0x174] sm:$0xf0]  ;;  %v9563_v7 = vld [vmem:[#allocation8 + $0x6c] sm:$0xf]  ;;  %v6650_v12 = vld [vmem:[#allocation8 + $0x178] sm:$0xf0] }
  0x56   :  { %746 = vmatpush.bf16.msrb.mxu2 %v6569_v8  ;;  %v6522_v8 = vld [vmem:[#allocation8 + $0x78] sm:$0xf0]  ;;  %v6504_v13 = vld [vmem:[#allocation8 + $0x48] sm:$0xf]  ;;  %v9561_v15 = vld [vmem:[#allocation8 + $0x54] sm:$0xf0] }
  0x57   :  { %759 = vmatpush.bf16.msrb.mxu3 %v6697_v10  ;;  %v6525_v10 = vor.u32 %v9563_v7, %v6522_v8  ;;  %v6505_v18 = vor.u32 %v9561_v15, %v6504_v13  ;;  %v9559_v20 = vld [vmem:[#allocation8 + $0x4c] sm:$0xf]  ;;  %v6506_v21 = vld [vmem:[#allocation8 + $0x58] sm:$0xf0]  ;;  %v6488_v25 = vld [vmem:[#allocation8 + $0x28] sm:$0xf] }
  0x58   :  { %722 = vmatpush.bf16.msrb.mxu0 %v6533_v61  ;;  %v6665_v61 = vor.u32 %v9601_v58, %v6664_v56  ;;  %v6634_v24 = vld [vmem:[#allocation8 + $0x158] sm:$0xf0]  ;;  %v9557_v26 = vld [vmem:[#allocation8 + $0x34] sm:$0xf0]  ;;  %v6616_v28 = vld [vmem:[#allocation8 + $0x128] sm:$0xf] }
  0x59   :  { %735 = vmatpush.bf16.msrb.mxu1 %v6661_v2  ;;  %v6520_v2 = vld [vmem:[#allocation8 + $0x68] sm:$0xf]  ;;  %v9589_v29 = vld [vmem:[#allocation8 + $0x134] sm:$0xf0]  ;;  %v9555_v30 = vld [vmem:[#allocation8 + $0x2c] sm:$0xf]  ;;  %v6489_v31 = vor.u32 %v9557_v26, %v6488_v25 }
  0x5a   :  { %747 = vmatpush.bf16.msrb.mxu2 %v6553_v44  ;;  %v6521_v5 = vor.u32 %v9565_v3, %v6520_v2  ;;  %v6472_v36 = vld [vmem:[#allocation8 + $0x8] sm:$0xf]  ;;  %v9553_v37 = vld [vmem:[#allocation8 + $0x14] sm:$0xf0]  ;;  %v9551_v42 = vld [vmem:[#allocation8 + $0xc] sm:$0xf] }
  0x5b   :  { %760 = vmatpush.bf16.msrb.mxu3 %v6681_v48  ;;  %v6474_v43 = vld [vmem:[#allocation8 + $0x18] sm:$0xf0]  ;;  %v9583_v44 = vld [vmem:[#allocation8 + $0x10c] sm:$0xf]  ;;  %v6473_v46 = vor.u32 %v9553_v37, %v6472_v36  ;;  %v9738_v59 = vld [vmem:[#allocation11 + $0x3dc] sm:$0xf0] }
  0x5c   :  { %723 = vmatpush.bf16.msrb.mxu0 %v6517_v9  ;;  %v6649_v9 = vor.u32 %v9597_v6, %v6648_v4  ;;  %v6602_v45 = vld [vmem:[#allocation8 + $0x118] sm:$0xf0]  ;;  %v6477_v48 = vor.u32 %v9551_v42, %v6474_v43  ;;  %v6944_v60 = vld [vmem:[#allocation11 + $0x1c0] sm:$0xf]  ;;  %s6382_s8 = sshll.u32 %s10622_s6, 4  ;;  %s6384_s13 = sshll.u32 %s10985_s9, 4  ;;  %s6383_s8 = int_to_ptr.vmem [resolvable:$true] %s6382_s8  ;;  %s6385_s13 = int_to_ptr.hbm [resolvable:$true] %s6384_s13 }
  0x5d   :  { %736 = vmatpush.bf16.msrb.mxu1 %v6645_v11  ;;  %v9595_v11 = vld [vmem:[#allocation8 + $0x16c] sm:$0xf]  ;;  %v6605_v49 = vor.u32 %v9583_v44, %v6602_v45  ;;  %v181_v50 = vld [vmem:[#allocation7] sm:$0x3]  ;;  %v7712_v63 = vld [vmem:[#allocation11 + $0x7c0] sm:$0xf] }
  0x5e   :  { %748 = vmatpush.bf16.msrb.mxu2 %v6537_v57  ;;  %v6653_v14 = vor.u32 %v9595_v11, %v6650_v12  ;;  %v183_v51 = vperm.slane %v181_v50, 0  ;;  %v7200_v57 = vld [vmem:[#allocation11 + $0x3c0] sm:$0xf] }
  0x5f   :  { %761 = vmatpush.bf16.msrb.mxu3 %v6665_v61  ;;  %v7456_v2 = vld [vmem:[#allocation11 + $0x5c0] sm:$0xf]  ;;  %v7201_v6 = vor.u32 %v9738_v59, %v7200_v57 }
  0x60   :  { %724 = vmatpush.bf16.msrb.mxu0 %v6501_v16  ;;  %v6632_v16 = vld [vmem:[#allocation8 + $0x148] sm:$0xf]  ;;  %v9802_v3 = vld [vmem:[#allocation11 + $0x5dc] sm:$0xf0] }
  0x61   :  { %737 = vmatpush.bf16.msrb.mxu1 %v6629_v17  ;;  %v9593_v17 = vld [vmem:[#allocation8 + $0x154] sm:$0xf0]  ;;  %v7168_v7 = vld [vmem:[#allocation11 + $0x380] sm:$0xf] }
  0x62   :  { %749 = vmatpush.bf16.msrb.mxu2 %v6521_v5  ;;  %v6633_v19 = vor.u32 %v9593_v17, %v6632_v16  ;;  %v9730_v8 = vld [vmem:[#allocation11 + $0x39c] sm:$0xf0]  ;;  %v7457_v16 = vor.u32 %v9802_v3, %v7456_v2 }
  0x63   :  { %762 = vmatpush.bf16.msrb.mxu3 %v6649_v9  ;;  %v6912_v12 = vld [vmem:[#allocation11 + $0x180] sm:$0xf] }
  0x64   :  { %725 = vmatpush.bf16.msrb.mxu0 %v6485_v22  ;;  %v9591_v22 = vld [vmem:[#allocation8 + $0x14c] sm:$0xf]  ;;  %v9666_v13 = vld [vmem:[#allocation11 + $0x19c] sm:$0xf0] }
  0x65   :  { %738 = vmatpush.bf16.msrb.mxu1 %v6613_v23  ;;  %v6509_v23 = vor.u32 %v9559_v20, %v6506_v21  ;;  %v6637_v27 = vor.u32 %v9591_v22, %v6634_v24  ;;  %v7680_v15 = vld [vmem:[#allocation11 + $0x780] sm:$0xf]  ;;  %v7169_v21 = vor.u32 %v9730_v8, %v7168_v7  ;;  %v6913_v24 = vor.u32 %v9666_v13, %v6912_v12 }
  0x66   :  { %750 = vmatpush.bf16.msrb.mxu2 %v6505_v18  ;;  %v9858_v18 = vld [vmem:[#allocation11 + $0x79c] sm:$0xf0] }
  0x67   :  { %763 = vmatpush.bf16.msrb.mxu3 %v6633_v19  ;;  %v7424_v19 = vld [vmem:[#allocation11 + $0x580] sm:$0xf] }
  0x68   :  { %726 = vmatpush.bf16.msrb.mxu0 %v6469_v32  ;;  %v6490_v32 = vld [vmem:[#allocation8 + $0x38] sm:$0xf0]  ;;  %v9794_v20 = vld [vmem:[#allocation11 + $0x59c] sm:$0xf0] }
  0x69   :  { %739 = vmatpush.bf16.msrb.mxu1 %v6597_v33  ;;  %v9587_v33 = vld [vmem:[#allocation8 + $0x12c] sm:$0xf]  ;;  %v6493_v38 = vor.u32 %v9555_v30, %v6490_v32  ;;  %v7136_v22 = vld [vmem:[#allocation11 + $0x340] sm:$0xf] }
  0x6a   :  { %751 = vmatpush.bf16.msrb.mxu2 %v6489_v31  ;;  %v6880_v25 = vld [vmem:[#allocation11 + $0x140] sm:$0xf] }
  0x6b   :  { %v9658_v26 = vld [vmem:[#allocation11 + $0x15c] sm:$0xf0] }
  0x6c   :  { %771 = vmatpush.bf16.msra.mxu0 %v6589_v34  ;;  %v6618_v34 = vld [vmem:[#allocation8 + $0x138] sm:$0xf0]  ;;  %v9850_v30 = vld [vmem:[#allocation11 + $0x75c] sm:$0xf0]  ;;  %v6881_v36 = vor.u32 %v9658_v26, %v6880_v25  ;;  %v7202_v26 = vld [vmem:[#allocation11 + $0x3e0] sm:$0xf0] }
  0x6d   :  { %784 = vmatpush.bf16.msra.mxu1 %v6717_v35  ;;  %v6617_v35 = vor.u32 %v9589_v29, %v6616_v28  ;;  %v6621_v39 = vor.u32 %v9587_v33, %v6618_v34  ;;  %v7648_v28 = vld [vmem:[#allocation11 + $0x740] sm:$0xf]  ;;  %v7425_v29 = vor.u32 %v9794_v20, %v7424_v19 }
  0x6e   :  { %752 = vmatpush.bf16.msrb.mxu2 %v6473_v46  ;;  %v7392_v31 = vld [vmem:[#allocation11 + $0x540] sm:$0xf] }
  0x6f   :  { %764 = vmatpush.bf16.msrb.mxu3 %v6617_v35  ;;  %v9786_v32 = vld [vmem:[#allocation11 + $0x55c] sm:$0xf0] }
  0x70   :  { %772 = vmatpush.bf16.msra.mxu0 %v6573_v40  ;;  %v6600_v40 = vld [vmem:[#allocation8 + $0x108] sm:$0xf]  ;;  %v7104_v34 = vld [vmem:[#allocation11 + $0x300] sm:$0xf] }
  0x71   :  { %785 = vmatpush.bf16.msra.mxu1 %v6701_v41  ;;  %v9585_v41 = vld [vmem:[#allocation8 + $0x114] sm:$0xf0]  ;;  %v9714_v35 = vld [vmem:[#allocation11 + $0x31c] sm:$0xf0] }
  0x72   :  { %v6601_v47 = vor.u32 %v9585_v41, %v6600_v40  ;;  %v6848_v37 = vld [vmem:[#allocation11 + $0x100] sm:$0xf]  ;;  %v7393_v41 = vor.u32 %v9786_v32, %v7392_v31  ;;  %v7105_v45 = vor.u32 %v9714_v35, %v7104_v34  ;;  %v7714_v34 = vld [vmem:[#allocation11 + $0x7e0] sm:$0xf0] }
  0x73   :  { %v7616_v40 = vld [vmem:[#allocation11 + $0x700] sm:$0xf] }
  0x74   :  { %773 = vmatpush.bf16.msra.mxu0 %v6557_v52  ;;  %765 = vmatpush.bf16.msrb.mxu3 %v6601_v47  ;;  %v184_v52 = vperm.slane %v181_v50, 1  ;;  %v9842_v42 = vld [vmem:[#allocation11 + $0x71c] sm:$0xf0] }
  0x75   :  { %786 = vmatpush.bf16.msra.mxu1 %v6685_v53  ;;  %v7360_v43 = vld [vmem:[#allocation11 + $0x500] sm:$0xf] }
  0x76   :  { %v9778_v44 = vld [vmem:[#allocation11 + $0x51c] sm:$0xf0] }
  0x77   :  { %v7072_v46 = vld [vmem:[#allocation11 + $0x2c0] sm:$0xf] }
  0x78   :  { %774 = vmatpush.bf16.msra.mxu0 %v6541_v62  ;;  %v9674_v62 = vld [vmem:[#allocation11 + $0x1dc] sm:$0xf0] }
  0x79   :  { %787 = vmatpush.bf16.msra.mxu1 %v6669_v1  ;;  %v9866_v1 = vld [vmem:[#allocation11 + $0x7dc] sm:$0xf0]  ;;  %v6945_v9 = vor.u32 %v9674_v62, %v6944_v60 }
  0x7a   :  { %v9706_v47 = vld [vmem:[#allocation11 + $0x2dc] sm:$0xf0] }
  0x7b   :  { %v9642_v50 = vld [vmem:[#allocation11 + $0xdc] sm:$0xf0]  ;;  %v7073_v57 = vor.u32 %v9706_v47, %v7072_v46  ;;  %v7138_v46 = vld [vmem:[#allocation11 + $0x360] sm:$0xf0] }
  0x7c   :  { %775 = vmatpush.bf16.msra.mxu0 %v6525_v10  ;;  %v9698_v59 = vld [vmem:[#allocation11 + $0x29c] sm:$0xf0]  ;;  %v9654_v47 = vld [vmem:[#allocation11 + $0x144] sm:$0xf] }
  0x7d   :  { %788 = vmatpush.bf16.msra.mxu1 %v6653_v14  ;;  %v7713_v14 = vor.u32 %v9866_v1, %v7712_v63  ;;  %v9634_v62 = vld [vmem:[#allocation11 + $0x9c] sm:$0xf0] }
  0x7e   :  { %v9826_v2 = vld [vmem:[#allocation11 + $0x69c] sm:$0xf0] }
  0x7f   :  { %v7296_v3 = vld [vmem:[#allocation11 + $0x480] sm:$0xf] }
  0x80   :  { %776 = vmatpush.bf16.msra.mxu0 %v6509_v23  ;;  %v9722_v23 = vld [vmem:[#allocation11 + $0x35c] sm:$0xf0] }
  0x81   :  { %789 = vmatpush.bf16.msra.mxu1 %v6637_v27  ;;  %v7681_v27 = vor.u32 %v9858_v18, %v7680_v15  ;;  %v7137_v33 = vor.u32 %v9722_v23, %v7136_v22  ;;  %v7008_v7 = vld [vmem:[#allocation11 + $0x240] sm:$0xf] }
  0x82   :  { %v9690_v8 = vld [vmem:[#allocation11 + $0x25c] sm:$0xf0] }
  0x83   :  { %v9626_v12 = vld [vmem:[#allocation11 + $0x5c] sm:$0xf0]  ;;  %v7009_v18 = vor.u32 %v9690_v8, %v7008_v7  ;;  %v6818_v7 = vld [vmem:[#allocation11 + $0xe0] sm:$0xf0] }
  0x84   :  { %777 = vmatpush.bf16.msra.mxu0 %v6493_v38  ;;  %v9650_v38 = vld [vmem:[#allocation11 + $0x11c] sm:$0xf0]  ;;  %v9798_v8 = vld [vmem:[#allocation11 + $0x5c4] sm:$0xf] }
  0x85   :  { %790 = vmatpush.bf16.msra.mxu1 %v6621_v39  ;;  %v7649_v39 = vor.u32 %v9850_v30, %v7648_v28  ;;  %v9818_v15 = vld [vmem:[#allocation11 + $0x65c] sm:$0xf0]  ;;  %v6946_v28 = vld [vmem:[#allocation11 + $0x1e0] sm:$0xf0] }
  0x86   :  { %v9682_v19 = vld [vmem:[#allocation11 + $0x21c] sm:$0xf0] }
  0x87   :  { %v6720_v22 = vld [vmem:[#allocation11] sm:$0xf] }
  0x88   :  { %778 = vmatpush.bf16.msra.mxu0 %v6477_v48  ;;  %v6849_v48 = vor.u32 %v9650_v38, %v6848_v37  ;;  %v9618_v23 = vld [vmem:[#allocation11 + $0x1c] sm:$0xf0]  ;;  %v7170_v38 = vld [vmem:[#allocation11 + $0x3a0] sm:$0xf0] }
  0x89   :  { %791 = vmatpush.bf16.msra.mxu1 %v6605_v49  ;;  %v6816_v49 = vld [vmem:[#allocation11 + $0xc0] sm:$0xf]  ;;  %v6721_v32 = vor.u32 %v9618_v23, %v6720_v22  ;;  %v9678_v23 = vld [vmem:[#allocation11 + $0x204] sm:$0xf] }
  0x8a   :  { %v6817_v60 = vor.u32 %v9642_v50, %v6816_v49  ;;  %v9810_v30 = vld [vmem:[#allocation11 + $0x61c] sm:$0xf0] }
  0xc8   :  { %v276_v53 = vpop.f32.mrf.mxu0 }
  0xc9   :  { %v277_v54 = vadd.f32 %v276_v53, %v183_v51  ;;  %v289_v55 = vpop.f32.mrf.mxu1  ;;  %v7617_v51 = vor.u32 %v9842_v42, %v7616_v40  ;;  %v7361_v53 = vor.u32 %v9778_v44, %v7360_v43  ;;  %v6914_v40 = vld [vmem:[#allocation11 + $0x1a0] sm:$0xf0] }
  0xca   :  { %v290_v56 = vadd.f32 %v289_v55, %v184_v52  ;;  %v7584_v52 = vld [vmem:[#allocation11 + $0x6c0] sm:$0xf]  ;;  %v9718_v44 = vld [vmem:[#allocation11 + $0x344] sm:$0xf] }
  0xcb   :  { %v293_v58 = vmul.f32 0.2, %v277_v54  ;;  %v7328_v55 = vld [vmem:[#allocation11 + $0x4c0] sm:$0xf]  ;;  %v7141_v49 = vor.u32 %v9718_v44, %v7138_v46  ;;  %v9822_v44 = vld [vmem:[#allocation11 + $0x684] sm:$0xf] }
  0xcc   :  { %v294_v61 = vmul.f32 0.2, %v290_v56 }
  0xcd   :  { %v295_v0 = vmax.f32 %v277_v54, %v293_v58  ;;  %v9834_v54 = vld [vmem:[#allocation11 + $0x6dc] sm:$0xf0] }
  0xce   :  { %v296_v4 = vmax.f32 %v290_v56, %v294_v61  ;;  %v9770_v56 = vld [vmem:[#allocation11 + $0x4dc] sm:$0xf0]  ;;  %v7585_v63 = vor.u32 %v9834_v54, %v7584_v52  ;;  %v7106_v52 = vld [vmem:[#allocation11 + $0x320] sm:$0xf0] }
  0xcf   :  { %v10700_v5 = vpack.c.bf16 %v295_v0, %v295_v0  ;;  %v7040_v58 = vld [vmem:[#allocation11 + $0x280] sm:$0xf]  ;;  %v7329_v1 = vor.u32 %v9770_v56, %v7328_v55  ;;  %v9702_v54 = vld [vmem:[#allocation11 + $0x2c4] sm:$0xf] }
  0xd0   :  { %v10702_v10 = vpack.c.bf16 %v296_v4, %v296_v4  ;;  %v278_v11 = vpop.f32.mrf.mxu0  ;;  %v6784_v61 = vld [vmem:[#allocation11 + $0x80] sm:$0xf]  ;;  %v7074_v55 = vld [vmem:[#allocation11 + $0x2e0] sm:$0xf0] }
  0xd1   :  { %v291_v17 = vpop.f32.mrf.mxu1  ;;  %701 = vmatmul.bf16.vlgmr.msra.gmra.mxu2 %v10700_v5  ;;  %727 = vmatmul.bf16.vlgmr.msrb.gmra.mxu0 %v10700_v5  ;;  %v7552_v0 = vld [vmem:[#allocation11 + $0x680] sm:$0xf]  ;;  %v7077_v56 = vor.u32 %v9702_v54, %v7074_v55  ;;  %v7298_v54 = vld [vmem:[#allocation11 + $0x4a0] sm:$0xf0] }
  0xd2   :  { %714 = vmatmul.bf16.vlgmr.msra.gmra.mxu3 %v10702_v10  ;;  %740 = vmatmul.bf16.vlgmr.msrb.gmra.mxu1 %v10702_v10  ;;  %v9762_v4 = vld [vmem:[#allocation11 + $0x49c] sm:$0xf0]  ;;  %v7553_v13 = vor.u32 %v9826_v2, %v7552_v0  ;;  %v7682_v0 = vld [vmem:[#allocation11 + $0x7a0] sm:$0xf0] }
  0xd3   :  { %2376 = vmatpush.bf16.msra.mxu3 %v7201_v6  ;;  %2363 = vmatpush.bf16.msra.mxu2 %v6945_v9  ;;  %v7041_v6 = vor.u32 %v9698_v59, %v7040_v58  ;;  %v6785_v9 = vor.u32 %v9634_v62, %v6784_v61  ;;  %v6752_v11 = vld [vmem:[#allocation11 + $0x40] sm:$0xf]  ;;  %v6850_v58 = vld [vmem:[#allocation11 + $0x120] sm:$0xf0] }
  0xd4   :  { %2402 = vmatpush.bf16.msrb.mxu1 %v7713_v14  ;;  %2389 = vmatpush.bf16.msrb.mxu0 %v7457_v16  ;;  %v7520_v14 = vld [vmem:[#allocation11 + $0x640] sm:$0xf]  ;;  %v6753_v20 = vor.u32 %v9626_v12, %v6752_v11  ;;  %v7042_v61 = vld [vmem:[#allocation11 + $0x2a0] sm:$0xf0] }
  0xd5   :  { %v7264_v16 = vld [vmem:[#allocation11 + $0x440] sm:$0xf]  ;;  %v9854_v62 = vld [vmem:[#allocation11 + $0x784] sm:$0xf] }
  0xd6   :  { %v9754_v17 = vld [vmem:[#allocation11 + $0x45c] sm:$0xf0]  ;;  %v7458_v11 = vld [vmem:[#allocation11 + $0x5e0] sm:$0xf0] }
  0xd7   :  { %2377 = vmatpush.bf16.msra.mxu3 %v7169_v21  ;;  %2364 = vmatpush.bf16.msra.mxu2 %v6913_v24  ;;  %v9734_v21 = vld [vmem:[#allocation11 + $0x3c4] sm:$0xf]  ;;  %v7521_v24 = vor.u32 %v9818_v15, %v7520_v14  ;;  %v7265_v25 = vor.u32 %v9754_v17, %v7264_v16  ;;  %v9746_v2 = vld [vmem:[#allocation11 + $0x41c] sm:$0xf0]  ;;  %v7461_v12 = vor.u32 %v9798_v8, %v7458_v11  ;;  %v7208_v11 = vld [vmem:[#allocation11 + $0x3c8] sm:$0xf] }
  0xd8   :  { %2403 = vmatpush.bf16.msrb.mxu1 %v7681_v27  ;;  %2390 = vmatpush.bf16.msrb.mxu0 %v7425_v29  ;;  %v9670_v27 = vld [vmem:[#allocation11 + $0x1c4] sm:$0xf]  ;;  %v7488_v29 = vld [vmem:[#allocation11 + $0x600] sm:$0xf]  ;;  %v7205_v35 = vor.u32 %v9734_v21, %v7202_v26 }
  0xd9   :  { %v6949_v37 = vor.u32 %v9670_v27, %v6946_v28  ;;  %v7010_v14 = vld [vmem:[#allocation11 + $0x260] sm:$0xf0] }
  0xda   :  { %v7650_v16 = vld [vmem:[#allocation11 + $0x760] sm:$0xf0] }
  0xdb   :  { %2378 = vmatpush.bf16.msra.mxu3 %v7137_v33  ;;  %2365 = vmatpush.bf16.msra.mxu2 %v6881_v36  ;;  %v9862_v33 = vld [vmem:[#allocation11 + $0x7c4] sm:$0xf] }
  0xdc   :  { %2404 = vmatpush.bf16.msrb.mxu1 %v7649_v39  ;;  %2391 = vmatpush.bf16.msrb.mxu0 %v7393_v41  ;;  %v9726_v36 = vld [vmem:[#allocation11 + $0x384] sm:$0xf]  ;;  %v7489_v41 = vor.u32 %v9810_v30, %v7488_v29  ;;  %v7717_v42 = vor.u32 %v9862_v33, %v7714_v34 }
  0xdd   :  { %v9662_v39 = vld [vmem:[#allocation11 + $0x184] sm:$0xf]  ;;  %v7173_v43 = vor.u32 %v9726_v36, %v7170_v38 }
  0xde   :  { %v7426_v21 = vld [vmem:[#allocation11 + $0x5a0] sm:$0xf0] }
  0xdf   :  { %2379 = vmatpush.bf16.msra.mxu3 %v7105_v45  ;;  %2366 = vmatpush.bf16.msra.mxu2 %v6849_v48  ;;  %v6917_v45 = vor.u32 %v9662_v39, %v6914_v40  ;;  %v6882_v48 = vld [vmem:[#allocation11 + $0x160] sm:$0xf0] }
  0xe0   :  { %2405 = vmatpush.bf16.msrb.mxu1 %v7617_v51  ;;  %2392 = vmatpush.bf16.msrb.mxu0 %v7361_v53  ;;  %v6885_v50 = vor.u32 %v9654_v47, %v6882_v48  ;;  %v9710_v51 = vld [vmem:[#allocation11 + $0x304] sm:$0xf] }
  0xe1   :  { %753 = vmatmul.bf16.vlgmr.msrb.gmra.mxu2 %v10700_v5  ;;  %779 = vmatmul.bf16.vlgmr.msra.gmra.mxu0 %v10700_v5  ;;  %v7297_v5 = vor.u32 %v9762_v4, %v7296_v3  ;;  %v7109_v53 = vor.u32 %v9710_v51, %v7106_v52  ;;  %v7685_v3 = vor.u32 %v9854_v62, %v7682_v0  ;;  %v7618_v27 = vld [vmem:[#allocation11 + $0x720] sm:$0xf0] }
  0xe2   :  { %766 = vmatmul.bf16.vlgmr.msrb.gmra.mxu3 %v10702_v10  ;;  %792 = vmatmul.bf16.vlgmr.msra.gmra.mxu1 %v10702_v10  ;;  %v6976_v10 = vld [vmem:[#allocation11 + $0x200] sm:$0xf]  ;;  %v9622_v29 = vld [vmem:[#allocation11 + $0x44] sm:$0xf] }
  0xe3   :  { %2380 = vmatpush.bf16.msra.mxu3 %v7073_v57  ;;  %2367 = vmatpush.bf16.msra.mxu2 %v6817_v60  ;;  %v6977_v31 = vor.u32 %v9682_v19, %v6976_v10  ;;  %v9646_v57 = vld [vmem:[#allocation11 + $0x104] sm:$0xf] }
  0xe4   :  { %2406 = vmatpush.bf16.msrb.mxu1 %v7585_v63  ;;  %2393 = vmatpush.bf16.msrb.mxu0 %v7329_v1  ;;  %v6853_v59 = vor.u32 %v9646_v57, %v6850_v58  ;;  %v9694_v60 = vld [vmem:[#allocation11 + $0x284] sm:$0xf]  ;;  %v7232_v1 = vld [vmem:[#allocation11 + $0x400] sm:$0xf] }
  0xe5   :  { %v7045_v63 = vor.u32 %v9694_v60, %v7042_v61  ;;  %v7233_v4 = vor.u32 %v9746_v2, %v7232_v1  ;;  %v6786_v10 = vld [vmem:[#allocation11 + $0xa0] sm:$0xf0] }
  0xe6   :  { %v6754_v30 = vld [vmem:[#allocation11 + $0x60] sm:$0xf0] }
  0xe7   :  { %2381 = vmatpush.bf16.msra.mxu3 %v7041_v6  ;;  %2368 = vmatpush.bf16.msra.mxu2 %v6785_v9  ;;  %v9638_v6 = vld [vmem:[#allocation11 + $0xc4] sm:$0xf] }
  0xe8   :  { %2407 = vmatpush.bf16.msrb.mxu1 %v7553_v13  ;;  %2394 = vmatpush.bf16.msrb.mxu0 %v7297_v5  ;;  %v6821_v9 = vor.u32 %v9638_v6, %v6818_v7  ;;  %v9686_v13 = vld [vmem:[#allocation11 + $0x244] sm:$0xf] }
  0xe9   :  { %v9846_v5 = vld [vmem:[#allocation11 + $0x744] sm:$0xf]  ;;  %v7013_v15 = vor.u32 %v9686_v13, %v7010_v14 }
  0xea   :  { %v7653_v17 = vor.u32 %v9846_v5, %v7650_v16  ;;  %v7394_v33 = vld [vmem:[#allocation11 + $0x560] sm:$0xf0] }
  0xeb   :  { %2382 = vmatpush.bf16.msra.mxu3 %v7009_v18  ;;  %2369 = vmatpush.bf16.msra.mxu2 %v6753_v20  ;;  %v9630_v18 = vld [vmem:[#allocation11 + $0x84] sm:$0xf] }
  0xec   :  { %2408 = vmatpush.bf16.msrb.mxu1 %v7521_v24  ;;  %2395 = vmatpush.bf16.msrb.mxu0 %v7265_v25  ;;  %v6789_v19 = vor.u32 %v9630_v18, %v6786_v10  ;;  %v9790_v20 = vld [vmem:[#allocation11 + $0x584] sm:$0xf] }
  0xed   :  { %v7429_v22 = vor.u32 %v9790_v20, %v7426_v21  ;;  %v6978_v24 = vld [vmem:[#allocation11 + $0x220] sm:$0xf0]  ;;  %v7176_v20 = vld [vmem:[#allocation11 + $0x388] sm:$0xf] }
  0xee   :  { %v9838_v25 = vld [vmem:[#allocation11 + $0x704] sm:$0xf]  ;;  %v6981_v26 = vor.u32 %v9678_v23, %v6978_v24  ;;  %v9731_v21 = vld [vmem:[#allocation11 + $0x3a4] sm:$0xf0] }
  0xef   :  { %2383 = vmatpush.bf16.msra.mxu3 %v6977_v31  ;;  %2370 = vmatpush.bf16.msra.mxu2 %v6721_v32  ;;  %v7621_v28 = vor.u32 %v9838_v25, %v7618_v27  ;;  %v9782_v31 = vld [vmem:[#allocation11 + $0x544] sm:$0xf]  ;;  %v6757_v32 = vor.u32 %v9622_v29, %v6754_v30  ;;  %v6952_v23 = vld [vmem:[#allocation11 + $0x1c8] sm:$0xf]  ;;  %v7177_v25 = vor.u32 %v9731_v21, %v7176_v20 }
  0xf0   :  { %2409 = vmatpush.bf16.msrb.mxu1 %v7489_v41  ;;  %2396 = vmatpush.bf16.msrb.mxu0 %v7233_v4  ;;  %v7397_v34 = vor.u32 %v9782_v31, %v7394_v33  ;;  %v7586_v36 = vld [vmem:[#allocation11 + $0x6e0] sm:$0xf0]  ;;  %v9675_v24 = vld [vmem:[#allocation11 + $0x1e4] sm:$0xf0] }
  0xf1   :  { %v9614_v38 = vld [vmem:[#allocation11 + $0x4] sm:$0xf]  ;;  %v9723_v29 = vld [vmem:[#allocation11 + $0x364] sm:$0xf0]  ;;  %v6953_v31 = vor.u32 %v9675_v24, %v6952_v23 }
  0xf2   :  { %v6722_v39 = vld [vmem:[#allocation11 + $0x20] sm:$0xf0]  ;;  %v6792_v23 = vld [vmem:[#allocation11 + $0x88] sm:$0xf] }
  0xf3   :  { %2428 = vmatpush.bf16.msrb.mxu3 %v7205_v35  ;;  %2415 = vmatpush.bf16.msrb.mxu2 %v6949_v37  ;;  %v9830_v35 = vld [vmem:[#allocation11 + $0x6c4] sm:$0xf]  ;;  %v6725_v41 = vor.u32 %v9614_v38, %v6722_v39 }
  0xf4   :  { %2454 = vmatpush.bf16.msra.mxu1 %v7717_v42  ;;  %2441 = vmatpush.bf16.msra.mxu0 %v7461_v12  ;;  %v7589_v37 = vor.u32 %v9830_v35, %v7586_v36  ;;  %v9774_v40 = vld [vmem:[#allocation11 + $0x504] sm:$0xf]  ;;  %v9739_v12 = vld [vmem:[#allocation11 + $0x3e4] sm:$0xf0] }
  0xf5   :  { %v7362_v42 = vld [vmem:[#allocation11 + $0x520] sm:$0xf0]  ;;  %v9667_v35 = vld [vmem:[#allocation11 + $0x1a4] sm:$0xf0] }
  0xf6   :  { %v9766_v47 = vld [vmem:[#allocation11 + $0x4c4] sm:$0xf] }
  0xf7   :  { %2429 = vmatpush.bf16.msrb.mxu3 %v7173_v43  ;;  %2416 = vmatpush.bf16.msrb.mxu2 %v6917_v45  ;;  %v7365_v43 = vor.u32 %v9774_v40, %v7362_v42  ;;  %v7554_v45 = vld [vmem:[#allocation11 + $0x6a0] sm:$0xf0]  ;;  %v7112_v40 = vld [vmem:[#allocation11 + $0x308] sm:$0xf] }
  0xf8   :  { %2455 = vmatpush.bf16.msra.mxu1 %v7685_v3  ;;  %2442 = vmatpush.bf16.msra.mxu0 %v7429_v22  ;;  %v7557_v46 = vor.u32 %v9822_v44, %v7554_v45  ;;  %v7330_v48 = vld [vmem:[#allocation11 + $0x4e0] sm:$0xf0]  ;;  %v6888_v45 = vld [vmem:[#allocation11 + $0x148] sm:$0xf] }
  0xf9   :  { %v7522_v51 = vld [vmem:[#allocation11 + $0x660] sm:$0xf0] }
  0xfa   :  { %v7490_v57 = vld [vmem:[#allocation11 + $0x620] sm:$0xf0] }
  0xfb   :  { %2430 = vmatpush.bf16.msrb.mxu3 %v7141_v49  ;;  %2417 = vmatpush.bf16.msrb.mxu2 %v6885_v50  ;;  %v7333_v49 = vor.u32 %v9766_v47, %v7330_v48  ;;  %v9814_v50 = vld [vmem:[#allocation11 + $0x644] sm:$0xf]  ;;  %v7080_v48 = vld [vmem:[#allocation11 + $0x2c8] sm:$0xf] }
  0xfc   :  { %2456 = vmatpush.bf16.msra.mxu1 %v7653_v17  ;;  %2443 = vmatpush.bf16.msra.mxu0 %v7397_v34  ;;  %v7525_v52 = vor.u32 %v9814_v50, %v7522_v51  ;;  %v9750_v60 = vld [vmem:[#allocation11 + $0x444] sm:$0xf]  ;;  %v7209_v17 = vor.u32 %v9739_v12, %v7208_v11  ;;  %v6920_v34 = vld [vmem:[#allocation11 + $0x188] sm:$0xf] }
  0xfd   :  { %v7266_v61 = vld [vmem:[#allocation11 + $0x460] sm:$0xf0]  ;;  %v6921_v42 = vor.u32 %v9667_v35, %v6920_v34  ;;  %v7720_v51 = vld [vmem:[#allocation11 + $0x7c8] sm:$0xf] }
  0xfe   :  { %v7269_v62 = vor.u32 %v9750_v60, %v7266_v61  ;;  %v9742_v0 = vld [vmem:[#allocation11 + $0x404] sm:$0xf]  ;;  %v9651_v60 = vld [vmem:[#allocation11 + $0x124] sm:$0xf0] }
  0xff   :  { %2431 = vmatpush.bf16.msrb.mxu3 %v7109_v53  ;;  %2418 = vmatpush.bf16.msrb.mxu2 %v6853_v59  ;;  %v9758_v53 = vld [vmem:[#allocation11 + $0x484] sm:$0xf]  ;;  %v10712_v59 = vld [vmem:[#allocation10] sm:$0xf]  ;;  %v7464_v12 = vld [vmem:[#allocation11 + $0x5c8] sm:$0xf] }
 0x100   :  { %2457 = vmatpush.bf16.msra.mxu1 %v7621_v28  ;;  %2444 = vmatpush.bf16.msra.mxu0 %v7365_v43  ;;  %v7301_v55 = vor.u32 %v9758_v53, %v7298_v54  ;;  %v7234_v1 = vld [vmem:[#allocation11 + $0x420] sm:$0xf0]  ;;  %v365_v8 = vperm.slane %v10712_v59, 0  ;;  %v368_v27 = vperm.slane %v10712_v59, 3  ;;  %v7144_v28 = vld [vmem:[#allocation11 + $0x348] sm:$0xf] }
 0x101   :  { %v7237_v2 = vor.u32 %v9742_v0, %v7234_v1  ;;  %v367_v44 = vperm.slane %v10712_v59, 2  ;;  %v7624_v34 = vld [vmem:[#allocation11 + $0x708] sm:$0xf] }
 0x102   :  { %v9843_v35 = vld [vmem:[#allocation11 + $0x724] sm:$0xf0] }
 0x103   :  { %2432 = vmatpush.bf16.msrb.mxu3 %v7077_v56  ;;  %2419 = vmatpush.bf16.msrb.mxu2 %v6821_v9  ;;  %v9806_v56 = vld [vmem:[#allocation11 + $0x604] sm:$0xf] }
 0x104   :  { %2458 = vmatpush.bf16.msra.mxu1 %v7589_v37  ;;  %2445 = vmatpush.bf16.msra.mxu0 %v7333_v49  ;;  %v7493_v58 = vor.u32 %v9806_v56, %v7490_v57  ;;  %v7145_v37 = vor.u32 %v9723_v29, %v7144_v28  ;;  %v9707_v49 = vld [vmem:[#allocation11 + $0x2e4] sm:$0xf0] }
 0x105   :  { %v9795_v28 = vld [vmem:[#allocation11 + $0x5a4] sm:$0xf0] }
 0x107   :  { %2433 = vmatpush.bf16.msrb.mxu3 %v7045_v63  ;;  %2420 = vmatpush.bf16.msrb.mxu2 %v6789_v19  ;;  %v366_v63 = vperm.slane %v10712_v59, 1  ;;  %v7081_v59 = vor.u32 %v9707_v49, %v7080_v48  ;;  %v9835_v48 = vld [vmem:[#allocation11 + $0x6e4] sm:$0xf0] }
 0x108   :  { %2459 = vmatpush.bf16.msra.mxu1 %v7557_v46  ;;  %2446 = vmatpush.bf16.msra.mxu0 %v7301_v55  ;;  %v9659_v46 = vld [vmem:[#allocation11 + $0x164] sm:$0xf0] }
 0x109   :  { %v6889_v54 = vor.u32 %v9659_v46, %v6888_v45  ;;  %v7625_v45 = vor.u32 %v9843_v35, %v7624_v34  ;;  %v7272_v34 = vld [vmem:[#allocation11 + $0x448] sm:$0xf] }
 0x10a   :  { %v9755_v35 = vld [vmem:[#allocation11 + $0x464] sm:$0xf0] }
 0x10b   :  { %2434 = vmatpush.bf16.msrb.mxu3 %v7013_v15  ;;  %2421 = vmatpush.bf16.msrb.mxu2 %v6757_v32 }
 0x10c   :  { %2460 = vmatpush.bf16.msra.mxu1 %v7525_v52  ;;  %2447 = vmatpush.bf16.msra.mxu0 %v7269_v62  ;;  %v9867_v52 = vld [vmem:[#allocation11 + $0x7e4] sm:$0xf0] }
 0x10d   :  { %v7721_v62 = vor.u32 %v9867_v52, %v7720_v51  ;;  %v9727_v51 = vld [vmem:[#allocation11 + $0x38c] sm:$0xf] }
 0x10e   :  { %v7178_v52 = vld [vmem:[#allocation11 + $0x3a8] sm:$0xf0] }
 0x10f   :  { %2435 = vmatpush.bf16.msrb.mxu3 %v6981_v26  ;;  %2422 = vmatpush.bf16.msrb.mxu2 %v6725_v41  ;;  %v9715_v41 = vld [vmem:[#allocation11 + $0x324] sm:$0xf0] }
 0x110   :  { %2461 = vmatpush.bf16.msra.mxu1 %v7493_v58  ;;  %2448 = vmatpush.bf16.msra.mxu0 %v7237_v2  ;;  %v7113_v47 = vor.u32 %v9715_v41, %v7112_v40  ;;  %v6856_v58 = vld [vmem:[#allocation11 + $0x108] sm:$0xf] }
 0x111   :  { %v6760_v40 = vld [vmem:[#allocation11 + $0x48] sm:$0xf] }
 0x112   :  { %v9627_v41 = vld [vmem:[#allocation11 + $0x64] sm:$0xf0] }
 0x113   :  { %v6761_v49 = vor.u32 %v9627_v41, %v6760_v40  ;;  %v9695_v41 = vld [vmem:[#allocation11 + $0x28c] sm:$0xf] }
 0x14e   :  { %v728_v3 = vpop.f32.mrf.mxu0 }
 0x14f   :  { %v729_v4 = vadd.f32 %v728_v3, %v366_v63  ;;  %v741_v6 = vpop.f32.mrf.mxu1  ;;  %v7048_v63 = vld [vmem:[#allocation11 + $0x288] sm:$0xf] }
 0x150   :  { %v9699_v3 = vld [vmem:[#allocation11 + $0x2a4] sm:$0xf0] }
 0x151   :  { %v742_v7 = vadd.f32 %v741_v6, %v729_v4  ;;  %v7688_v4 = vld [vmem:[#allocation11 + $0x788] sm:$0xf] }
 0x152   :  { %v9859_v6 = vld [vmem:[#allocation11 + $0x7a4] sm:$0xf0] }
 0x153   :  { %v798_v9 = vmul.f32 0.2, %v742_v7 }
 0x154   :  { %v702_v13 = vpop.f32.mrf.mxu2 }
 0x155   :  { %v802_v14 = vmax.f32 %v742_v7, %v798_v9  ;;  %v703_v5 = vadd.f32 %v702_v13, %v365_v8  ;;  %v715_v15 = vpop.f32.mrf.mxu3  ;;  %v6857_v7 = vor.u32 %v9651_v60, %v6856_v58  ;;  %v6824_v8 = vld [vmem:[#allocation11 + $0xc8] sm:$0xf]  ;;  %v9671_v58 = vld [vmem:[#allocation11 + $0x1cc] sm:$0xf] }
 0x156   :  { %v730_v16 = vpop.f32.mrf.mxu0  ;;  %v9643_v9 = vld [vmem:[#allocation11 + $0xe4] sm:$0xf0]  ;;  %v6954_v60 = vld [vmem:[#allocation11 + $0x1e8] sm:$0xf0] }
 0x157   :  { %v10716_v18 = vpack.c.bf16 %v802_v14, %v802_v14  ;;  %v716_v10 = vadd.f32 %v715_v15, %v703_v5  ;;  %v743_v19 = vpop.f32.mrf.mxu1  ;;  %v9803_v13 = vld [vmem:[#allocation11 + $0x5e4] sm:$0xf0]  ;;  %v7049_v14 = vor.u32 %v9699_v3, %v7048_v63  ;;  %v7689_v5 = vor.u32 %v9859_v6, %v7688_v4  ;;  %v7146_v3 = vld [vmem:[#allocation11 + $0x368] sm:$0xf0] }
 0x158   :  { %v7016_v15 = vld [vmem:[#allocation11 + $0x248] sm:$0xf]  ;;  %v6825_v21 = vor.u32 %v9643_v9, %v6824_v8  ;;  %v6957_v4 = vor.u32 %v9671_v58, %v6954_v60  ;;  %v9663_v9 = vld [vmem:[#allocation11 + $0x18c] sm:$0xf] }
 0x159   :  { %v797_v22 = vmul.f32 0.2, %v716_v10  ;;  %2384 = vmatmul.bf16.vlgmr.msra.gmra.mxu3 %v10716_v18  ;;  %v9851_v19 = vld [vmem:[#allocation11 + $0x764] sm:$0xf0]  ;;  %v9847_v58 = vld [vmem:[#allocation11 + $0x74c] sm:$0xf] }
 0x15a   :  { %2480 = vmatpush.bf16.msra.mxu3 %v7209_v17  ;;  %v9691_v17 = vld [vmem:[#allocation11 + $0x264] sm:$0xf0]  ;;  %v7658_v60 = vld [vmem:[#allocation11 + $0x768] sm:$0xf0] }
 0x15b   :  { %v801_v26 = vmax.f32 %v716_v10, %v797_v22  ;;  %v7656_v10 = vld [vmem:[#allocation11 + $0x748] sm:$0xf]  ;;  %v7465_v22 = vor.u32 %v9803_v13, %v7464_v12  ;;  %v7017_v29 = vor.u32 %v9691_v17, %v7016_v15  ;;  %v9711_v15 = vld [vmem:[#allocation11 + $0x30c] sm:$0xf] }
 0x15c   :  { %v704_v30 = vpop.f32.mrf.mxu2  ;;  %v7336_v6 = vld [vmem:[#allocation11 + $0x4c8] sm:$0xf] }
 0x15d   :  { %v10720_v32 = vpack.c.bf16 %v801_v26, %v801_v26  ;;  %v717_v33 = vpop.f32.mrf.mxu3  ;;  %v9635_v26 = vld [vmem:[#allocation11 + $0xa4] sm:$0xf0]  ;;  %v7657_v30 = vor.u32 %v9851_v19, %v7656_v10 }
 0x15e   :  { %2481 = vmatpush.bf16.msra.mxu3 %v7177_v25  ;;  %v780_v36 = vpop.f32.mrf.mxu0  ;;  %v9683_v33 = vld [vmem:[#allocation11 + $0x224] sm:$0xf0] }
 0x15f   :  { %v781_v38 = vadd.f32 %v780_v36, %v368_v27  ;;  %v793_v39 = vpop.f32.mrf.mxu1  ;;  %2371 = vmatmul.bf16.vlgmr.msra.gmra.mxu2 %v10720_v32  ;;  %v7432_v27 = vld [vmem:[#allocation11 + $0x588] sm:$0xf]  ;;  %v6793_v36 = vor.u32 %v9635_v26, %v6792_v23 }
 0x160   :  { %2467 = vmatpush.bf16.msra.mxu2 %v6953_v31  ;;  %v6984_v31 = vld [vmem:[#allocation11 + $0x208] sm:$0xf] }
 0x161   :  { %v794_v43 = vadd.f32 %v793_v39, %v781_v38  ;;  %v9735_v38 = vld [vmem:[#allocation11 + $0x3cc] sm:$0xf]  ;;  %v7528_v13 = vld [vmem:[#allocation11 + $0x648] sm:$0xf] }
 0x162   :  { %2482 = vmatpush.bf16.msra.mxu3 %v7145_v37  ;;  %v7433_v37 = vor.u32 %v9795_v28, %v7432_v27  ;;  %v7210_v39 = vld [vmem:[#allocation11 + $0x3e8] sm:$0xf0]  ;;  %v7304_v10 = vld [vmem:[#allocation11 + $0x488] sm:$0xf] }
 0x163   :  { %v800_v50 = vmul.f32 0.2, %v794_v43  ;;  %v7213_v46 = vor.u32 %v9735_v38, %v7210_v39  ;;  %v9763_v19 = vld [vmem:[#allocation11 + $0x4a4] sm:$0xf0]  ;;  %v9703_v27 = vld [vmem:[#allocation11 + $0x2cc] sm:$0xf] }
 0x164   :  { %2468 = vmatpush.bf16.msra.mxu2 %v6921_v42  ;;  %v754_v53 = vpop.f32.mrf.mxu2  ;;  %v7400_v42 = vld [vmem:[#allocation11 + $0x548] sm:$0xf]  ;;  %v7305_v28 = vor.u32 %v9763_v19, %v7304_v10  ;;  %v6858_v38 = vld [vmem:[#allocation11 + $0x128] sm:$0xf0] }
 0x165   :  { %v804_v55 = vmax.f32 %v794_v43, %v800_v50  ;;  %v755_v56 = vadd.f32 %v754_v53, %v367_v44  ;;  %v767_v57 = vpop.f32.mrf.mxu3  ;;  %v9787_v43 = vld [vmem:[#allocation11 + $0x564] sm:$0xf0]  ;;  %v6985_v44 = vor.u32 %v9683_v33, %v6984_v31  ;;  %v7722_v31 = vld [vmem:[#allocation11 + $0x7e8] sm:$0xf0] }
 0x166   :  { %2483 = vmatpush.bf16.msra.mxu3 %v7113_v47  ;;  %v782_v61 = vpop.f32.mrf.mxu0  ;;  %v7592_v47 = vld [vmem:[#allocation11 + $0x6c8] sm:$0xf]  ;;  %v7401_v50 = vor.u32 %v9787_v43, %v7400_v42  ;;  %v7273_v42 = vor.u32 %v9755_v35, %v7272_v34  ;;  %v7050_v43 = vld [vmem:[#allocation11 + $0x2a8] sm:$0xf0]  ;;  %v6960_v34 = vld [vmem:[#allocation11 + $0x1d0] sm:$0xf] }
 0x167   :  { %v10724_v0 = vpack.c.bf16 %v804_v55, %v804_v55  ;;  %v768_v1 = vadd.f32 %v767_v57, %v755_v56  ;;  %v795_v2 = vpop.f32.mrf.mxu1  ;;  %v6728_v53 = vld [vmem:[#allocation11 + $0x8] sm:$0xf]  ;;  %v7593_v57 = vor.u32 %v9835_v48, %v7592_v47  ;;  %v7181_v61 = vor.u32 %v9727_v51, %v7178_v52  ;;  %v9799_v51 = vld [vmem:[#allocation11 + $0x5cc] sm:$0xf]  ;;  %v9676_v35 = vld [vmem:[#allocation11 + $0x1ec] sm:$0xf0] }
 0x168   :  { %2469 = vmatpush.bf16.msra.mxu2 %v6889_v54  ;;  %v9619_v54 = vld [vmem:[#allocation11 + $0x24] sm:$0xf0]  ;;  %v9719_v2 = vld [vmem:[#allocation11 + $0x34c] sm:$0xf] }
 0x169   :  { %v799_v11 = vmul.f32 0.2, %v768_v1  ;;  %2410 = vmatmul.bf16.vlgmr.msrb.gmra.mxu1 %v10724_v0  ;;  %2436 = vmatmul.bf16.vlgmr.msrb.gmra.mxu3 %v10716_v18  ;;  %v7368_v55 = vld [vmem:[#allocation11 + $0x508] sm:$0xf]  ;;  %v6729_v63 = vor.u32 %v9619_v54, %v6728_v53  ;;  %v7149_v12 = vor.u32 %v9719_v2, %v7146_v3  ;;  %v7466_v52 = vld [vmem:[#allocation11 + $0x5e8] sm:$0xf0]  ;;  %v7053_v53 = vor.u32 %v9695_v41, %v7050_v43 }
 0x16a   :  { %2484 = vmatpush.bf16.msra.mxu3 %v7081_v59  ;;  %2506 = vmatpush.bf16.msrb.mxu1 %v7721_v62  ;;  %v9779_v56 = vld [vmem:[#allocation11 + $0x524] sm:$0xf0]  ;;  %v7434_v2 = vld [vmem:[#allocation11 + $0x5a8] sm:$0xf0]  ;;  %v7152_v41 = vld [vmem:[#allocation11 + $0x350] sm:$0xf]  ;;  %v6961_v43 = vor.u32 %v9676_v35, %v6960_v34 }
 0x16b   :  { %v803_v16 = vmax.f32 %v768_v1, %v799_v11  ;;  %v7560_v59 = vld [vmem:[#allocation11 + $0x688] sm:$0xf]  ;;  %v7369_v1 = vor.u32 %v9779_v56, %v7368_v55  ;;  %v6922_v11 = vld [vmem:[#allocation11 + $0x1a8] sm:$0xf0] }
 0x16c   :  { %2470 = vmatpush.bf16.msra.mxu2 %v6857_v7  ;;  %v756_v20 = vpop.f32.mrf.mxu2  ;;  %v9827_v62 = vld [vmem:[#allocation11 + $0x6a4] sm:$0xf0]  ;;  %v6925_v17 = vor.u32 %v9663_v9, %v6922_v11  ;;  %v9687_v55 = vld [vmem:[#allocation11 + $0x24c] sm:$0xf] }
 0x16d   :  { %v10728_v24 = vpack.c.bf16 %v803_v16, %v803_v16  ;;  %v769_v25 = vpop.f32.mrf.mxu3  ;;  %v9771_v7 = vld [vmem:[#allocation11 + $0x4e4] sm:$0xf0]  ;;  %v7561_v8 = vor.u32 %v9827_v62, %v7560_v59  ;;  %v7114_v16 = vld [vmem:[#allocation11 + $0x328] sm:$0xf0]  ;;  %v7469_v59 = vor.u32 %v9799_v51, %v7466_v52 }
 0x16e   :  { %2485 = vmatpush.bf16.msra.mxu3 %v7049_v14  ;;  %2507 = vmatpush.bf16.msrb.mxu1 %v7689_v5  ;;  %v9819_v14 = vld [vmem:[#allocation11 + $0x664] sm:$0xf0]  ;;  %v7337_v5 = vor.u32 %v9771_v7, %v7336_v6  ;;  %v7117_v23 = vor.u32 %v9711_v15, %v7114_v16  ;;  %v9631_v62 = vld [vmem:[#allocation11 + $0x8c] sm:$0xf] }
 0x16f   :  { %2397 = vmatmul.bf16.vlgmr.msrb.gmra.mxu0 %v10728_v24  ;;  %2423 = vmatmul.bf16.vlgmr.msrb.gmra.mxu2 %v10720_v32  ;;  %v7529_v20 = vor.u32 %v9819_v14, %v7528_v13  ;;  %v7496_v25 = vld [vmem:[#allocation11 + $0x608] sm:$0xf]  ;;  %v9679_v6 = vld [vmem:[#allocation11 + $0x20c] sm:$0xf]  ;;  %v7216_v13 = vld [vmem:[#allocation11 + $0x3d0] sm:$0xf] }
 0x170   :  { %2471 = vmatpush.bf16.msra.mxu2 %v6825_v21  ;;  %2493 = vmatpush.bf16.msrb.mxu0 %v7465_v22  ;;  %v9655_v21 = vld [vmem:[#allocation11 + $0x14c] sm:$0xf]  ;;  %v9811_v26 = vld [vmem:[#allocation11 + $0x624] sm:$0xf0]  ;;  %v9740_v14 = vld [vmem:[#allocation11 + $0x3ec] sm:$0xf0] }
 0x171   :  { %v6890_v22 = vld [vmem:[#allocation11 + $0x168] sm:$0xf0]  ;;  %v7240_v47 = vld [vmem:[#allocation11 + $0x408] sm:$0xf] }
 0x172   :  { %2486 = vmatpush.bf16.msra.mxu3 %v7017_v29  ;;  %2508 = vmatpush.bf16.msrb.mxu1 %v7657_v30  ;;  %v7082_v29 = vld [vmem:[#allocation11 + $0x2e8] sm:$0xf0]  ;;  %v6893_v33 = vor.u32 %v9655_v21, %v6890_v22  ;;  %v9747_v48 = vld [vmem:[#allocation11 + $0x424] sm:$0xf0] }
 0x173   :  { %v9863_v30 = vld [vmem:[#allocation11 + $0x7cc] sm:$0xf]  ;;  %v7085_v39 = vor.u32 %v9703_v27, %v7082_v29  ;;  %v7241_v56 = vor.u32 %v9747_v48, %v7240_v47  ;;  %v9732_v27 = vld [vmem:[#allocation11 + $0x3ac] sm:$0xf0] }
 0x174   :  { %2472 = vmatpush.bf16.msra.mxu2 %v6793_v36  ;;  %2494 = vmatpush.bf16.msrb.mxu0 %v7433_v37  ;;  %v7497_v36 = vor.u32 %v9811_v26, %v7496_v25  ;;  %v9647_v37 = vld [vmem:[#allocation11 + $0x10c] sm:$0xf]  ;;  %v7725_v40 = vor.u32 %v9863_v30, %v7722_v31  ;;  %v7184_v26 = vld [vmem:[#allocation11 + $0x390] sm:$0xf] }
 0x175   :  { %v6986_v7 = vld [vmem:[#allocation11 + $0x228] sm:$0xf0]  ;;  %v6928_v47 = vld [vmem:[#allocation11 + $0x190] sm:$0xf] }
 0x176   :  { %2487 = vmatpush.bf16.msra.mxu3 %v6985_v44  ;;  %2509 = vmatpush.bf16.msrb.mxu1 %v7625_v45  ;;  %v9855_v44 = vld [vmem:[#allocation11 + $0x78c] sm:$0xf]  ;;  %v6989_v10 = vor.u32 %v9679_v6, %v6986_v7  ;;  %v9668_v48 = vld [vmem:[#allocation11 + $0x1ac] sm:$0xf0] }
 0x177   :  { %v7690_v45 = vld [vmem:[#allocation11 + $0x7a8] sm:$0xf0]  ;;  %v9868_v6 = vld [vmem:[#allocation11 + $0x7ec] sm:$0xf0] }
 0x178   :  { %2473 = vmatpush.bf16.msra.mxu2 %v6761_v49  ;;  %2495 = vmatpush.bf16.msrb.mxu0 %v7401_v50  ;;  %v9639_v49 = vld [vmem:[#allocation11 + $0xcc] sm:$0xf]  ;;  %v7693_v54 = vor.u32 %v9855_v44, %v7690_v45 }
 0x179   :  { %2462 = vmatmul.bf16.vlgmr.msra.gmra.mxu1 %v10724_v0  ;;  %2488 = vmatmul.bf16.vlgmr.msra.gmra.mxu3 %v10716_v18  ;;  %v6826_v50 = vld [vmem:[#allocation11 + $0xe8] sm:$0xf0] }
 0x17a   :  { %2532 = vmatpush.bf16.msrb.mxu3 %v7213_v46  ;;  %2510 = vmatpush.bf16.msrb.mxu1 %v7593_v57  ;;  %v6861_v46 = vor.u32 %v9647_v37, %v6858_v38  ;;  %v7018_v57 = vld [vmem:[#allocation11 + $0x268] sm:$0xf0] }
 0x17b   :  { %v7021_v3 = vor.u32 %v9687_v55, %v7018_v57  ;;  %v7626_v9 = vld [vmem:[#allocation11 + $0x728] sm:$0xf0]  ;;  %v6929_v55 = vor.u32 %v9668_v48, %v6928_v47  ;;  %v9844_v47 = vld [vmem:[#allocation11 + $0x72c] sm:$0xf0] }
 0x17c   :  { %2474 = vmatpush.bf16.msra.mxu2 %v6729_v63  ;;  %2496 = vmatpush.bf16.msrb.mxu0 %v7369_v1  ;;  %v6794_v63 = vld [vmem:[#allocation11 + $0xa8] sm:$0xf0] }
 0x17d   :  { %v9791_v1 = vld [vmem:[#allocation11 + $0x58c] sm:$0xf]  ;;  %v6797_v11 = vor.u32 %v9631_v62, %v6794_v63 }
 0x17e   :  { %2533 = vmatpush.bf16.msrb.mxu3 %v7181_v61  ;;  %2511 = vmatpush.bf16.msrb.mxu1 %v7561_v8  ;;  %v6829_v61 = vor.u32 %v9639_v49, %v6826_v50  ;;  %v9839_v8 = vld [vmem:[#allocation11 + $0x70c] sm:$0xf] }
 0x17f   :  { %2449 = vmatmul.bf16.vlgmr.msra.gmra.mxu0 %v10728_v24  ;;  %2475 = vmatmul.bf16.vlgmr.msra.gmra.mxu2 %v10720_v32  ;;  %v6762_v15 = vld [vmem:[#allocation11 + $0x68] sm:$0xf0]  ;;  %v7629_v19 = vor.u32 %v9839_v8, %v7626_v9 }
 0x180   :  { %2519 = vmatpush.bf16.msrb.mxu2 %v6957_v4  ;;  %2497 = vmatpush.bf16.msrb.mxu0 %v7337_v5  ;;  %v7661_v4 = vor.u32 %v9847_v58, %v7658_v60  ;;  %v9623_v5 = vld [vmem:[#allocation11 + $0x4c] sm:$0xf]  ;;  %v6896_v60 = vld [vmem:[#allocation11 + $0x150] sm:$0xf] }
 0x181   :  { %v9783_v16 = vld [vmem:[#allocation11 + $0x54c] sm:$0xf] }
 0x182   :  { %2534 = vmatpush.bf16.msrb.mxu3 %v7149_v12  ;;  %2512 = vmatpush.bf16.msrb.mxu1 %v7529_v20  ;;  %v7437_v12 = vor.u32 %v9791_v1, %v7434_v2  ;;  %v7217_v20 = vor.u32 %v9740_v14, %v7216_v13  ;;  %v9831_v21 = vld [vmem:[#allocation11 + $0x6cc] sm:$0xf]  ;;  %v7088_v1 = vld [vmem:[#allocation11 + $0x2d0] sm:$0xf] }
 0x183   :  { %v7594_v22 = vld [vmem:[#allocation11 + $0x6e8] sm:$0xf0]  ;;  %v9652_v13 = vld [vmem:[#allocation11 + $0x12c] sm:$0xf0] }
 0x184   :  { %2520 = vmatpush.bf16.msrb.mxu2 %v6925_v17  ;;  %2498 = vmatpush.bf16.msrb.mxu0 %v7305_v28  ;;  %v7402_v17 = vld [vmem:[#allocation11 + $0x568] sm:$0xf0] }
 0x185   :  { %v7405_v25 = vor.u32 %v9783_v16, %v7402_v17  ;;  %v9615_v28 = vld [vmem:[#allocation11 + $0xc] sm:$0xf]  ;;  %v9700_v17 = vld [vmem:[#allocation11 + $0x2ac] sm:$0xf0] }
 0x186   :  { %2535 = vmatpush.bf16.msrb.mxu3 %v7117_v23  ;;  %2513 = vmatpush.bf16.msrb.mxu1 %v7497_v36  ;;  %v6765_v23 = vor.u32 %v9623_v5, %v6762_v15  ;;  %v6730_v29 = vld [vmem:[#allocation11 + $0x28] sm:$0xf0]  ;;  %v7185_v36 = vor.u32 %v9732_v27, %v7184_v26  ;;  %v7056_v15 = vld [vmem:[#allocation11 + $0x290] sm:$0xf] }
 0x187   :  { %v9775_v30 = vld [vmem:[#allocation11 + $0x50c] sm:$0xf]  ;;  %v7472_v26 = vld [vmem:[#allocation11 + $0x5d0] sm:$0xf] }
 0x188   :  { %2521 = vmatpush.bf16.msrb.mxu2 %v6893_v33  ;;  %2499 = vmatpush.bf16.msrb.mxu0 %v7273_v42  ;;  %v7370_v31 = vld [vmem:[#allocation11 + $0x528] sm:$0xf0]  ;;  %v7597_v33 = vor.u32 %v9831_v21, %v7594_v22  ;;  %v9724_v42 = vld [vmem:[#allocation11 + $0x36c] sm:$0xf0] }
 0x189   :  { %2514 = vmatmul.bf16.vlgmr.msrb.gmra.mxu1 %v10724_v0  ;;  %v9823_v37 = vld [vmem:[#allocation11 + $0x68c] sm:$0xf]  ;;  %v7153_v49 = vor.u32 %v9724_v42, %v7152_v41  ;;  %v9804_v27 = vld [vmem:[#allocation11 + $0x5ec] sm:$0xf0] }
 0x18a   :  { %2536 = vmatpush.bf16.msrb.mxu3 %v7085_v39  ;;  %2558 = vmatpush.bf16.msra.mxu1 %v7725_v40  ;;  %v7562_v38 = vld [vmem:[#allocation11 + $0x6a8] sm:$0xf0]  ;;  %v6733_v39 = vor.u32 %v9615_v28, %v6730_v29  ;;  %v7373_v40 = vor.u32 %v9775_v30, %v7370_v31  ;;  %v7057_v28 = vor.u32 %v9700_v17, %v7056_v15  ;;  %v7024_v31 = vld [vmem:[#allocation11 + $0x250] sm:$0xf]  ;;  %v9720_v15 = vld [vmem:[#allocation11 + $0x354] sm:$0xf] }
 0x18b   :  { %v9767_v44 = vld [vmem:[#allocation11 + $0x4cc] sm:$0xf]  ;;  %v7473_v35 = vor.u32 %v9804_v27, %v7472_v26  ;;  %v9796_v41 = vld [vmem:[#allocation11 + $0x5ac] sm:$0xf0]  ;;  %v7154_v17 = vld [vmem:[#allocation11 + $0x370] sm:$0xf0] }
 0x18c   :  { %2522 = vmatpush.bf16.msrb.mxu2 %v6861_v46  ;;  %2500 = vmatpush.bf16.msrb.mxu0 %v7241_v56  ;;  %v7338_v45 = vld [vmem:[#allocation11 + $0x4e8] sm:$0xf0]  ;;  %v7565_v46 = vor.u32 %v9823_v37, %v7562_v38  ;;  %v9852_v37 = vld [vmem:[#allocation11 + $0x76c] sm:$0xf0] }
 0x18d   :  { %v9815_v50 = vld [vmem:[#allocation11 + $0x64c] sm:$0xf]  ;;  %v7341_v52 = vor.u32 %v9767_v44, %v7338_v45  ;;  %v6800_v38 = vld [vmem:[#allocation11 + $0x90] sm:$0xf] }
 0x18e   :  { %2537 = vmatpush.bf16.msrb.mxu3 %v7053_v53  ;;  %2559 = vmatpush.bf16.msra.mxu1 %v7693_v54  ;;  %v7530_v51 = vld [vmem:[#allocation11 + $0x668] sm:$0xf0]  ;;  %v7120_v53 = vld [vmem:[#allocation11 + $0x310] sm:$0xf] }
 0x18f   :  { %2501 = vmatmul.bf16.vlgmr.msrb.gmra.mxu0 %v10728_v24  ;;  %v9716_v54 = vld [vmem:[#allocation11 + $0x32c] sm:$0xf0]  ;;  %v9759_v56 = vld [vmem:[#allocation11 + $0x48c] sm:$0xf]  ;;  %v7533_v58 = vor.u32 %v9815_v50, %v7530_v51  ;;  %v9736_v50 = vld [vmem:[#allocation11 + $0x3d4] sm:$0xf] }
 0x190   :  { %2523 = vmatpush.bf16.msrb.mxu2 %v6829_v61  ;;  %2545 = vmatpush.bf16.msra.mxu0 %v7469_v59  ;;  %v7306_v57 = vld [vmem:[#allocation11 + $0x4a8] sm:$0xf0]  ;;  %v9660_v61 = vld [vmem:[#allocation11 + $0x16c] sm:$0xf0]  ;;  %v7121_v59 = vor.u32 %v9716_v54, %v7120_v53  ;;  %v7218_v51 = vld [vmem:[#allocation11 + $0x3f0] sm:$0xf0] }
 0x191   :  { %v9807_v62 = vld [vmem:[#allocation11 + $0x60c] sm:$0xf]  ;;  %v7309_v2 = vor.u32 %v9759_v56, %v7306_v57  ;;  %v6897_v7 = vor.u32 %v9660_v61, %v6896_v60  ;;  %v9684_v45 = vld [vmem:[#allocation11 + $0x22c] sm:$0xf0] }
 0x192   :  { %2538 = vmatpush.bf16.msrb.mxu3 %v7021_v3  ;;  %2560 = vmatpush.bf16.msra.mxu1 %v7661_v4  ;;  %v7498_v63 = vld [vmem:[#allocation11 + $0x628] sm:$0xf0]  ;;  %v9708_v3 = vld [vmem:[#allocation11 + $0x2ec] sm:$0xf0] }
 0x193   :  { %v7728_v4 = vld [vmem:[#allocation11 + $0x7d0] sm:$0xf]  ;;  %v9751_v8 = vld [vmem:[#allocation11 + $0x44c] sm:$0xf]  ;;  %v7089_v14 = vor.u32 %v9708_v3, %v7088_v1  ;;  %v7186_v1 = vld [vmem:[#allocation11 + $0x3b0] sm:$0xf0] }
 0x194   :  { %2524 = vmatpush.bf16.msrb.mxu2 %v6797_v11  ;;  %2546 = vmatpush.bf16.msra.mxu0 %v7437_v12  ;;  %v7274_v9 = vld [vmem:[#allocation11 + $0x468] sm:$0xf0]  ;;  %v7501_v11 = vor.u32 %v9807_v62, %v7498_v63  ;;  %v6864_v12 = vld [vmem:[#allocation11 + $0x110] sm:$0xf]  ;;  %v7729_v5 = vor.u32 %v9868_v6, %v7728_v4  ;;  %v9728_v63 = vld [vmem:[#allocation11 + $0x394] sm:$0xf] }
 0x195   :  { %v7277_v16 = vor.u32 %v9751_v8, %v7274_v9  ;;  %v9743_v21 = vld [vmem:[#allocation11 + $0x40c] sm:$0xf]  ;;  %v9628_v53 = vld [vmem:[#allocation11 + $0x6c] sm:$0xf0]  ;;  %v6962_v8 = vld [vmem:[#allocation11 + $0x1f0] sm:$0xf0] }
 0x196   :  { %2539 = vmatpush.bf16.msrb.mxu3 %v6989_v10  ;;  %2561 = vmatpush.bf16.msra.mxu1 %v7629_v19  ;;  %v7696_v10 = vld [vmem:[#allocation11 + $0x790] sm:$0xf]  ;;  %v7242_v22 = vld [vmem:[#allocation11 + $0x428] sm:$0xf0] }
 0x197   :  { %v9860_v19 = vld [vmem:[#allocation11 + $0x7ac] sm:$0xf0]  ;;  %v7245_v30 = vor.u32 %v9743_v21, %v7242_v22  ;;  %v6930_v21 = vld [vmem:[#allocation11 + $0x1b0] sm:$0xf0] }
 0x198   :  { %2525 = vmatpush.bf16.msrb.mxu2 %v6765_v23  ;;  %2547 = vmatpush.bf16.msra.mxu0 %v7405_v25  ;;  %v6832_v23 = vld [vmem:[#allocation11 + $0xd0] sm:$0xf]  ;;  %v7697_v29 = vor.u32 %v9860_v19, %v7696_v10 }
 0x199   :  { %2540 = vmatmul.bf16.vlgmr.msrb.gmra.mxu3 %v10716_v18  ;;  %v9644_v25 = vld [vmem:[#allocation11 + $0xec] sm:$0xf0] }
 0x19a   :  { %2584 = vmatpush.bf16.msra.mxu3 %v7217_v20  ;;  %2562 = vmatpush.bf16.msra.mxu1 %v7597_v33  ;;  %v6865_v20 = vor.u32 %v9652_v13, %v6864_v12  ;;  %v9692_v33 = vld [vmem:[#allocation11 + $0x26c] sm:$0xf0]  ;;  %v6833_v34 = vor.u32 %v9644_v25, %v6832_v23  ;;  %v7157_v23 = vor.u32 %v9720_v15, %v7154_v17  ;;  %v7442_v15 = vld [vmem:[#allocation11 + $0x5b0] sm:$0xf0] }
 0x19b   :  { %v7025_v42 = vor.u32 %v9692_v33, %v7024_v31  ;;  %v7408_v54 = vld [vmem:[#allocation11 + $0x550] sm:$0xf]  ;;  %v9680_v17 = vld [vmem:[#allocation11 + $0x214] sm:$0xf] }
 0x19c   :  { %2526 = vmatpush.bf16.msrb.mxu2 %v6733_v39  ;;  %2548 = vmatpush.bf16.msra.mxu0 %v7373_v40  ;;  %v9636_v39 = vld [vmem:[#allocation11 + $0xac] sm:$0xf0] }
 0x19d   :  { %v7440_v40 = vld [vmem:[#allocation11 + $0x590] sm:$0xf]  ;;  %v6801_v48 = vor.u32 %v9636_v39, %v6800_v38 }
 0x19e   :  { %2585 = vmatpush.bf16.msra.mxu3 %v7185_v36  ;;  %2563 = vmatpush.bf16.msra.mxu1 %v7565_v46  ;;  %v7664_v36 = vld [vmem:[#allocation11 + $0x750] sm:$0xf] }
 0x19f   :  { %2527 = vmatmul.bf16.vlgmr.msrb.gmra.mxu2 %v10720_v32  ;;  %v7665_v44 = vor.u32 %v9852_v37, %v7664_v36  ;;  %v7632_v46 = vld [vmem:[#allocation11 + $0x710] sm:$0xf] }
 0x1a0   :  { %2571 = vmatpush.bf16.msra.mxu2 %v6961_v43  ;;  %2549 = vmatpush.bf16.msra.mxu0 %v7341_v52  ;;  %v6992_v43 = vld [vmem:[#allocation11 + $0x210] sm:$0xf]  ;;  %v7633_v57 = vor.u32 %v9844_v47, %v7632_v46 }
 0x1a1   :  { %v6768_v52 = vld [vmem:[#allocation11 + $0x50] sm:$0xf]  ;;  %v6993_v56 = vor.u32 %v9684_v45, %v6992_v43  ;;  %v7730_v45 = vld [vmem:[#allocation11 + $0x7f0] sm:$0xf0] }
 0x1a2   :  { %2586 = vmatpush.bf16.msra.mxu3 %v7153_v49  ;;  %2564 = vmatpush.bf16.msra.mxu1 %v7533_v58  ;;  %v7441_v49 = vor.u32 %v9796_v41, %v7440_v40  ;;  %v7221_v58 = vor.u32 %v9736_v50, %v7218_v51  ;;  %v7600_v60 = vld [vmem:[#allocation11 + $0x6d0] sm:$0xf]  ;;  %v9704_v41 = vld [vmem:[#allocation11 + $0x2d4] sm:$0xf] }
 0x1a3   :  { %v9836_v61 = vld [vmem:[#allocation11 + $0x6ec] sm:$0xf0] }
 0x1a4   :  { %2572 = vmatpush.bf16.msra.mxu2 %v6929_v55  ;;  %2550 = vmatpush.bf16.msra.mxu0 %v7309_v2  ;;  %v9788_v55 = vld [vmem:[#allocation11 + $0x56c] sm:$0xf0]  ;;  %v7601_v9 = vor.u32 %v9836_v61, %v7600_v60 }
 0x1a5   :  { %v7409_v62 = vor.u32 %v9788_v55, %v7408_v54  ;;  %v6736_v2 = vld [vmem:[#allocation11 + $0x10] sm:$0xf]  ;;  %v7058_v54 = vld [vmem:[#allocation11 + $0x2b0] sm:$0xf0] }
 0x1a6   :  { %2587 = vmatpush.bf16.msra.mxu3 %v7121_v59  ;;  %2565 = vmatpush.bf16.msra.mxu1 %v7501_v11  ;;  %v6769_v59 = vor.u32 %v9628_v53, %v6768_v52  ;;  %v9620_v3 = vld [vmem:[#allocation11 + $0x2c] sm:$0xf0]  ;;  %v7189_v11 = vor.u32 %v9728_v63, %v7186_v1  ;;  %v9696_v53 = vld [vmem:[#allocation11 + $0x294] sm:$0xf] }
 0x1a7   :  { %v7376_v4 = vld [vmem:[#allocation11 + $0x510] sm:$0xf]  ;;  %v6737_v12 = vor.u32 %v9620_v3, %v6736_v2  ;;  %v9800_v63 = vld [vmem:[#allocation11 + $0x5d4] sm:$0xf]  ;;  %v7061_v2 = vor.u32 %v9696_v53, %v7058_v54  ;;  %v7160_v53 = vld [vmem:[#allocation11 + $0x358] sm:$0xf] }
 0x1a8   :  { %2573 = vmatpush.bf16.msra.mxu2 %v6897_v7  ;;  %2551 = vmatpush.bf16.msra.mxu0 %v7277_v16  ;;  %v9780_v6 = vld [vmem:[#allocation11 + $0x52c] sm:$0xf0]  ;;  %v9672_v7 = vld [vmem:[#allocation11 + $0x1d4] sm:$0xf] }
 0x1a9   :  { %2566 = vmatmul.bf16.vlgmr.msra.gmra.mxu1 %v10724_v0  ;;  %v7377_v13 = vor.u32 %v9780_v6, %v7376_v4  ;;  %v6965_v16 = vor.u32 %v9672_v7, %v6962_v8  ;;  %v7344_v10 = vld [vmem:[#allocation11 + $0x4d0] sm:$0xf]  ;;  %v7474_v1 = vld [vmem:[#allocation11 + $0x5f0] sm:$0xf0] }
 0x1aa   :  { %2588 = vmatpush.bf16.msra.mxu3 %v7089_v14  ;;  %2610 = vmatpush.bf16.msrb.mxu1 %v7729_v5  ;;  %v7568_v14 = vld [vmem:[#allocation11 + $0x690] sm:$0xf]  ;;  %v9688_v7 = vld [vmem:[#allocation11 + $0x254] sm:$0xf] }
 0x1ab   :  { %v9828_v5 = vld [vmem:[#allocation11 + $0x6ac] sm:$0xf0]  ;;  %v7026_v8 = vld [vmem:[#allocation11 + $0x270] sm:$0xf0] }
 0x1ac   :  { %2574 = vmatpush.bf16.msra.mxu2 %v6865_v20  ;;  %2552 = vmatpush.bf16.msra.mxu0 %v7245_v30  ;;  %v9772_v19 = vld [vmem:[#allocation11 + $0x4ec] sm:$0xf0]  ;;  %v9664_v20 = vld [vmem:[#allocation11 + $0x194] sm:$0xf]  ;;  %v7569_v22 = vor.u32 %v9828_v5, %v7568_v14 }
 0x1ad   :  { %v7345_v25 = vor.u32 %v9772_v19, %v7344_v10  ;;  %v7536_v26 = vld [vmem:[#allocation11 + $0x650] sm:$0xf]  ;;  %v7122_v30 = vld [vmem:[#allocation11 + $0x330] sm:$0xf0] }
 0x1ae   :  { %2589 = vmatpush.bf16.msra.mxu3 %v7057_v28  ;;  %2611 = vmatpush.bf16.msrb.mxu1 %v7697_v29  ;;  %v9820_v27 = vld [vmem:[#allocation11 + $0x66c] sm:$0xf0]  ;;  %v9712_v28 = vld [vmem:[#allocation11 + $0x314] sm:$0xf]  ;;  %v6933_v29 = vor.u32 %v9664_v20, %v6930_v21 }
 0x1af   :  { %2553 = vmatmul.bf16.vlgmr.msra.gmra.mxu0 %v10728_v24  ;;  %v7312_v31 = vld [vmem:[#allocation11 + $0x490] sm:$0xf]  ;;  %v7537_v36 = vor.u32 %v9820_v27, %v7536_v26  ;;  %v7125_v38 = vor.u32 %v9712_v28, %v7122_v30  ;;  %v6802_v14 = vld [vmem:[#allocation11 + $0xb0] sm:$0xf0]  ;;  %v9741_v26 = vld [vmem:[#allocation11 + $0x3f4] sm:$0xf0] }
 0x1b0   :  { %2575 = vmatpush.bf16.msra.mxu2 %v6833_v34  ;;  %2597 = vmatpush.bf16.msrb.mxu0 %v7473_v35  ;;  %v9764_v33 = vld [vmem:[#allocation11 + $0x4ac] sm:$0xf0]  ;;  %v9656_v34 = vld [vmem:[#allocation11 + $0x154] sm:$0xf] }
 0x1b1   :  { %v6898_v35 = vld [vmem:[#allocation11 + $0x170] sm:$0xf0]  ;;  %v7504_v37 = vld [vmem:[#allocation11 + $0x610] sm:$0xf]  ;;  %v7313_v39 = vor.u32 %v9764_v33, %v7312_v31 }
 0x1b2   :  { %2590 = vmatpush.bf16.msra.mxu3 %v7025_v42  ;;  %2612 = vmatpush.bf16.msrb.mxu1 %v7665_v44  ;;  %v9812_v40 = vld [vmem:[#allocation11 + $0x62c] sm:$0xf0]  ;;  %v7090_v42 = vld [vmem:[#allocation11 + $0x2f0] sm:$0xf0]  ;;  %v6901_v43 = vor.u32 %v9656_v34, %v6898_v35 }
 0x1b3   :  { %v9864_v44 = vld [vmem:[#allocation11 + $0x7d4] sm:$0xf]  ;;  %v7280_v46 = vld [vmem:[#allocation11 + $0x450] sm:$0xf]  ;;  %v7505_v50 = vor.u32 %v9812_v40, %v7504_v37  ;;  %v7093_v51 = vor.u32 %v9704_v41, %v7090_v42  ;;  %v9733_v40 = vld [vmem:[#allocation11 + $0x3b4] sm:$0xf0] }
 0x1b4   :  { %2576 = vmatpush.bf16.msra.mxu2 %v6801_v48  ;;  %2598 = vmatpush.bf16.msrb.mxu0 %v7441_v49  ;;  %v9756_v47 = vld [vmem:[#allocation11 + $0x46c] sm:$0xf0]  ;;  %v9648_v48 = vld [vmem:[#allocation11 + $0x114] sm:$0xf]  ;;  %v7733_v52 = vor.u32 %v9864_v44, %v7730_v45  ;;  %v6968_v45 = vld [vmem:[#allocation11 + $0x1d8] sm:$0xf] }
 0x1b5   :  { %v6866_v49 = vld [vmem:[#allocation11 + $0x130] sm:$0xf0]  ;;  %v7281_v55 = vor.u32 %v9756_v47, %v7280_v46  ;;  %v7248_v60 = vld [vmem:[#allocation11 + $0x410] sm:$0xf]  ;;  %v9677_v46 = vld [vmem:[#allocation11 + $0x1f4] sm:$0xf0] }
 0x1b6   :  { %2591 = vmatpush.bf16.msra.mxu3 %v6993_v56  ;;  %2613 = vmatpush.bf16.msrb.mxu1 %v7633_v57  ;;  %v6869_v56 = vor.u32 %v9648_v48, %v6866_v49  ;;  %v9856_v57 = vld [vmem:[#allocation11 + $0x794] sm:$0xf]  ;;  %v9748_v61 = vld [vmem:[#allocation11 + $0x42c] sm:$0xf0]  ;;  %v6969_v54 = vor.u32 %v9677_v46, %v6968_v45 }
 0x1b7   :  { %v7249_v4 = vor.u32 %v9748_v61, %v7248_v60  ;;  %v9792_v5 = vld [vmem:[#allocation11 + $0x594] sm:$0xf]  ;;  %v9669_v60 = vld [vmem:[#allocation11 + $0x1b4] sm:$0xf0] }
 0x1b8   :  { %2577 = vmatpush.bf16.msra.mxu2 %v6769_v59  ;;  %2599 = vmatpush.bf16.msrb.mxu0 %v7409_v62  ;;  %v9640_v59 = vld [vmem:[#allocation11 + $0xd4] sm:$0xf] }
 0x1b9   :  { %2592 = vmatmul.bf16.vlgmr.msra.gmra.mxu3 %v10716_v18  ;;  %v6834_v62 = vld [vmem:[#allocation11 + $0xf0] sm:$0xf0] }
 0x1ba   :  { %2636 = vmatpush.bf16.msrb.mxu3 %v7221_v58  ;;  %2614 = vmatpush.bf16.msrb.mxu1 %v7601_v9  ;;  %v7698_v58 = vld [vmem:[#allocation11 + $0x7b0] sm:$0xf0]  ;;  %v6837_v6 = vor.u32 %v9640_v59, %v6834_v62 }
 0x1bb   :  { %v7701_v3 = vor.u32 %v9856_v57, %v7698_v58  ;;  %v9848_v9 = vld [vmem:[#allocation11 + $0x754] sm:$0xf]  ;;  %v6936_v58 = vld [vmem:[#allocation11 + $0x198] sm:$0xf] }
 0x1bc   :  { %2578 = vmatpush.bf16.msra.mxu2 %v6737_v12  ;;  %2600 = vmatpush.bf16.msrb.mxu0 %v7377_v13  ;;  %v7666_v12 = vld [vmem:[#allocation11 + $0x770] sm:$0xf0] }
 0x1bd   :  { %v9632_v13 = vld [vmem:[#allocation11 + $0x94] sm:$0xf]  ;;  %v7669_v10 = vor.u32 %v9848_v9, %v7666_v12  ;;  %v9661_v9 = vld [vmem:[#allocation11 + $0x174] sm:$0xf0] }
 0x1be   :  { %2637 = vmatpush.bf16.msrb.mxu3 %v7189_v11  ;;  %2615 = vmatpush.bf16.msrb.mxu1 %v7569_v22  ;;  %v7477_v11 = vor.u32 %v9800_v63, %v7474_v1  ;;  %v6805_v19 = vor.u32 %v9632_v13, %v6802_v14  ;;  %v6994_v20 = vld [vmem:[#allocation11 + $0x230] sm:$0xf0] }
 0x1bf   :  { %2579 = vmatmul.bf16.vlgmr.msra.gmra.mxu2 %v10720_v32  ;;  %v9840_v21 = vld [vmem:[#allocation11 + $0x714] sm:$0xf]  ;;  %v6997_v31 = vor.u32 %v9680_v17, %v6994_v20 }
 0x1c0   :  { %2623 = vmatpush.bf16.msrb.mxu2 %v6965_v16  ;;  %2601 = vmatpush.bf16.msrb.mxu0 %v7345_v25  ;;  %v7029_v16 = vor.u32 %v9688_v7, %v7026_v8  ;;  %v7634_v22 = vld [vmem:[#allocation11 + $0x730] sm:$0xf0]  ;;  %v7224_v25 = vld [vmem:[#allocation11 + $0x3d8] sm:$0xf] }
 0x1c1   :  { %v9624_v27 = vld [vmem:[#allocation11 + $0x54] sm:$0xf]  ;;  %v7637_v33 = vor.u32 %v9840_v21, %v7634_v22  ;;  %v7225_v34 = vor.u32 %v9741_v26, %v7224_v25  ;;  %v6904_v8 = vld [vmem:[#allocation11 + $0x158] sm:$0xf] }
 0x1c2   :  { %2638 = vmatpush.bf16.msrb.mxu3 %v7157_v23  ;;  %2616 = vmatpush.bf16.msrb.mxu1 %v7537_v36  ;;  %v7445_v23 = vor.u32 %v9792_v5, %v7442_v15  ;;  %v6770_v28 = vld [vmem:[#allocation11 + $0x70] sm:$0xf0]  ;;  %v7096_v15 = vld [vmem:[#allocation11 + $0x2d8] sm:$0xf]  ;;  %v6905_v17 = vor.u32 %v9661_v9, %v6904_v8 }
 0x1c3   :  { %v7410_v30 = vld [vmem:[#allocation11 + $0x570] sm:$0xf0]  ;;  %v6773_v37 = vor.u32 %v9624_v27, %v6770_v28  ;;  %v6872_v22 = vld [vmem:[#allocation11 + $0x118] sm:$0xf] }
 0x1c4   :  { %2624 = vmatpush.bf16.msrb.mxu2 %v6933_v29  ;;  %2602 = vmatpush.bf16.msrb.mxu0 %v7313_v39  ;;  %v9784_v29 = vld [vmem:[#allocation11 + $0x554] sm:$0xf]  ;;  %v7192_v39 = vld [vmem:[#allocation11 + $0x398] sm:$0xf] }
 0x1c5   :  { %v9832_v35 = vld [vmem:[#allocation11 + $0x6d4] sm:$0xf]  ;;  %v7193_v48 = vor.u32 %v9733_v40, %v7192_v39  ;;  %v9645_v39 = vld [vmem:[#allocation11 + $0xf4] sm:$0xf0] }
 0x1c6   :  { %2639 = vmatpush.bf16.msrb.mxu3 %v7125_v38  ;;  %2617 = vmatpush.bf16.msrb.mxu1 %v7505_v50  ;;  %v7602_v36 = vld [vmem:[#allocation11 + $0x6f0] sm:$0xf0]  ;;  %v7413_v38 = vor.u32 %v9784_v29, %v7410_v30  ;;  %v7064_v29 = vld [vmem:[#allocation11 + $0x298] sm:$0xf] }
 0x1c7   :  { %v9616_v41 = vld [vmem:[#allocation11 + $0x14] sm:$0xf]  ;;  %v7605_v47 = vor.u32 %v9832_v35, %v7602_v36  ;;  %v9701_v30 = vld [vmem:[#allocation11 + $0x2b4] sm:$0xf0] }
 0x1c8   :  { %2625 = vmatpush.bf16.msrb.mxu2 %v6901_v43  ;;  %2603 = vmatpush.bf16.msrb.mxu0 %v7281_v55  ;;  %v6738_v42 = vld [vmem:[#allocation11 + $0x30] sm:$0xf0]  ;;  %v9725_v55 = vld [vmem:[#allocation11 + $0x374] sm:$0xf0] }
 0x1c9   :  { %2618 = vmatmul.bf16.vlgmr.msrb.gmra.mxu1 %v10724_v0  ;;  %v9776_v43 = vld [vmem:[#allocation11 + $0x514] sm:$0xf]  ;;  %v6741_v49 = vor.u32 %v9616_v41, %v6738_v42  ;;  %v7161_v59 = vor.u32 %v9725_v55, %v7160_v53  ;;  %v9861_v35 = vld [vmem:[#allocation11 + $0x7b4] sm:$0xf0]  ;;  %v7065_v42 = vor.u32 %v9701_v30, %v7064_v29 }
 0x1ca   :  { %2640 = vmatpush.bf16.msrb.mxu3 %v7093_v51  ;;  %2662 = vmatpush.bf16.msra.mxu1 %v7733_v52  ;;  %v7378_v44 = vld [vmem:[#allocation11 + $0x530] sm:$0xf0]  ;;  %v7480_v40 = vld [vmem:[#allocation11 + $0x5d8] sm:$0xf] }
 0x1cb   :  { %v7381_v50 = vor.u32 %v9776_v43, %v7378_v44  ;;  %v9824_v51 = vld [vmem:[#allocation11 + $0x694] sm:$0xf]  ;;  %v9805_v41 = vld [vmem:[#allocation11 + $0x5f4] sm:$0xf0]  ;;  %v10750_v44 = vld [vmem:[#allocation13] sm:$0xff] }
 0x1cc   :  { %2626 = vmatpush.bf16.msrb.mxu2 %v6869_v56  ;;  %2604 = vmatpush.bf16.msrb.mxu0 %v7249_v4  ;;  %v7570_v52 = vld [vmem:[#allocation11 + $0x6b0] sm:$0xf0]  ;;  %v9717_v4 = vld [vmem:[#allocation11 + $0x334] sm:$0xf0]  ;;  %v1067_v55 = vperm.slane %v10750_v44, 0 }
 0x1cd   :  { %v9768_v56 = vld [vmem:[#allocation11 + $0x4d4] sm:$0xf]  ;;  %v7573_v61 = vor.u32 %v9824_v51, %v7570_v52  ;;  %v7481_v51 = vor.u32 %v9805_v41, %v7480_v40  ;;  %v9853_v52 = vld [vmem:[#allocation11 + $0x774] sm:$0xf0] }
 0x1ce   :  { %2641 = vmatpush.bf16.msrb.mxu3 %v7061_v2  ;;  %2663 = vmatpush.bf16.msra.mxu1 %v7701_v3  ;;  %v7346_v57 = vld [vmem:[#allocation11 + $0x4f0] sm:$0xf0]  ;;  %v7128_v2 = vld [vmem:[#allocation11 + $0x318] sm:$0xf]  ;;  %v6937_v3 = vor.u32 %v9669_v60, %v6936_v58 }
 0x1cf   :  { %2605 = vmatmul.bf16.vlgmr.msrb.gmra.mxu0 %v10728_v24  ;;  %v7349_v62 = vor.u32 %v9768_v56, %v7346_v57  ;;  %v9816_v63 = vld [vmem:[#allocation11 + $0x654] sm:$0xf]  ;;  %v7129_v13 = vor.u32 %v9717_v4, %v7128_v2  ;;  %v6808_v53 = vld [vmem:[#allocation11 + $0x98] sm:$0xf] }
 0x1d0   :  { %2627 = vmatpush.bf16.msrb.mxu2 %v6837_v6  ;;  %2649 = vmatpush.bf16.msra.mxu0 %v7477_v11  ;;  %v7538_v1 = vld [vmem:[#allocation11 + $0x670] sm:$0xf0]  ;;  %v7448_v56 = vld [vmem:[#allocation11 + $0x598] sm:$0xf] }
 0x1d1   :  { %v9760_v6 = vld [vmem:[#allocation11 + $0x494] sm:$0xf]  ;;  %v7541_v11 = vor.u32 %v9816_v63, %v7538_v1  ;;  %v9797_v57 = vld [vmem:[#allocation11 + $0x5b4] sm:$0xf0] }
 0x1d2   :  { %2642 = vmatpush.bf16.msrb.mxu3 %v7029_v16  ;;  %2664 = vmatpush.bf16.msra.mxu1 %v7669_v10  ;;  %v7314_v7 = vld [vmem:[#allocation11 + $0x4b0] sm:$0xf0]  ;;  %v9709_v16 = vld [vmem:[#allocation11 + $0x2f4] sm:$0xf0]  ;;  %v7449_v4 = vor.u32 %v9797_v57, %v7448_v56  ;;  %v9713_v57 = vld [vmem:[#allocation11 + $0x31c] sm:$0xf] }
 0x1d3   :  { %v9808_v12 = vld [vmem:[#allocation11 + $0x614] sm:$0xf]  ;;  %v7317_v14 = vor.u32 %v9760_v6, %v7314_v7  ;;  %v7736_v10 = vld [vmem:[#allocation11 + $0x7d8] sm:$0xf]  ;;  %v7097_v27 = vor.u32 %v9709_v16, %v7096_v15  ;;  %v9737_v6 = vld [vmem:[#allocation11 + $0x3dc] sm:$0xf] }
 0x1d4   :  { %2628 = vmatpush.bf16.msrb.mxu2 %v6805_v19  ;;  %2650 = vmatpush.bf16.msra.mxu0 %v7445_v23  ;;  %v7506_v5 = vld [vmem:[#allocation11 + $0x630] sm:$0xf0]  ;;  %v9869_v19 = vld [vmem:[#allocation11 + $0x7f4] sm:$0xf0]  ;;  %v7226_v7 = vld [vmem:[#allocation11 + $0x3f8] sm:$0xf0] }
 0x1d5   :  { %v9752_v20 = vld [vmem:[#allocation11 + $0x454] sm:$0xf]  ;;  %v9653_v23 = vld [vmem:[#allocation11 + $0x134] sm:$0xf0]  ;;  %v7509_v25 = vor.u32 %v9808_v12, %v7506_v5  ;;  %v7737_v28 = vor.u32 %v9869_v19, %v7736_v10  ;;  %v7229_v15 = vor.u32 %v9737_v6, %v7226_v7 }
 0x1d6   :  { %2643 = vmatpush.bf16.msrb.mxu3 %v6997_v31  ;;  %2665 = vmatpush.bf16.msra.mxu1 %v7637_v33  ;;  %v7282_v21 = vld [vmem:[#allocation11 + $0x470] sm:$0xf0]  ;;  %v6873_v33 = vor.u32 %v9653_v23, %v6872_v22  ;;  %v9685_v63 = vld [vmem:[#allocation11 + $0x234] sm:$0xf0]  ;;  %v7194_v22 = vld [vmem:[#allocation11 + $0x3b8] sm:$0xf0] }
 0x1d7   :  { %v7285_v31 = vor.u32 %v9752_v20, %v7282_v21  ;;  %v9744_v36 = vld [vmem:[#allocation11 + $0x414] sm:$0xf]  ;;  %v7640_v1 = vld [vmem:[#allocation11 + $0x718] sm:$0xf]  ;;  %v9729_v21 = vld [vmem:[#allocation11 + $0x39c] sm:$0xf] }
 0x1d8   :  { %2629 = vmatpush.bf16.msrb.mxu2 %v6773_v37  ;;  %2651 = vmatpush.bf16.msra.mxu0 %v7413_v38  ;;  %v7250_v37 = vld [vmem:[#allocation11 + $0x430] sm:$0xf0]  ;;  %v6840_v38 = vld [vmem:[#allocation11 + $0xd8] sm:$0xf] }
 0x1d9   :  { %2644 = vmatmul.bf16.vlgmr.msrb.gmra.mxu3 %v10716_v18  ;;  %v7253_v45 = vor.u32 %v9744_v36, %v7250_v37  ;;  %v6841_v46 = vor.u32 %v9645_v39, %v6840_v38  ;;  %v9845_v2 = vld [vmem:[#allocation11 + $0x734] sm:$0xf0]  ;;  %v7197_v37 = vor.u32 %v9729_v21, %v7194_v22 }
 0x1da   :  { %2688 = vmatpush.bf16.msra.mxu3 %v7225_v34  ;;  %2666 = vmatpush.bf16.msra.mxu1 %v7605_v47  ;;  %v7704_v34 = vld [vmem:[#allocation11 + $0x798] sm:$0xf]  ;;  %v7641_v5 = vor.u32 %v9845_v2, %v7640_v1  ;;  %v9657_v1 = vld [vmem:[#allocation11 + $0x15c] sm:$0xf] }
 0x1db   :  { %v7705_v43 = vor.u32 %v9861_v35, %v7704_v34  ;;  %v7032_v47 = vld [vmem:[#allocation11 + $0x258] sm:$0xf]  ;;  %v6970_v34 = vld [vmem:[#allocation11 + $0x1f8] sm:$0xf0] }
 0x1dc   :  { %2630 = vmatpush.bf16.msrb.mxu2 %v6741_v49  ;;  %2652 = vmatpush.bf16.msra.mxu0 %v7381_v50  ;;  %v10748_v26 = vpop.f32.mrf.mxu3  ;;  %v7672_v49 = vld [vmem:[#allocation11 + $0x758] sm:$0xf]  ;;  %v6906_v2 = vld [vmem:[#allocation11 + $0x178] sm:$0xf0] }
 0x1dd   :  { %v6776_v8 = vld [vmem:[#allocation11 + $0x58] sm:$0xf] }
 0x1de   :  { %2689 = vmatpush.bf16.msra.mxu3 %v7193_v48  ;;  %2667 = vmatpush.bf16.msra.mxu1 %v7573_v61  ;;  %v9693_v48 = vld [vmem:[#allocation11 + $0x274] sm:$0xf0] }
 0x1df   :  { %2631 = vmatmul.bf16.vlgmr.msrb.gmra.mxu2 %v10720_v32  ;;  %v7033_v60 = vor.u32 %v9693_v48, %v7032_v47  ;;  %v7000_v61 = vld [vmem:[#allocation11 + $0x218] sm:$0xf] }
 0x1e0   :  { %2675 = vmatpush.bf16.msra.mxu2 %v6969_v54  ;;  %2653 = vmatpush.bf16.msra.mxu0 %v7349_v62  ;;  %v9637_v54 = vld [vmem:[#allocation11 + $0xb4] sm:$0xf0] }
 0x1e1   :  { %v6809_v62 = vor.u32 %v9637_v54, %v6808_v53  ;;  %v7416_v12 = vld [vmem:[#allocation11 + $0x558] sm:$0xf] }
 0x1e2   :  { %2690 = vmatpush.bf16.msra.mxu3 %v7161_v59  ;;  %2668 = vmatpush.bf16.msra.mxu1 %v7541_v11  ;;  %v2372_v50 = vpop.f32.mrf.mxu2  ;;  %v7673_v59 = vor.u32 %v9853_v52, %v7672_v49  ;;  %v9629_v11 = vld [vmem:[#allocation11 + $0x74] sm:$0xf0]  ;;  %v9665_v49 = vld [vmem:[#allocation11 + $0x19c] sm:$0xf] }
 0x1e3   :  { %v2373_v9 = vadd.f32 %v2372_v50, %v1067_v55  ;;  %v7608_v16 = vld [vmem:[#allocation11 + $0x6d8] sm:$0xf]  ;;  %v6777_v19 = vor.u32 %v9629_v11, %v6776_v8  ;;  %v6938_v50 = vld [vmem:[#allocation11 + $0x1b8] sm:$0xf0] }
 0x1e4   :  { %2676 = vmatpush.bf16.msra.mxu2 %v6937_v3  ;;  %2654 = vmatpush.bf16.msra.mxu0 %v7317_v14  ;;  %v2387_v58 = vpop.f32.mrf.mxu3  ;;  %v7001_v14 = vor.u32 %v9685_v63, %v7000_v61  ;;  %v6744_v23 = vld [vmem:[#allocation11 + $0x18] sm:$0xf]  ;;  %v9705_v11 = vld [vmem:[#allocation11 + $0x2dc] sm:$0xf] }
 0x1e5   :  { %v9781_v29 = vld [vmem:[#allocation11 + $0x534] sm:$0xf0]  ;;  %v6941_v58 = vor.u32 %v9665_v49, %v6938_v50  ;;  %v9849_v49 = vld [vmem:[#allocation11 + $0x75c] sm:$0xf] }
 0x1e6   :  { %2691 = vmatpush.bf16.msra.mxu3 %v7129_v13  ;;  %2669 = vmatpush.bf16.msra.mxu1 %v7509_v25  ;;  %v2411_v3 = vpop.f32.mrf.mxu1  ;;  %v9789_v13 = vld [vmem:[#allocation11 + $0x574] sm:$0xf0]  ;;  %v2386_v25 = vadd.f32 %v10748_v26, %v2373_v9 }
 0x1e7   :  { %v7417_v20 = vor.u32 %v9789_v13, %v7416_v12  ;;  %v7576_v26 = vld [vmem:[#allocation11 + $0x698] sm:$0xf]  ;;  %v7098_v12 = vld [vmem:[#allocation11 + $0x2f8] sm:$0xf0]  ;;  %v6909_v13 = vor.u32 %v9657_v1, %v6906_v2 }
 0x1e8   :  { %2677 = vmatpush.bf16.msra.mxu2 %v6905_v17  ;;  %2655 = vmatpush.bf16.msra.mxu0 %v7285_v31  ;;  %v9837_v17 = vld [vmem:[#allocation11 + $0x6f4] sm:$0xf0]  ;;  %v7101_v21 = vor.u32 %v9705_v11, %v7098_v12  ;;  %v7642_v1 = vld [vmem:[#allocation11 + $0x738] sm:$0xf0] }
 0x1e9   :  { %2670 = vmatmul.bf16.vlgmr.msra.gmra.mxu1 %v10724_v0  ;;  %v7609_v36 = vor.u32 %v9837_v17, %v7608_v16  ;;  %v9829_v41 = vld [vmem:[#allocation11 + $0x6b4] sm:$0xf0]  ;;  %v9649_v17 = vld [vmem:[#allocation11 + $0x11c] sm:$0xf] }
 0x1ea   :  { %2692 = vmatpush.bf16.msra.mxu3 %v7097_v27  ;;  %2714 = vmatpush.bf16.msrb.mxu1 %v7737_v28  ;;  %v2374_v10 = vpop.f32.mrf.mxu2  ;;  %v9621_v27 = vld [vmem:[#allocation11 + $0x34] sm:$0xf0]  ;;  %v6778_v11 = vld [vmem:[#allocation11 + $0x78] sm:$0xf0] }
 0x1eb   :  { %v7384_v28 = vld [vmem:[#allocation11 + $0x518] sm:$0xf]  ;;  %v6745_v39 = vor.u32 %v9621_v27, %v6744_v23  ;;  %v6874_v10 = vld [vmem:[#allocation11 + $0x138] sm:$0xf0] }
 0x1ec   :  { %2678 = vmatpush.bf16.msra.mxu2 %v6873_v33  ;;  %2656 = vmatpush.bf16.msra.mxu0 %v7253_v45  ;;  %v2398_v30 = vpop.f32.mrf.mxu0  ;;  %v10756_v31 = vpop.f32.mrf.mxu3  ;;  %v9673_v33 = vld [vmem:[#allocation11 + $0x1dc] sm:$0xf]  ;;  %v7385_v40 = vor.u32 %v9781_v29, %v7384_v28  ;;  %v7352_v47 = vld [vmem:[#allocation11 + $0x4d8] sm:$0xf]  ;;  %v6877_v28 = vor.u32 %v9649_v17, %v6874_v10 }
 0x1ed   :  { %v2399_v35 = vadd.f32 %v2398_v30, %v2386_v25  ;;  %v6973_v45 = vor.u32 %v9673_v33, %v6970_v34  ;;  %v9773_v48 = vld [vmem:[#allocation11 + $0x4f4] sm:$0xf0]  ;;  %v9697_v23 = vld [vmem:[#allocation11 + $0x29c] sm:$0xf] }
 0x1ee   :  { %2693 = vmatpush.bf16.msra.mxu3 %v7065_v42  ;;  %2715 = vmatpush.bf16.msrb.mxu1 %v7705_v43  ;;  %v2413_v38 = vpop.f32.mrf.mxu1  ;;  %v9721_v42 = vld [vmem:[#allocation11 + $0x35c] sm:$0xf]  ;;  %v7353_v54 = vor.u32 %v9773_v48, %v7352_v47  ;;  %v7544_v55 = vld [vmem:[#allocation11 + $0x658] sm:$0xf] }
 0x1ef   :  { %2657 = vmatmul.bf16.vlgmr.msra.gmra.mxu0 %v10728_v24  ;;  %v10758_v43 = vadd.f32 %v2411_v3, %v2399_v35  ;;  %v9821_v56 = vld [vmem:[#allocation11 + $0x674] sm:$0xf0]  ;;  %v7066_v25 = vld [vmem:[#allocation11 + $0x2b8] sm:$0xf0] }
 0x1f0   :  { %2679 = vmatpush.bf16.msra.mxu2 %v6841_v46  ;;  %2701 = vmatpush.bf16.msrb.mxu0 %v7481_v51  ;;  %v7162_v46 = vld [vmem:[#allocation11 + $0x378] sm:$0xf0]  ;;  %v7577_v51 = vor.u32 %v9829_v41, %v7576_v26  ;;  %v7320_v61 = vld [vmem:[#allocation11 + $0x498] sm:$0xf]  ;;  %v7545_v3 = vor.u32 %v9821_v56, %v7544_v55  ;;  %v7069_v41 = vor.u32 %v9697_v23, %v7066_v25 }
 0x1f1   :  { %v7165_v53 = vor.u32 %v9721_v42, %v7162_v46  ;;  %v9813_v9 = vld [vmem:[#allocation11 + $0x634] sm:$0xf0]  ;;  %v9857_v29 = vld [vmem:[#allocation11 + $0x79c] sm:$0xf] }
 0x1f2   :  { %2694 = vmatpush.bf16.msra.mxu3 %v7033_v60  ;;  %2716 = vmatpush.bf16.msrb.mxu1 %v7673_v59  ;;  %v10761_v52 = vpop.f32.mrf.mxu2  ;;  %v7130_v60 = vld [vmem:[#allocation11 + $0x338] sm:$0xf0]  ;;  %v9765_v59 = vld [vmem:[#allocation11 + $0x4b4] sm:$0xf0] }
 0x1f3   :  { %v7133_v7 = vor.u32 %v9713_v57, %v7130_v60  ;;  %v7321_v8 = vor.u32 %v9765_v59, %v7320_v61  ;;  %v9757_v16 = vld [vmem:[#allocation11 + $0x474] sm:$0xf0]  ;;  %v7706_v30 = vld [vmem:[#allocation11 + $0x7b8] sm:$0xf0] }
 0x1f4   :  { %2680 = vmatpush.bf16.msra.mxu2 %v6809_v62  ;;  %2702 = vmatpush.bf16.msrb.mxu0 %v7449_v4  ;;  %v2400_v62 = vpop.f32.mrf.mxu0  ;;  %v2439_v63 = vpop.f32.mrf.mxu3  ;;  %v7512_v4 = vld [vmem:[#allocation11 + $0x618] sm:$0xf]  ;;  %v6842_v38 = vld [vmem:[#allocation11 + $0xf8] sm:$0xf0]  ;;  %v7709_v42 = vor.u32 %v9857_v29, %v7706_v30  ;;  %v7940_v29 = vld [vmem:[#allocation14 + $0x188] sm:$0xf] }
 0x1f5   :  { %v7256_v33 = vld [vmem:[#allocation11 + $0x418] sm:$0xf]  ;;  %v9689_v47 = vld [vmem:[#allocation11 + $0x25c] sm:$0xf]  ;;  %v9922_v30 = vld [vmem:[#allocation14 + $0x1a0] sm:$0xf0] }
 0x1f6   :  { %2695 = vmatpush.bf16.msra.mxu3 %v7001_v14  ;;  %2717 = vmatpush.bf16.msrb.mxu1 %v7641_v5  ;;  %v10764_v6 = vpop.f32.mrf.mxu1  ;;  %v9865_v14 = vld [vmem:[#allocation11 + $0x7dc] sm:$0xf] }
 0x1f7   :  { %v7738_v5 = vld [vmem:[#allocation11 + $0x7f8] sm:$0xf0] }
 0x1f8   :  { %2681 = vmatpush.bf16.msra.mxu2 %v6777_v19  ;;  %2703 = vmatpush.bf16.msrb.mxu0 %v7417_v20  ;;  %v7513_v19 = vor.u32 %v9813_v9, %v7512_v4  ;;  %v7741_v22 = vor.u32 %v9865_v14, %v7738_v5  ;;  %v7034_v48 = vld [vmem:[#allocation11 + $0x278] sm:$0xf0] }
 0x1f9   :  { %2696 = vmatmul.bf16.vlgmr.msra.gmra.mxu3 %v10716_v18  ;;  %v9793_v55 = vld [vmem:[#allocation11 + $0x59c] sm:$0xf]  ;;  %v7037_v57 = vor.u32 %v9689_v47, %v7034_v48 }
 0x1fa   :  { %2740 = vmatpush.bf16.msrb.mxu3 %v7229_v15  ;;  %2718 = vmatpush.bf16.msrb.mxu1 %v7609_v36  ;;  %v7288_v15 = vld [vmem:[#allocation11 + $0x458] sm:$0xf]  ;;  %v2426_v20 = vpop.f32.mrf.mxu2  ;;  %v7450_v56 = vld [vmem:[#allocation11 + $0x5b8] sm:$0xf0] }
 0x1fb   :  { %v7289_v27 = vor.u32 %v9757_v16, %v7288_v15  ;;  %v9749_v36 = vld [vmem:[#allocation11 + $0x434] sm:$0xf0]  ;;  %v7002_v62 = vld [vmem:[#allocation11 + $0x238] sm:$0xf0]  ;;  %v7453_v4 = vor.u32 %v9793_v55, %v7450_v56 }
 0x1fc   :  { %2682 = vmatpush.bf16.msra.mxu2 %v6745_v39  ;;  %2704 = vmatpush.bf16.msrb.mxu0 %v7385_v40  ;;  %v10766_v34 = vpop.f32.mrf.mxu0  ;;  %v10768_v35 = vpop.f32.mrf.mxu3  ;;  %v9801_v39 = vld [vmem:[#allocation11 + $0x5dc] sm:$0xf] }
 0x1fd   :  { %v7482_v40 = vld [vmem:[#allocation11 + $0x5f8] sm:$0xf0] }
 0x1fe   :  { %2741 = vmatpush.bf16.msrb.mxu3 %v7197_v37  ;;  %2719 = vmatpush.bf16.msrb.mxu1 %v7577_v51  ;;  %v9641_v37 = vld [vmem:[#allocation11 + $0xdc] sm:$0xf]  ;;  %v2465_v26 = vpop.f32.mrf.mxu1  ;;  %v7485_v50 = vor.u32 %v9801_v39, %v7482_v40 }
 0x1ff   :  { %2683 = vmatmul.bf16.vlgmr.msra.gmra.mxu2 %v10720_v32  ;;  %v6845_v46 = vor.u32 %v9641_v37, %v6842_v38  ;;  %v7674_v51 = vld [vmem:[#allocation11 + $0x778] sm:$0xf0] }
 0x200   :  { %2727 = vmatpush.bf16.msrb.mxu2 %v6973_v45  ;;  %2705 = vmatpush.bf16.msrb.mxu0 %v7353_v54  ;;  %v7257_v45 = vor.u32 %v9749_v36, %v7256_v33  ;;  %v6810_v54 = vld [vmem:[#allocation11 + $0xb8] sm:$0xf0]  ;;  %v7677_v61 = vor.u32 %v9849_v49, %v7674_v51  ;;  %v1068_v49 = vperm.slane %v10750_v44, 1  ;;  %v7912_v51 = vld [vmem:[#allocation14 + $0x150] sm:$0xf] }
 0x201   :  { %v9841_v63 = vld [vmem:[#allocation11 + $0x71c] sm:$0xf] }
 0x202   :  { %2742 = vmatpush.bf16.msrb.mxu3 %v7165_v53  ;;  %2720 = vmatpush.bf16.msrb.mxu1 %v7545_v3  ;;  %v9633_v53 = vld [vmem:[#allocation11 + $0x9c] sm:$0xf]  ;;  %v10771_v60 = vpop.f32.mrf.mxu2  ;;  %v7645_v15 = vor.u32 %v9841_v63, %v7642_v1  ;;  %v2425_v1 = vadd.f32 %v10761_v52, %v1068_v49  ;;  %v7996_v49 = vld [vmem:[#allocation14 + $0x1f8] sm:$0xf] }
 0x203   :  { %v6813_v59 = vor.u32 %v9633_v53, %v6810_v54  ;;  %v9625_v9 = vld [vmem:[#allocation11 + $0x5c] sm:$0xf]  ;;  %v9915_v53 = vld [vmem:[#allocation14 + $0x168] sm:$0xf0] }
 0x204   :  { %2728 = vmatpush.bf16.msrb.mxu2 %v6941_v58  ;;  %2706 = vmatpush.bf16.msrb.mxu0 %v7321_v8  ;;  %v9681_v58 = vld [vmem:[#allocation11 + $0x21c] sm:$0xf]  ;;  %v2452_v2 = vpop.f32.mrf.mxu0  ;;  %v2491_v3 = vpop.f32.mrf.mxu3  ;;  %v9978_v8 = vld [vmem:[#allocation14 + $0x360] sm:$0xf0] }
 0x205   :  { %v9785_v12 = vld [vmem:[#allocation11 + $0x55c] sm:$0xf]  ;;  %v7005_v5 = vor.u32 %v9681_v58, %v7002_v62  ;;  %v8080_v58 = vld [vmem:[#allocation14 + $0x2a0] sm:$0xf]  ;;  %v7884_v2 = vld [vmem:[#allocation14 + $0x118] sm:$0xf] }
 0x206   :  { %2743 = vmatpush.bf16.msrb.mxu3 %v7133_v7  ;;  %2721 = vmatpush.bf16.msrb.mxu1 %v7513_v19  ;;  %v8164_v7 = vld [vmem:[#allocation14 + $0x348] sm:$0xf]  ;;  %v10774_v14 = vpop.f32.mrf.mxu1  ;;  %v9833_v17 = vld [vmem:[#allocation11 + $0x6dc] sm:$0xf]  ;;  %v6781_v19 = vor.u32 %v9625_v9, %v6778_v11 }
 0x207   :  { %v8165_v16 = vor.u32 %v9978_v8, %v8164_v7  ;;  %v7610_v10 = vld [vmem:[#allocation11 + $0x6f8] sm:$0xf0] }
 0x208   :  { %2729 = vmatpush.bf16.msrb.mxu2 %v6909_v13  ;;  %2707 = vmatpush.bf16.msrb.mxu0 %v7289_v27  ;;  %v7418_v13 = vld [vmem:[#allocation11 + $0x578] sm:$0xf0]  ;;  %v7613_v36 = vor.u32 %v9833_v17, %v7610_v10  ;;  %v10090_v17 = vld [vmem:[#allocation14 + $0x6e0] sm:$0xf0]  ;;  %v2438_v10 = vadd.f32 %v10756_v31, %v2425_v1  ;;  %v10083_v31 = vld [vmem:[#allocation14 + $0x6a8] sm:$0xf0] }
 0x209   :  { %2722 = vmatmul.bf16.vlgmr.msrb.gmra.mxu1 %v10724_v0  ;;  %v7421_v20 = vor.u32 %v9785_v12, %v7418_v13  ;;  %v9617_v23 = vld [vmem:[#allocation11 + $0x1c] sm:$0xf]  ;;  %v8052_v12 = vld [vmem:[#allocation14 + $0x268] sm:$0xf]  ;;  %v9950_v13 = vld [vmem:[#allocation14 + $0x280] sm:$0xf0] }
 0x20a   :  { %2744 = vmatpush.bf16.msrb.mxu3 %v7101_v21  ;;  %2766 = vmatpush.bf16.msra.mxu1 %v7741_v22  ;;  %v8136_v21 = vld [vmem:[#allocation14 + $0x310] sm:$0xf]  ;;  %v9971_v22 = vld [vmem:[#allocation14 + $0x328] sm:$0xf0]  ;;  %v6746_v25 = vld [vmem:[#allocation11 + $0x38] sm:$0xf0]  ;;  %v2478_v33 = vpop.f32.mrf.mxu2 }
 0x20b   :  { %v9777_v27 = vld [vmem:[#allocation11 + $0x51c] sm:$0xf]  ;;  %v8137_v37 = vor.u32 %v9971_v22, %v8136_v21  ;;  %v6749_v38 = vor.u32 %v9617_v23, %v6746_v25  ;;  %v2451_v22 = vadd.f32 %v10766_v34, %v2438_v10  ;;  %v8053_v23 = vor.u32 %v9950_v13, %v8052_v12  ;;  %v10034_v34 = vld [vmem:[#allocation14 + $0x520] sm:$0xf0]  ;;  %v8332_v12 = vld [vmem:[#allocation14 + $0x498] sm:$0xf] }
 0x20c   :  { %2730 = vmatpush.bf16.msrb.mxu2 %v6877_v28  ;;  %2708 = vmatpush.bf16.msrb.mxu0 %v7257_v45  ;;  %v7386_v28 = vld [vmem:[#allocation11 + $0x538] sm:$0xf0]  ;;  %v7941_v45 = vor.u32 %v9922_v30, %v7940_v29 }
 0x20d   :  { %v7389_v39 = vor.u32 %v9777_v27, %v7386_v28  ;;  %v9825_v40 = vld [vmem:[#allocation11 + $0x69c] sm:$0xf]  ;;  %v8024_v27 = vld [vmem:[#allocation14 + $0x230] sm:$0xf]  ;;  %v9943_v28 = vld [vmem:[#allocation14 + $0x248] sm:$0xf0] }
 0x20e   :  { %2745 = vmatpush.bf16.msrb.mxu3 %v7069_v41  ;;  %2767 = vmatpush.bf16.msra.mxu1 %v7709_v42  ;;  %v7578_v26 = vld [vmem:[#allocation11 + $0x6b8] sm:$0xf0]  ;;  %v8108_v41 = vld [vmem:[#allocation14 + $0x2d8] sm:$0xf]  ;;  %v10777_v42 = vpop.f32.mrf.mxu0 }
 0x20f   :  { %2709 = vmatmul.bf16.vlgmr.msrb.gmra.mxu0 %v10728_v24  ;;  %v9769_v47 = vld [vmem:[#allocation11 + $0x4dc] sm:$0xf]  ;;  %v7581_v54 = vor.u32 %v9825_v40, %v7578_v26  ;;  %v9894_v40 = vld [vmem:[#allocation14 + $0xc0] sm:$0xf0]  ;;  %v8388_v26 = vld [vmem:[#allocation14 + $0x508] sm:$0xf] }
 0x210   :  { %2731 = vmatpush.bf16.msrb.mxu2 %v6845_v46  ;;  %2753 = vmatpush.bf16.msra.mxu0 %v7485_v50  ;;  %v9964_v46 = vld [vmem:[#allocation14 + $0x2f0] sm:$0xf0]  ;;  %v2517_v50 = vpop.f32.mrf.mxu1 }
 0x211   :  { %v7354_v48 = vld [vmem:[#allocation11 + $0x4f8] sm:$0xf0]  ;;  %v8109_v55 = vor.u32 %v9964_v46, %v8108_v41  ;;  %v2464_v41 = vadd.f32 %v10764_v6, %v2451_v22  ;;  %v10027_v6 = vld [vmem:[#allocation14 + $0x4e8] sm:$0xf0]  ;;  %v10062_v22 = vld [vmem:[#allocation14 + $0x600] sm:$0xf0] }
 0x212   :  { %2746 = vmatpush.bf16.msrb.mxu3 %v7037_v57  ;;  %2768 = vmatpush.bf16.msra.mxu1 %v7677_v61  ;;  %v7357_v56 = vor.u32 %v9769_v47, %v7354_v48  ;;  %v9817_v57 = vld [vmem:[#allocation11 + $0x65c] sm:$0xf]  ;;  %v7913_v61 = vor.u32 %v9915_v53, %v7912_v51  ;;  %v8556_v51 = vld [vmem:[#allocation14 + $0x658] sm:$0xf]  ;;  %v8389_v53 = vor.u32 %v10034_v34, %v8388_v26  ;;  %v10195_v26 = vld [vmem:[#allocation14 + $0xa28] sm:$0xf0] }
 0x213   :  { %v9761_v62 = vld [vmem:[#allocation11 + $0x49c] sm:$0xf] }
 0x214   :  { %2732 = vmatpush.bf16.msrb.mxu2 %v6813_v59  ;;  %2754 = vmatpush.bf16.msra.mxu0 %v7453_v4  ;;  %v9957_v59 = vld [vmem:[#allocation14 + $0x2b8] sm:$0xf0]  ;;  %v7322_v63 = vld [vmem:[#allocation11 + $0x4b8] sm:$0xf0] }
 0x215   :  { %v9908_v3 = vld [vmem:[#allocation14 + $0x130] sm:$0xf0]  ;;  %v8081_v8 = vor.u32 %v9957_v59, %v8080_v58  ;;  %v7325_v9 = vor.u32 %v9761_v62, %v7322_v63  ;;  %v2780_v58 = vmul.f32 0.2, %v2464_v41  ;;  %v1070_v59 = vperm.slane %v10750_v44, 3 }
 0x216   :  { %2747 = vmatpush.bf16.msrb.mxu3 %v7005_v5  ;;  %2769 = vmatpush.bf16.msra.mxu1 %v7645_v15  ;;  %v9809_v7 = vld [vmem:[#allocation11 + $0x61c] sm:$0xf]  ;;  %v2504_v5 = vpop.f32.mrf.mxu0  ;;  %v7885_v15 = vor.u32 %v9908_v3, %v7884_v2  ;;  %v7968_v63 = vld [vmem:[#allocation14 + $0x1c0] sm:$0xf]  ;;  %v9929_v3 = vld [vmem:[#allocation14 + $0x1d8] sm:$0xf0] }
 0x217   :  { %v7514_v11 = vld [vmem:[#allocation11 + $0x638] sm:$0xf0]  ;;  %v7969_v10 = vor.u32 %v9929_v3, %v7968_v63  ;;  %v8444_v63 = vld [vmem:[#allocation14 + $0x578] sm:$0xf] }
 0x218   :  { %2733 = vmatpush.bf16.msrb.mxu2 %v6781_v19  ;;  %2755 = vmatpush.bf16.msra.mxu0 %v7421_v20  ;;  %v9753_v52 = vld [vmem:[#allocation11 + $0x45c] sm:$0xf]  ;;  %v7856_v20 = vld [vmem:[#allocation14 + $0xe0] sm:$0xf]  ;;  %v7517_v21 = vor.u32 %v9809_v7, %v7514_v11  ;;  %v10069_v7 = vld [vmem:[#allocation14 + $0x638] sm:$0xf0] }
 0x219   :  { %2748 = vmatmul.bf16.vlgmr.msrb.gmra.mxu3 %v10716_v18  ;;  %v7546_v18 = vld [vmem:[#allocation11 + $0x678] sm:$0xf0]  ;;  %v8780_v3 = vld [vmem:[#allocation14 + $0x818] sm:$0xf] }
 0x21a   :  { %5648 = vmatpush.bf16.msra.mxu3 %v8165_v16  ;;  %2770 = vmatpush.bf16.msra.mxu1 %v7613_v36  ;;  %v7549_v4 = vor.u32 %v9817_v57, %v7546_v18  ;;  %v8612_v16 = vld [vmem:[#allocation14 + $0x6c8] sm:$0xf]  ;;  %v7290_v19 = vld [vmem:[#allocation11 + $0x478] sm:$0xf0]  ;;  %v8584_v36 = vld [vmem:[#allocation14 + $0x690] sm:$0xf] }
 0x21b   :  { %v8613_v25 = vor.u32 %v10090_v17, %v8612_v16  ;;  %v7293_v30 = vor.u32 %v9753_v52, %v7290_v19  ;;  %v8585_v46 = vor.u32 %v10083_v31, %v8584_v36  ;;  %v9936_v50 = vld [vmem:[#allocation14 + $0x210] sm:$0xf0]  ;;  %v8360_v18 = vld [vmem:[#allocation14 + $0x4d0] sm:$0xf]  ;;  %v10202_v16 = vld [vmem:[#allocation14 + $0xa60] sm:$0xf0]  ;;  %v2788_v19 = vmax.f32 %v2464_v41, %v2780_v58 }
 0x21c   :  { %2734 = vmatpush.bf16.msrb.mxu2 %v6749_v38  ;;  %2756 = vmatpush.bf16.msra.mxu0 %v7389_v39  ;;  %v10784_v29 = vpop.f32.mrf.mxu3  ;;  %v7258_v38 = vld [vmem:[#allocation11 + $0x438] sm:$0xf0]  ;;  %v7828_v39 = vld [vmem:[#allocation14 + $0xa8] sm:$0xf]  ;;  %v7997_v62 = vor.u32 %v9936_v50, %v7996_v49  ;;  %v2779_v17 = vmul.f32 0.2, %v10758_v43 }
 0x21d   :  { %v7829_v48 = vor.u32 %v9894_v40, %v7828_v39  ;;  %v9880_v11 = vld [vmem:[#allocation14 + $0x50] sm:$0xf0]  ;;  %v10013_v31 = vld [vmem:[#allocation14 + $0x478] sm:$0xf0]  ;;  %v9032_v40 = vld [vmem:[#allocation14 + $0xa10] sm:$0xf]  ;;  %v10795_v34 = vpack.c.bf16 %v2788_v19, %v2788_v19 }
 0x21e   :  { %5649 = vmatpush.bf16.msra.mxu3 %v8137_v37  ;;  %2771 = vmatpush.bf16.msra.mxu1 %v7581_v54  ;;  %v9745_v37 = vld [vmem:[#allocation11 + $0x41c] sm:$0xf]  ;;  %v8472_v49 = vld [vmem:[#allocation14 + $0x5b0] sm:$0xf]  ;;  %v10055_v50 = vld [vmem:[#allocation14 + $0x5c8] sm:$0xf0] }
 0x21f   :  { %2735 = vmatmul.bf16.vlgmr.msrb.gmra.mxu2 %v10720_v32  ;;  %v9901_v32 = vld [vmem:[#allocation14 + $0xf8] sm:$0xf0]  ;;  %v7261_v47 = vor.u32 %v9745_v37, %v7258_v38  ;;  %v10076_v54 = vld [vmem:[#allocation14 + $0x670] sm:$0xf0]  ;;  %v10146_v37 = vld [vmem:[#allocation14 + $0x8a0] sm:$0xf0]  ;;  %v2787_v38 = vmax.f32 %v10758_v43, %v2779_v17 }
 0x220   :  { %5635 = vmatpush.bf16.msra.mxu2 %v7941_v45  ;;  %2757 = vmatpush.bf16.msra.mxu0 %v7357_v56  ;;  %v7857_v33 = vor.u32 %v9901_v32, %v7856_v20  ;;  %v8025_v45 = vor.u32 %v9943_v28, %v8024_v27  ;;  %v9887_v56 = vld [vmem:[#allocation14 + $0x88] sm:$0xf0]  ;;  %v8557_v1 = vor.u32 %v10076_v54, %v8556_v51  ;;  %v10020_v5 = vld [vmem:[#allocation14 + $0x4b0] sm:$0xf0]  ;;  %v9873_v27 = vld [vmem:[#allocation14 + $0x18] sm:$0xf0] }
 0x221   :  { %v8304_v28 = vld [vmem:[#allocation14 + $0x460] sm:$0xf]  ;;  %v8276_v51 = vld [vmem:[#allocation14 + $0x428] sm:$0xf]  ;;  %v8808_v54 = vld [vmem:[#allocation14 + $0x850] sm:$0xf] }
 0x222   :  { %5650 = vmatpush.bf16.msra.mxu3 %v8109_v55  ;;  %2772 = vmatpush.bf16.msra.mxu1 %v7549_v4  ;;  %v7800_v55 = vld [vmem:[#allocation14 + $0x70] sm:$0xf]  ;;  %v2528_v57 = vpop.f32.mrf.mxu2  ;;  %v8528_v4 = vld [vmem:[#allocation14 + $0x620] sm:$0xf]  ;;  %v10041_v17 = vld [vmem:[#allocation14 + $0x558] sm:$0xf0] }
 0x223   :  { %v7801_v2 = vor.u32 %v9887_v56, %v7800_v55  ;;  %v2529_v52 = vadd.f32 %v2528_v57, %v1070_v59  ;;  %v8529_v20 = vor.u32 %v10069_v7, %v8528_v4  ;;  %v10139_v55 = vld [vmem:[#allocation14 + $0x868] sm:$0xf0]  ;;  %v9033_v56 = vor.u32 %v10195_v26, %v9032_v40  ;;  %v9004_v57 = vld [vmem:[#allocation14 + $0x9d8] sm:$0xf]  ;;  %v10132_v4 = vld [vmem:[#allocation14 + $0x830] sm:$0xf0] }
 0x224   :  { %5636 = vmatpush.bf16.msra.mxu2 %v7913_v61  ;;  %2758 = vmatpush.bf16.msra.mxu0 %v7325_v9  ;;  %v1069_v61 = vperm.slane %v10750_v44, 2  ;;  %v7772_v9 = vld [vmem:[#allocation14 + $0x38] sm:$0xf]  ;;  %v8752_v19 = vld [vmem:[#allocation14 + $0x7e0] sm:$0xf] }
 0x225   :  { %v7773_v32 = vor.u32 %v9880_v11, %v7772_v9  ;;  %v2542_v39 = vadd.f32 %v10784_v29, %v2529_v52  ;;  %v8220_v52 = vld [vmem:[#allocation14 + $0x3b8] sm:$0xf]  ;;  %v9284_v40 = vld [vmem:[#allocation14 + $0xc08] sm:$0xf]  ;;  %v10258_v26 = vld [vmem:[#allocation14 + $0xc20] sm:$0xf0] }
 0x226   :  { %5651 = vmatpush.bf16.msra.mxu3 %v8081_v8  ;;  %2773 = vmatpush.bf16.msra.mxu1 %v7517_v21  ;;  %v8361_v8 = vor.u32 %v10027_v6, %v8360_v18  ;;  %v2567_v13 = vpop.f32.mrf.mxu1  ;;  %v8500_v21 = vld [vmem:[#allocation14 + $0x5e8] sm:$0xf]  ;;  %v10188_v18 = vld [vmem:[#allocation14 + $0x9f0] sm:$0xf0]  ;;  %v10799_v6 = vpack.c.bf16 %v2787_v38, %v2787_v38  ;;  %v8920_v38 = vld [vmem:[#allocation14 + $0x930] sm:$0xf] }
 0x227   :  { %v8501_v41 = vor.u32 %v10062_v22, %v8500_v21  ;;  %v9005_v7 = vor.u32 %v10188_v18, %v9004_v57  ;;  %v8948_v21 = vld [vmem:[#allocation14 + $0x968] sm:$0xf]  ;;  %v10174_v22 = vld [vmem:[#allocation14 + $0x980] sm:$0xf0] }
 0x228   :  { %5637 = vmatpush.bf16.msra.mxu2 %v7885_v15  ;;  %2759 = vmatpush.bf16.msra.mxu0 %v7293_v30  ;;  %v9060_v15 = vld [vmem:[#allocation14 + $0xa48] sm:$0xf] }
 0x229   :  { %2774 = vmatmul.bf16.vlgmr.msra.gmra.mxu1 %v10724_v0  ;;  %v2543_v0 = vpop.f32.mrf.mxu3  ;;  %v9061_v30 = vor.u32 %v10202_v16, %v9060_v15  ;;  %v8781_v16 = vor.u32 %v10132_v4, %v8780_v3  ;;  %v9975_v3 = vld [vmem:[#allocation14 + $0x34c] sm:$0xf]  ;;  %v8166_v4 = vld [vmem:[#allocation14 + $0x364] sm:$0xf0] }
 0x22a   :  { %5652 = vmatpush.bf16.msra.mxu3 %v8053_v23  ;;  %5674 = vmatpush.bf16.msrb.mxu1 %v8613_v25  ;;  %v8333_v23 = vor.u32 %v10020_v5, %v8332_v12  ;;  %v7744_v25 = vld [vmem:[#allocation14] sm:$0xf]  ;;  %v2530_v36 = vpop.f32.mrf.mxu2  ;;  %v8248_v0 = vld [vmem:[#allocation14 + $0x3f0] sm:$0xf] }
 0x22b   :  { %v8416_v12 = vld [vmem:[#allocation14 + $0x540] sm:$0xf]  ;;  %v9985_v36 = vld [vmem:[#allocation14 + $0x398] sm:$0xf0] }
 0x22c   :  { %5638 = vmatpush.bf16.msra.mxu2 %v7857_v33  ;;  %2760 = vmatpush.bf16.msra.mxu0 %v7261_v47  ;;  %v2477_v33 = vadd.f32 %v10771_v60, %v1069_v61  ;;  %v8305_v47 = vor.u32 %v10013_v31, %v8304_v28  ;;  %v8473_v61 = vor.u32 %v10055_v50, %v8472_v49  ;;  %v8724_v31 = vld [vmem:[#allocation14 + $0x7a8] sm:$0xf]  ;;  %v8892_v50 = vld [vmem:[#allocation14 + $0x8f8] sm:$0xf] }
 0x22e   :  { %5653 = vmatpush.bf16.msra.mxu3 %v8025_v45  ;;  %5675 = vmatpush.bf16.msrb.mxu1 %v8585_v46  ;;  %v2554_v45 = vpop.f32.mrf.mxu0  ;;  %v7745_v46 = vor.u32 %v9873_v27, %v7744_v25  ;;  %v2490_v43 = vadd.f32 %v10768_v35, %v2477_v33  ;;  %v2569_v29 = vpop.f32.mrf.mxu1  ;;  %v8192_v33 = vld [vmem:[#allocation14 + $0x380] sm:$0xf] }
 0x22f   :  { %2761 = vmatmul.bf16.vlgmr.msra.gmra.mxu0 %v10728_v24  ;;  %v8836_v24 = vld [vmem:[#allocation14 + $0x888] sm:$0xf]  ;;  %v2555_v60 = vadd.f32 %v2554_v45, %v2542_v39  ;;  %v10167_v39 = vld [vmem:[#allocation14 + $0x948] sm:$0xf0]  ;;  %v8193_v45 = vor.u32 %v9985_v36, %v8192_v33  ;;  %v10160_v29 = vld [vmem:[#allocation14 + $0x910] sm:$0xf0] }
 0x230   :  { %5639 = vmatpush.bf16.msra.mxu2 %v7829_v48  ;;  %5661 = vmatpush.bf16.msrb.mxu0 %v8389_v53  ;;  %v8837_v48 = vor.u32 %v10146_v37, %v8836_v24  ;;  %v10006_v53 = vld [vmem:[#allocation14 + $0x440] sm:$0xf0]  ;;  %v2503_v58 = vadd.f32 %v10777_v42, %v2490_v43  ;;  %v10181_v42 = vld [vmem:[#allocation14 + $0x9b8] sm:$0xf0]  ;;  %v8949_v37 = vor.u32 %v10174_v22, %v8948_v21  ;;  %v9912_v22 = vld [vmem:[#allocation14 + $0x154] sm:$0xf] }
 0x231   :  { %v2568_v59 = vadd.f32 %v2567_v13, %v2555_v60  ;;  %v8277_v35 = vor.u32 %v10006_v53, %v8276_v51  ;;  %v10118_v24 = vld [vmem:[#allocation14 + $0x7c0] sm:$0xf0]  ;;  %v8921_v49 = vor.u32 %v10167_v39, %v8920_v38  ;;  %v9285_v51 = vor.u32 %v10258_v26, %v9284_v40  ;;  %v9256_v53 = vld [vmem:[#allocation14 + $0xbd0] sm:$0xf]  ;;  %v9905_v38 = vld [vmem:[#allocation14 + $0x11c] sm:$0xf] }
 0x232   :  { %5654 = vmatpush.bf16.msra.mxu3 %v7997_v62  ;;  %5676 = vmatpush.bf16.msrb.mxu1 %v8557_v1  ;;  %v8809_v62 = vor.u32 %v10139_v55, %v8808_v54  ;;  %v10048_v1 = vld [vmem:[#allocation14 + $0x590] sm:$0xf0]  ;;  %v2516_v13 = vadd.f32 %v10774_v14, %v2503_v58  ;;  %v10251_v54 = vld [vmem:[#allocation14 + $0xbe8] sm:$0xf0]  ;;  %v1071_v55 = vperm.slane %v10750_v44, 4 }
 0x233   :  { %v8445_v9 = vor.u32 %v10048_v1, %v8444_v63  ;;  %v2782_v5 = vmul.f32 0.2, %v2568_v59  ;;  %v8668_v58 = vld [vmem:[#allocation14 + $0x738] sm:$0xf]  ;;  %v10153_v63 = vld [vmem:[#allocation14 + $0x8d8] sm:$0xf0] }
 0x234   :  { %5640 = vmatpush.bf16.msra.mxu2 %v7801_v2  ;;  %5662 = vmatpush.bf16.msrb.mxu0 %v8361_v8  ;;  %v9999_v2 = vld [vmem:[#allocation14 + $0x408] sm:$0xf0]  ;;  %v8976_v8 = vld [vmem:[#allocation14 + $0x9a0] sm:$0xf]  ;;  %v2781_v25 = vmul.f32 0.2, %v2516_v13 }
 0x235   :  { %v8249_v15 = vor.u32 %v9999_v2, %v8248_v0  ;;  %v2790_v27 = vmax.f32 %v2568_v59, %v2782_v5  ;;  %v8893_v59 = vor.u32 %v10160_v29, %v8892_v50  ;;  %v9228_v1 = vld [vmem:[#allocation14 + $0xb98] sm:$0xf]  ;;  %v10244_v0 = vld [vmem:[#allocation14 + $0xbb0] sm:$0xf0]  ;;  %v7942_v5 = vld [vmem:[#allocation14 + $0x1a4] sm:$0xf0] }
 0x236   :  { %5655 = vmatpush.bf16.msra.mxu3 %v7969_v10  ;;  %5677 = vmatpush.bf16.msrb.mxu1 %v8529_v20  ;;  %v2556_v11 = vpop.f32.mrf.mxu0  ;;  %v9992_v10 = vld [vmem:[#allocation14 + $0x3d0] sm:$0xf0]  ;;  %v10125_v20 = vld [vmem:[#allocation14 + $0x7f8] sm:$0xf0]  ;;  %v2789_v60 = vmax.f32 %v2516_v13, %v2781_v25  ;;  %v10230_v33 = vld [vmem:[#allocation14 + $0xb40] sm:$0xf0] }
 0x237   :  { %v8221_v28 = vor.u32 %v9992_v10, %v8220_v52  ;;  %v9968_v52 = vld [vmem:[#allocation14 + $0x314] sm:$0xf]  ;;  %v8138_v10 = vld [vmem:[#allocation14 + $0x32c] sm:$0xf0]  ;;  %v7886_v39 = vld [vmem:[#allocation14 + $0x134] sm:$0xf0] }
 0x238   :  { %5641 = vmatpush.bf16.msra.mxu2 %v7773_v32  ;;  %5663 = vmatpush.bf16.msrb.mxu0 %v8333_v23  ;;  %v8977_v32 = vor.u32 %v10181_v42, %v8976_v8  ;;  %v8417_v23 = vor.u32 %v10041_v17, %v8416_v12  ;;  %v10810_v18 = vpack.c.bf16 %v2789_v60, %v2789_v60  ;;  %v8640_v8 = vld [vmem:[#allocation14 + $0x700] sm:$0xf]  ;;  %v10097_v42 = vld [vmem:[#allocation14 + $0x718] sm:$0xf0]  ;;  %v10223_v60 = vld [vmem:[#allocation14 + $0xb08] sm:$0xf0] }
 0x239   :  { %5656 = vmatmul.bf16.vlgmr.msra.gmra.mxu3 %v10795_v34  ;;  %v9229_v12 = vor.u32 %v10244_v0, %v9228_v1  ;;  %v10237_v17 = vld [vmem:[#allocation14 + $0xb78] sm:$0xf0]  ;;  %v7858_v29 = vld [vmem:[#allocation14 + $0xfc] sm:$0xf0]  ;;  %v7830_v0 = vld [vmem:[#allocation14 + $0xc4] sm:$0xf0] }
 0x23a   :  { %5700 = vmatpush.bf16.msrb.mxu3 %v9061_v30  ;;  %5678 = vmatpush.bf16.msrb.mxu1 %v8501_v41  ;;  %v8753_v30 = vor.u32 %v10125_v20, %v8752_v19  ;;  %v10806_v41 = vpack.c.bf16 %v2790_v27, %v2790_v27  ;;  %v8641_v20 = vor.u32 %v10097_v42, %v8640_v8  ;;  %v7914_v27 = vld [vmem:[#allocation14 + $0x16c] sm:$0xf0]  ;;  %v10209_v8 = vld [vmem:[#allocation14 + $0xa98] sm:$0xf0] }
 0x23b   :  { %v9480_v42 = vld [vmem:[#allocation14 + $0xd90] sm:$0xf] }
 0x23c   :  { %5642 = vmatpush.bf16.msra.mxu2 %v7745_v46  ;;  %5664 = vmatpush.bf16.msrb.mxu0 %v8305_v47  ;;  %v10804_v14 = vpop.f32.mrf.mxu3  ;;  %v8725_v46 = vor.u32 %v10118_v24, %v8724_v31  ;;  %v8696_v47 = vld [vmem:[#allocation14 + $0x770] sm:$0xf]  ;;  %v9961_v31 = vld [vmem:[#allocation14 + $0x2dc] sm:$0xf]  ;;  %v8110_v24 = vld [vmem:[#allocation14 + $0x2f4] sm:$0xf0] }
 0x23e   :  { %5701 = vmatpush.bf16.msrb.mxu3 %v9033_v56  ;;  %5679 = vmatpush.bf16.msrb.mxu1 %v8473_v61  ;;  %v10104_v61 = vld [vmem:[#allocation14 + $0x750] sm:$0xf0] }
 0x23f   :  { %5643 = vmatmul.bf16.vlgmr.msra.gmra.mxu2 %v10799_v6 }
 0x240   :  { %5687 = vmatpush.bf16.msrb.mxu2 %v8837_v48  ;;  %5665 = vmatpush.bf16.msrb.mxu0 %v8277_v35  ;;  %v10111_v48 = vld [vmem:[#allocation14 + $0x788] sm:$0xf0]  ;;  %v8864_v35 = vld [vmem:[#allocation14 + $0x8c0] sm:$0xf] }
 0x241   :  { %v8697_v57 = vor.u32 %v10111_v48, %v8696_v47  ;;  %v8865_v11 = vor.u32 %v10153_v63, %v8864_v35  ;;  %v9954_v47 = vld [vmem:[#allocation14 + $0x2a4] sm:$0xf]  ;;  %v8082_v48 = vld [vmem:[#allocation14 + $0x2bc] sm:$0xf0]  ;;  %v8054_v35 = vld [vmem:[#allocation14 + $0x284] sm:$0xf0] }
 0x242   :  { %5702 = vmatpush.bf16.msrb.mxu3 %v9005_v7  ;;  %5680 = vmatpush.bf16.msrb.mxu1 %v8445_v9  ;;  %v2580_v43 = vpop.f32.mrf.mxu2  ;;  %v8669_v7 = vor.u32 %v10104_v61, %v8668_v58  ;;  %v9919_v9 = vld [vmem:[#allocation14 + $0x18c] sm:$0xf]  ;;  %v9508_v58 = vld [vmem:[#allocation14 + $0xdc8] sm:$0xf]  ;;  %v10314_v61 = vld [vmem:[#allocation14 + $0xde0] sm:$0xf0] }
 0x243   :  { %v2581_v44 = vadd.f32 %v2580_v43, %v1071_v55  ;;  %v7945_v21 = vor.u32 %v9919_v9, %v7942_v5  ;;  %v9898_v43 = vld [vmem:[#allocation14 + $0xe4] sm:$0xf]  ;;  %v9891_v63 = vld [vmem:[#allocation14 + $0xac] sm:$0xf] }
 0x244   :  { %5688 = vmatpush.bf16.msrb.mxu2 %v8809_v62  ;;  %5666 = vmatpush.bf16.msrb.mxu0 %v8249_v15  ;;  %v2595_v56 = vpop.f32.mrf.mxu3  ;;  %v9257_v62 = vor.u32 %v10251_v54, %v9256_v53  ;;  %v8169_v15 = vor.u32 %v9975_v3, %v8166_v4  ;;  %v9116_v54 = vld [vmem:[#allocation14 + $0xab8] sm:$0xf]  ;;  %v7861_v1 = vor.u32 %v9898_v43, %v7858_v29  ;;  %v9088_v4 = vld [vmem:[#allocation14 + $0xa80] sm:$0xf]  ;;  %v10307_v9 = vld [vmem:[#allocation14 + $0xda8] sm:$0xf0] }
 0x245   :  { %v2594_v19 = vadd.f32 %v10804_v14, %v2581_v44  ;;  %v7917_v14 = vor.u32 %v9912_v22, %v7914_v27  ;;  %v8085_v56 = vor.u32 %v9954_v47, %v8082_v48  ;;  %v9481_v5 = vor.u32 %v10307_v9, %v9480_v42  ;;  %v7998_v22 = vld [vmem:[#allocation14 + $0x214] sm:$0xf0]  ;;  %v10143_v29 = vld [vmem:[#allocation14 + $0x88c] sm:$0xf]  ;;  %v8810_v42 = vld [vmem:[#allocation14 + $0x86c] sm:$0xf0] }
 0x246   :  { %5703 = vmatpush.bf16.msrb.mxu3 %v8977_v32  ;;  %5681 = vmatpush.bf16.msrb.mxu1 %v8417_v23  ;;  %v2619_v2 = vpop.f32.mrf.mxu1  ;;  %v10003_v9 = vld [vmem:[#allocation14 + $0x42c] sm:$0xf] }
 0x248   :  { %5689 = vmatpush.bf16.msrb.mxu2 %v8781_v16  ;;  %5667 = vmatpush.bf16.msrb.mxu0 %v8221_v28  ;;  %v9200_v16 = vld [vmem:[#allocation14 + $0xb60] sm:$0xf]  ;;  %v8141_v28 = vor.u32 %v9968_v52, %v8138_v10  ;;  %v9089_v52 = vor.u32 %v10209_v8, %v9088_v4  ;;  %v9368_v4 = vld [vmem:[#allocation14 + $0xcb0] sm:$0xf] }
 0x249   :  { %5682 = vmatmul.bf16.vlgmr.msrb.gmra.mxu1 %v10806_v41  ;;  %v9201_v23 = vor.u32 %v10237_v17, %v9200_v16  ;;  %v9884_v16 = vld [vmem:[#allocation14 + $0x74] sm:$0xf]  ;;  %v7802_v17 = vld [vmem:[#allocation14 + $0x8c] sm:$0xf0] }
 0x24a   :  { %5704 = vmatpush.bf16.msrb.mxu3 %v8949_v37  ;;  %v2582_v13 = vpop.f32.mrf.mxu2 }
 0x24b   :  { %v8390_v13 = vld [vmem:[#allocation14 + $0x524] sm:$0xf0] }
 0x24c   :  { %5690 = vmatpush.bf16.msrb.mxu2 %v8753_v30  ;;  %5668 = vmatpush.bf16.msrb.mxu0 %v8193_v45  ;;  %v2606_v32 = vpop.f32.mrf.mxu0  ;;  %v9172_v30 = vld [vmem:[#allocation14 + $0xb28] sm:$0xf]  ;;  %v8113_v45 = vor.u32 %v9961_v31, %v8110_v24  ;;  %v9877_v31 = vld [vmem:[#allocation14 + $0x3c] sm:$0xf]  ;;  %v7774_v24 = vld [vmem:[#allocation14 + $0x54] sm:$0xf0] }
 0x24d   :  { %v2607_v25 = vadd.f32 %v2606_v32, %v2594_v19  ;;  %v9173_v40 = vor.u32 %v10230_v33, %v9172_v30  ;;  %v9933_v19 = vld [vmem:[#allocation14 + $0x1fc] sm:$0xf]  ;;  %v9452_v32 = vld [vmem:[#allocation14 + $0xd58] sm:$0xf] }
 0x24e   :  { %5705 = vmatpush.bf16.msrb.mxu3 %v8921_v49  ;;  %v2621_v36 = vpop.f32.mrf.mxu1  ;;  %v10819_v30 = vld [vmem:[#allocation13] sm:$0xff] }
 0x24f   :  { %5669 = vmatmul.bf16.vlgmr.msrb.gmra.mxu0 %v10810_v18  ;;  %v2620_v37 = vadd.f32 %v2619_v2, %v2607_v25  ;;  %v9940_v2 = vld [vmem:[#allocation14 + $0x234] sm:$0xf]  ;;  %v8362_v25 = vld [vmem:[#allocation14 + $0x4ec] sm:$0xf0]  ;;  %v1072_v33 = vperm.slane %v10819_v30, 5  ;;  %v7805_v36 = vor.u32 %v9884_v16, %v7802_v17 }
 0x250   :  { %5691 = vmatpush.bf16.msrb.mxu2 %v8725_v46  ;;  %5713 = vmatpush.bf16.msra.mxu0 %v9285_v51  ;;  %v9144_v46 = vld [vmem:[#allocation14 + $0xaf0] sm:$0xf]  ;;  %v7889_v51 = vor.u32 %v9905_v38, %v7886_v39  ;;  %v9926_v38 = vld [vmem:[#allocation14 + $0x1c4] sm:$0xf] }
 0x251   :  { %v2783_v26 = vmul.f32 0.2, %v2620_v37  ;;  %v9145_v53 = vor.u32 %v10223_v60, %v9144_v46  ;;  %v10017_v46 = vld [vmem:[#allocation14 + $0x49c] sm:$0xf]  ;;  %v8334_v60 = vld [vmem:[#allocation14 + $0x4b4] sm:$0xf0] }
 0x252   :  { %5706 = vmatpush.bf16.msrb.mxu3 %v8893_v59  ;;  %v9947_v59 = vld [vmem:[#allocation14 + $0x26c] sm:$0xf] }
 0x253   :  { %v2791_v49 = vmax.f32 %v2620_v37, %v2783_v26  ;;  %v10293_v26 = vld [vmem:[#allocation14 + $0xd38] sm:$0xf0] }
 0x254   :  { %5692 = vmatpush.bf16.msrb.mxu2 %v8697_v57  ;;  %5714 = vmatpush.bf16.msra.mxu0 %v9257_v62  ;;  %v2608_v50 = vpop.f32.mrf.mxu0  ;;  %v10216_v57 = vld [vmem:[#allocation14 + $0xad0] sm:$0xf0]  ;;  %v9509_v62 = vor.u32 %v10314_v61, %v9508_v58  ;;  %v8838_v58 = vld [vmem:[#allocation14 + $0x8a4] sm:$0xf0]  ;;  %v10010_v61 = vld [vmem:[#allocation14 + $0x464] sm:$0xf] }
 0x255   :  { %v10814_v55 = vpack.c.bf16 %v2791_v49, %v2791_v49  ;;  %v9117_v3 = vor.u32 %v10216_v57, %v9116_v54  ;;  %v7777_v49 = vor.u32 %v9877_v31, %v7774_v24  ;;  %v9870_v50 = vld [vmem:[#allocation14 + $0x4] sm:$0xf]  ;;  %v8337_v54 = vor.u32 %v10017_v46, %v8334_v60  ;;  %v10265_v31 = vld [vmem:[#allocation14 + $0xc58] sm:$0xf0]  ;;  %v8222_v46 = vld [vmem:[#allocation14 + $0x3d4] sm:$0xf0] }
 0x256   :  { %5707 = vmatpush.bf16.msrb.mxu3 %v8865_v11  ;;  %5726 = vmatpush.bf16.msra.mxu1 %v9509_v62  ;;  %v8026_v11 = vld [vmem:[#allocation14 + $0x24c] sm:$0xf0]  ;;  %v10286_v57 = vld [vmem:[#allocation14 + $0xd00] sm:$0xf0] }
 0x257   :  { %v8029_v10 = vor.u32 %v9940_v2, %v8026_v11  ;;  %v10136_v2 = vld [vmem:[#allocation14 + $0x854] sm:$0xf]  ;;  %v8278_v11 = vld [vmem:[#allocation14 + $0x444] sm:$0xf0] }
 0x258   :  { %5693 = vmatpush.bf16.msrb.mxu2 %v8669_v7  ;;  %5715 = vmatpush.bf16.msra.mxu0 %v9229_v12  ;;  %v8057_v7 = vor.u32 %v9947_v59, %v8054_v35  ;;  %v10031_v12 = vld [vmem:[#allocation14 + $0x50c] sm:$0xf]  ;;  %v8306_v59 = vld [vmem:[#allocation14 + $0x47c] sm:$0xf0]  ;;  %v8813_v16 = vor.u32 %v10136_v2, %v8810_v42  ;;  %v8281_v17 = vor.u32 %v10003_v9, %v8278_v11  ;;  %v8698_v2 = vld [vmem:[#allocation14 + $0x78c] sm:$0xf0] }
 0x259   :  { %v8978_v42 = vld [vmem:[#allocation14 + $0x9bc] sm:$0xf0] }
 0x25a   :  { %5752 = vmatpush.bf16.msra.mxu3 %v8169_v15  ;;  %v7833_v15 = vor.u32 %v9891_v63, %v7830_v0  ;;  %5727 = vmatpush.bf16.msra.mxu1 %v9481_v5  ;;  %v8841_v0 = vor.u32 %v10143_v29, %v8838_v58 }
 0x25c   :  { %5694 = vmatpush.bf16.msrb.mxu2 %v8641_v20  ;;  %5716 = vmatpush.bf16.msra.mxu0 %v9201_v23  ;;  %v10817_v44 = vpop.f32.mrf.mxu3  ;;  %v8393_v20 = vor.u32 %v10031_v12, %v8390_v13  ;;  %v10024_v23 = vld [vmem:[#allocation14 + $0x4d4] sm:$0xf] }
 0x25d   :  { %v8365_v39 = vor.u32 %v10024_v23, %v8362_v25  ;;  %v9996_v23 = vld [vmem:[#allocation14 + $0x3f4] sm:$0xf]  ;;  %v8250_v25 = vld [vmem:[#allocation14 + $0x40c] sm:$0xf0] }
 0x25e   :  { %5753 = vmatpush.bf16.msra.mxu3 %v8141_v28 }
 0x25f   :  { %5695 = vmatmul.bf16.vlgmr.msrb.gmra.mxu2 %v10814_v55 }
 0x260   :  { %5739 = vmatpush.bf16.msra.mxu2 %v7945_v21  ;;  %5717 = vmatpush.bf16.msra.mxu0 %v9173_v40  ;;  %v10300_v21 = vld [vmem:[#allocation14 + $0xd70] sm:$0xf0]  ;;  %v9424_v40 = vld [vmem:[#allocation14 + $0xd20] sm:$0xf] }
 0x261   :  { %v9453_v27 = vor.u32 %v10300_v21, %v9452_v32  ;;  %v9425_v47 = vor.u32 %v10293_v26, %v9424_v40  ;;  %v9062_v32 = vld [vmem:[#allocation14 + $0xa64] sm:$0xf0]  ;;  %v8253_v40 = vor.u32 %v9996_v23, %v8250_v25 }
 0x262   :  { %5754 = vmatpush.bf16.msra.mxu3 %v8113_v45  ;;  %v2632_v28 = vpop.f32.mrf.mxu2  ;;  %v7970_v45 = vld [vmem:[#allocation14 + $0x1dc] sm:$0xf0] }
 0x263   :  { %5728 = vmatpush.bf16.msra.mxu1 %v9453_v27  ;;  %v2633_v43 = vadd.f32 %v2632_v28, %v1072_v33  ;;  %v10122_v33 = vld [vmem:[#allocation14 + $0x7e4] sm:$0xf] }
 0x264   :  { %5740 = vmatpush.bf16.msra.mxu2 %v7917_v14  ;;  %5718 = vmatpush.bf16.msra.mxu0 %v9145_v53  ;;  %v2647_v37 = vpop.f32.mrf.mxu3  ;;  %v8001_v14 = vor.u32 %v9933_v19, %v7998_v22  ;;  %v7973_v53 = vor.u32 %v9926_v38, %v7970_v45  ;;  %v8782_v19 = vld [vmem:[#allocation14 + $0x834] sm:$0xf0]  ;;  %v10192_v38 = vld [vmem:[#allocation14 + $0xa14] sm:$0xf]  ;;  %v9989_v45 = vld [vmem:[#allocation14 + $0x3bc] sm:$0xf] }
 0x266   :  { %5755 = vmatpush.bf16.msra.mxu3 %v8085_v56  ;;  %v2671_v48 = vpop.f32.mrf.mxu1  ;;  %v9396_v56 = vld [vmem:[#allocation14 + $0xce8] sm:$0xf] }
 0x267   :  { %5729 = vmatpush.bf16.msra.mxu1 %v9425_v47  ;;  %v9397_v35 = vor.u32 %v10286_v57, %v9396_v56  ;;  %v10087_v47 = vld [vmem:[#allocation14 + $0x6cc] sm:$0xf]  ;;  %v10080_v56 = vld [vmem:[#allocation14 + $0x694] sm:$0xf]  ;;  %v8586_v57 = vld [vmem:[#allocation14 + $0x6ac] sm:$0xf0] }
 0x268   :  { %5741 = vmatpush.bf16.msra.mxu2 %v7889_v51  ;;  %5719 = vmatpush.bf16.msra.mxu0 %v9117_v3  ;;  %v7746_v51 = vld [vmem:[#allocation14 + $0x1c] sm:$0xf0]  ;;  %v8309_v3 = vor.u32 %v10010_v61, %v8306_v59  ;;  %v9006_v61 = vld [vmem:[#allocation14 + $0x9f4] sm:$0xf0]  ;;  %v9982_v59 = vld [vmem:[#allocation14 + $0x384] sm:$0xf] }
 0x269   :  { %v7749_v63 = vor.u32 %v9870_v50, %v7746_v51  ;;  %v10115_v50 = vld [vmem:[#allocation14 + $0x7ac] sm:$0xf]  ;;  %v8726_v51 = vld [vmem:[#allocation14 + $0x7c4] sm:$0xf0] }
 0x26a   :  { %5756 = vmatpush.bf16.msra.mxu3 %v8057_v7  ;;  %v2634_v62 = vpop.f32.mrf.mxu2  ;;  %v10279_v7 = vld [vmem:[#allocation14 + $0xcc8] sm:$0xf0] }
 0x26b   :  { %5730 = vmatpush.bf16.msra.mxu1 %v9397_v35  ;;  %v9369_v12 = vor.u32 %v10279_v7, %v9368_v4  ;;  %v8194_v35 = vld [vmem:[#allocation14 + $0x39c] sm:$0xf0]  ;;  %v8589_v62 = vor.u32 %v10080_v56, %v8586_v57  ;;  %v10073_v4 = vld [vmem:[#allocation14 + $0x65c] sm:$0xf]  ;;  %v8558_v7 = vld [vmem:[#allocation14 + $0x674] sm:$0xf0] }
 0x26c   :  { %5742 = vmatpush.bf16.msra.mxu2 %v7861_v1  ;;  %5720 = vmatpush.bf16.msra.mxu0 %v9089_v52  ;;  %v2646_v1 = vadd.f32 %v10817_v44, %v2633_v43  ;;  %v2658_v8 = vpop.f32.mrf.mxu0  ;;  %v10129_v44 = vld [vmem:[#allocation14 + $0x81c] sm:$0xf]  ;;  %v9340_v52 = vld [vmem:[#allocation14 + $0xc78] sm:$0xf]  ;;  %v8561_v9 = vor.u32 %v10073_v4, %v8558_v7  ;;  %v10255_v7 = vld [vmem:[#allocation14 + $0xc0c] sm:$0xf] }
 0x26d   :  { %v8785_v28 = vor.u32 %v10129_v44, %v8782_v19  ;;  %v8530_v44 = vld [vmem:[#allocation14 + $0x63c] sm:$0xf0]  ;;  %v8950_v19 = vld [vmem:[#allocation14 + $0x984] sm:$0xf0] }
 0x26e   :  { %5757 = vmatpush.bf16.msra.mxu3 %v8029_v10  ;;  %v2659_v13 = vadd.f32 %v2658_v8, %v2646_v1  ;;  %v2673_v5 = vpop.f32.mrf.mxu1  ;;  %v10272_v10 = vld [vmem:[#allocation14 + $0xc90] sm:$0xf0]  ;;  %v10178_v8 = vld [vmem:[#allocation14 + $0x9a4] sm:$0xf] }
 0x26f   :  { %5731 = vmatpush.bf16.msra.mxu1 %v9369_v12  ;;  %v9341_v21 = vor.u32 %v10272_v10, %v9340_v52  ;;  %v10108_v1 = vld [vmem:[#allocation14 + $0x774] sm:$0xf]  ;;  %v8981_v5 = vor.u32 %v10178_v8, %v8978_v42  ;;  %v10171_v10 = vld [vmem:[#allocation14 + $0x96c] sm:$0xf]  ;;  %v9286_v8 = vld [vmem:[#allocation14 + $0xc24] sm:$0xf0] }
 0x270   :  { %5743 = vmatpush.bf16.msra.mxu2 %v7833_v15  ;;  %5765 = vmatpush.bf16.msrb.mxu0 %v8393_v20  ;;  %v2672_v15 = vadd.f32 %v2671_v48, %v2659_v13  ;;  %v10199_v20 = vld [vmem:[#allocation14 + $0xa4c] sm:$0xf]  ;;  %v8614_v48 = vld [vmem:[#allocation14 + $0x6e4] sm:$0xf0]  ;;  %v8701_v12 = vor.u32 %v10108_v1, %v8698_v2  ;;  %v10101_v13 = vld [vmem:[#allocation14 + $0x73c] sm:$0xf]  ;;  %v8953_v25 = vor.u32 %v10171_v10, %v8950_v19 }
 0x271   :  { %v9065_v37 = vor.u32 %v10199_v20, %v9062_v32  ;;  %v8617_v43 = vor.u32 %v10087_v47, %v8614_v48  ;;  %v8474_v47 = vld [vmem:[#allocation14 + $0x5cc] sm:$0xf0]  ;;  %v7892_v1 = vld [vmem:[#allocation14 + $0x120] sm:$0xf]  ;;  %v9979_v2 = vld [vmem:[#allocation14 + $0x368] sm:$0xf0] }
 0x272   :  { %5758 = vmatpush.bf16.msra.mxu3 %v8001_v14  ;;  %v2784_v22 = vmul.f32 0.2, %v2672_v15  ;;  %v8754_v14 = vld [vmem:[#allocation14 + $0x7fc] sm:$0xf0]  ;;  %v9972_v10 = vld [vmem:[#allocation14 + $0x330] sm:$0xf0] }
 0x273   :  { %5732 = vmatpush.bf16.msra.mxu1 %v9341_v21  ;;  %v10094_v21 = vld [vmem:[#allocation14 + $0x704] sm:$0xf] }
 0x274   :  { %5744 = vmatpush.bf16.msra.mxu2 %v7805_v36  ;;  %5766 = vmatpush.bf16.msrb.mxu0 %v8365_v39  ;;  %v2792_v27 = vmax.f32 %v2672_v15, %v2784_v22  ;;  %v9312_v36 = vld [vmem:[#allocation14 + $0xc40] sm:$0xf]  ;;  %v2660_v24 = vpop.f32.mrf.mxu0  ;;  %v9034_v39 = vld [vmem:[#allocation14 + $0xa2c] sm:$0xf0]  ;;  %v8670_v15 = vld [vmem:[#allocation14 + $0x754] sm:$0xf0] }
 0x275   :  { %v9313_v60 = vor.u32 %v10265_v31, %v9312_v36  ;;  %v9037_v29 = vor.u32 %v10192_v38, %v9034_v39  ;;  %v8673_v32 = vor.u32 %v10101_v13, %v8670_v15  ;;  %v8642_v22 = vld [vmem:[#allocation14 + $0x71c] sm:$0xf0]  ;;  %v8922_v31 = vld [vmem:[#allocation14 + $0x94c] sm:$0xf0]  ;;  %v7864_v15 = vld [vmem:[#allocation14 + $0xe8] sm:$0xf] }
 0x276   :  { %5759 = vmatpush.bf16.msra.mxu3 %v7973_v53  ;;  %v10824_v26 = vpack.c.bf16 %v2792_v27, %v2792_v27  ;;  %v10185_v53 = vld [vmem:[#allocation14 + $0x9dc] sm:$0xf]  ;;  %v10164_v27 = vld [vmem:[#allocation14 + $0x934] sm:$0xf]  ;;  %v7948_v24 = vld [vmem:[#allocation14 + $0x190] sm:$0xf]  ;;  %v8645_v39 = vor.u32 %v10094_v21, %v8642_v22 }
 0x277   :  { %5733 = vmatpush.bf16.msra.mxu1 %v9313_v60  ;;  %v10052_v60 = vld [vmem:[#allocation14 + $0x5b4] sm:$0xf]  ;;  %v9258_v21 = vld [vmem:[#allocation14 + $0xbec] sm:$0xf0] }
 0x278   :  { %5745 = vmatpush.bf16.msra.mxu2 %v7777_v49  ;;  %5767 = vmatpush.bf16.msrb.mxu0 %v8337_v54  ;;  %v8757_v49 = vor.u32 %v10122_v33, %v8754_v14  ;;  %v8225_v54 = vor.u32 %v9989_v45, %v8222_v46  ;;  %v8502_v33 = vld [vmem:[#allocation14 + $0x604] sm:$0xf0]  ;;  %v10157_v46 = vld [vmem:[#allocation14 + $0x8fc] sm:$0xf] }
 0x279   :  { %5708 = vmatmul.bf16.vlgmr.msrb.gmra.mxu3 %v10824_v26 }
 0x27a   :  { %5804 = vmatpush.bf16.msrb.mxu3 %v9065_v37  ;;  %v9923_v37 = vld [vmem:[#allocation14 + $0x1a8] sm:$0xf0] }
 0x27b   :  { %5778 = vmatpush.bf16.msrb.mxu1 %v8617_v43  ;;  %v7949_v45 = vor.u32 %v9923_v37, %v7948_v24  ;;  %v10241_v24 = vld [vmem:[#allocation14 + $0xb9c] sm:$0xf]  ;;  %v9230_v37 = vld [vmem:[#allocation14 + $0xbb4] sm:$0xf0] }
 0x27c   :  { %5746 = vmatpush.bf16.msra.mxu2 %v7749_v63  ;;  %5768 = vmatpush.bf16.msrb.mxu0 %v8309_v3  ;;  %v10827_v58 = vpop.f32.mrf.mxu3  ;;  %v8729_v63 = vor.u32 %v10115_v50, %v8726_v51  ;;  %v8197_v3 = vor.u32 %v9982_v59, %v8194_v35  ;;  %v7920_v50 = vld [vmem:[#allocation14 + $0x158] sm:$0xf]  ;;  %v9916_v51 = vld [vmem:[#allocation14 + $0x170] sm:$0xf0]  ;;  %v10045_v59 = vld [vmem:[#allocation14 + $0x57c] sm:$0xf] }
 0x27d   :  { %v7921_v57 = vor.u32 %v9916_v51, %v7920_v50  ;;  %v8446_v35 = vld [vmem:[#allocation14 + $0x594] sm:$0xf0] }
 0x27e   :  { %5805 = vmatpush.bf16.msrb.mxu3 %v9037_v29  ;;  %v8477_v29 = vor.u32 %v10052_v60, %v8474_v47  ;;  %v9958_v60 = vld [vmem:[#allocation14 + $0x2c0] sm:$0xf0] }
 0x27f   :  { %5747 = vmatmul.bf16.vlgmr.msra.gmra.mxu2 %v10799_v6  ;;  %5779 = vmatpush.bf16.msrb.mxu1 %v8589_v62  ;;  %v10234_v47 = vld [vmem:[#allocation14 + $0xb64] sm:$0xf] }
 0x280   :  { %5791 = vmatpush.bf16.msrb.mxu2 %v8841_v0  ;;  %5769 = vmatpush.bf16.msrb.mxu0 %v8281_v17  ;;  %v9009_v0 = vor.u32 %v10185_v53, %v9006_v61  ;;  %v1073_v17 = vperm.slane %v10819_v30, 6  ;;  %v10150_v61 = vld [vmem:[#allocation14 + $0x8c4] sm:$0xf] }
 0x282   :  { %v2684_v11 = vpop.f32.mrf.mxu2  ;;  %5806 = vmatpush.bf16.msrb.mxu3 %v9009_v0  ;;  %v8172_v0 = vld [vmem:[#allocation14 + $0x350] sm:$0xf] }
 0x283   :  { %5780 = vmatpush.bf16.msrb.mxu1 %v8561_v9  ;;  %v2685_v36 = vadd.f32 %v2684_v11, %v1073_v17  ;;  %v10038_v11 = vld [vmem:[#allocation14 + $0x544] sm:$0xf]  ;;  %v9289_v17 = vor.u32 %v10255_v7, %v9286_v8  ;;  %v8844_v7 = vld [vmem:[#allocation14 + $0x890] sm:$0xf]  ;;  %v10147_v8 = vld [vmem:[#allocation14 + $0x8a8] sm:$0xf0] }
 0x284   :  { %5792 = vmatpush.bf16.msrb.mxu2 %v8813_v16  ;;  %5770 = vmatpush.bf16.msrb.mxu0 %v8253_v40  ;;  %v10066_v16 = vld [vmem:[#allocation14 + $0x624] sm:$0xf]  ;;  %v2699_v52 = vpop.f32.mrf.mxu3  ;;  %v8925_v40 = vor.u32 %v10164_v27, %v8922_v31  ;;  %v9895_v27 = vld [vmem:[#allocation14 + $0xc8] sm:$0xf0] }
 0x285   :  { %v8533_v20 = vor.u32 %v10066_v16, %v8530_v44  ;;  %v2698_v48 = vadd.f32 %v10827_v58, %v2685_v36  ;;  %v9909_v58 = vld [vmem:[#allocation14 + $0x138] sm:$0xf0]  ;;  %v9902_v16 = vld [vmem:[#allocation14 + $0x100] sm:$0xf0]  ;;  %v8144_v52 = vld [vmem:[#allocation14 + $0x318] sm:$0xf] }
 0x286   :  { %v2723_v23 = vpop.f32.mrf.mxu1  ;;  %5807 = vmatpush.bf16.msrb.mxu3 %v8981_v5  ;;  %v7893_v9 = vor.u32 %v9909_v58, %v7892_v1  ;;  %v8173_v5 = vor.u32 %v9979_v2, %v8172_v0  ;;  %v7865_v22 = vor.u32 %v9902_v16, %v7864_v15  ;;  %v9965_v36 = vld [vmem:[#allocation14 + $0x2f8] sm:$0xf0]  ;;  %v7752_v1 = vld [vmem:[#allocation14 + $0x8] sm:$0xf]  ;;  %v9874_v58 = vld [vmem:[#allocation14 + $0x20] sm:$0xf0] }
 0x287   :  { %5781 = vmatpush.bf16.msrb.mxu1 %v8533_v20  ;;  %v8032_v0 = vld [vmem:[#allocation14 + $0x238] sm:$0xf]  ;;  %v8004_v15 = vld [vmem:[#allocation14 + $0x200] sm:$0xf] }
 0x288   :  { %5793 = vmatpush.bf16.msrb.mxu2 %v8785_v28  ;;  %5771 = vmatpush.bf16.msrb.mxu0 %v8225_v54  ;;  %v10059_v28 = vld [vmem:[#allocation14 + $0x5ec] sm:$0xf] }
 0x289   :  { %v8505_v14 = vor.u32 %v10059_v28, %v8502_v33  ;;  %5760 = vmatmul.bf16.vlgmr.msra.gmra.mxu3 %v10795_v34  ;;  %v8116_v33 = vld [vmem:[#allocation14 + $0x2e0] sm:$0xf] }
 0x28a   :  { %v2686_v38 = vpop.f32.mrf.mxu2  ;;  %5808 = vmatpush.bf16.msrb.mxu3 %v8953_v25  ;;  %v7836_v25 = vld [vmem:[#allocation14 + $0xb0] sm:$0xf] }
 0x28b   :  { %5782 = vmatpush.bf16.msrb.mxu1 %v8505_v14  ;;  %v7837_v14 = vor.u32 %v9895_v27, %v7836_v25  ;;  %v8117_v38 = vor.u32 %v9965_v36, %v8116_v33  ;;  %v10206_v27 = vld [vmem:[#allocation14 + $0xa84] sm:$0xf] }
 0x28c   :  { %5794 = vmatpush.bf16.msrb.mxu2 %v8757_v49  ;;  %5772 = vmatpush.bf16.msrb.mxu0 %v8197_v3  ;;  %v8894_v49 = vld [vmem:[#allocation14 + $0x914] sm:$0xf0]  ;;  %v2710_v43 = vpop.f32.mrf.mxu0  ;;  %v8449_v3 = vor.u32 %v10045_v59, %v8446_v35  ;;  %v10227_v59 = vld [vmem:[#allocation14 + $0xb2c] sm:$0xf]  ;;  %v9174_v35 = vld [vmem:[#allocation14 + $0xb44] sm:$0xf0] }
 0x28d   :  { %v2711_v53 = vadd.f32 %v2710_v43, %v2698_v48  ;;  %v8897_v56 = vor.u32 %v10157_v46, %v8894_v49  ;;  %v8088_v46 = vld [vmem:[#allocation14 + $0x2a8] sm:$0xf]  ;;  %v9202_v48 = vld [vmem:[#allocation14 + $0xb7c] sm:$0xf0] }
 0x28e   :  { %v2725_v54 = vpop.f32.mrf.mxu1  ;;  %5809 = vmatpush.bf16.msrb.mxu3 %v8925_v40  ;;  %v9888_v40 = vld [vmem:[#allocation14 + $0x90] sm:$0xf0]  ;;  %v8089_v51 = vor.u32 %v9958_v60, %v8088_v46  ;;  %v7780_v43 = vld [vmem:[#allocation14 + $0x40] sm:$0xf]  ;;  %v10035_v46 = vld [vmem:[#allocation14 + $0x528] sm:$0xf0] }
 0x28f   :  { %v2724_v62 = vadd.f32 %v2723_v23, %v2711_v53  ;;  %5783 = vmatpush.bf16.msrb.mxu1 %v8477_v29  ;;  %v8145_v23 = vor.u32 %v9972_v10, %v8144_v52  ;;  %v9881_v29 = vld [vmem:[#allocation14 + $0x58] sm:$0xf0]  ;;  %v9205_v53 = vor.u32 %v10234_v47, %v9202_v48  ;;  %v8060_v54 = vld [vmem:[#allocation14 + $0x270] sm:$0xf]  ;;  %v10140_v52 = vld [vmem:[#allocation14 + $0x870] sm:$0xf0] }
 0x290   :  { %5795 = vmatpush.bf16.msrb.mxu2 %v8729_v63  ;;  %v8866_v63 = vld [vmem:[#allocation14 + $0x8dc] sm:$0xf0] }
 0x291   :  { %v2785_v4 = vmul.f32 0.2, %v2724_v62  ;;  %v8869_v42 = vor.u32 %v10150_v61, %v8866_v63 }
 0x292   :  { %5810 = vmatpush.bf16.msrb.mxu3 %v8897_v56  ;;  %v9951_v56 = vld [vmem:[#allocation14 + $0x288] sm:$0xf0] }
 0x293   :  { %v2793_v13 = vmax.f32 %v2724_v62, %v2785_v4  ;;  %5784 = vmatpush.bf16.msrb.mxu1 %v8449_v3  ;;  %v7781_v62 = vor.u32 %v9881_v29, %v7780_v43  ;;  %v8061_v63 = vor.u32 %v9951_v56, %v8060_v54  ;;  %v9177_v3 = vor.u32 %v10227_v59, %v9174_v35  ;;  %v9944_v4 = vld [vmem:[#allocation14 + $0x250] sm:$0xf0]  ;;  %v8760_v29 = vld [vmem:[#allocation14 + $0x7e8] sm:$0xf] }
 0x294   :  { %5796 = vmatpush.bf16.msrb.mxu2 %v8701_v12  ;;  %v8418_v12 = vld [vmem:[#allocation14 + $0x55c] sm:$0xf0]  ;;  %v2712_v44 = vpop.f32.mrf.mxu0 }
 0x295   :  { %v8421_v19 = vor.u32 %v10038_v11, %v8418_v12  ;;  %v10833_v20 = vpack.c.bf16 %v2793_v13, %v2793_v13  ;;  %v9146_v11 = vld [vmem:[#allocation14 + $0xb0c] sm:$0xf0]  ;;  %v8033_v13 = vor.u32 %v9944_v4, %v8032_v0  ;;  %v9937_v44 = vld [vmem:[#allocation14 + $0x218] sm:$0xf0]  ;;  %v10304_v0 = vld [vmem:[#allocation14 + $0xd94] sm:$0xf] }
 0x296   :  { %5811 = vmatpush.bf16.msrb.mxu3 %v8869_v42  ;;  %v8732_v4 = vld [vmem:[#allocation14 + $0x7b0] sm:$0xf] }
 0x297   :  { %5721 = vmatmul.bf16.vlgmr.msra.gmra.mxu0 %v10833_v20  ;;  %5785 = vmatpush.bf16.msrb.mxu1 %v8421_v19  ;;  %v10213_v19 = vld [vmem:[#allocation14 + $0xabc] sm:$0xf] }
 0x298   :  { %5797 = vmatpush.bf16.msrb.mxu2 %v8673_v32  ;;  %v10248_v32 = vld [vmem:[#allocation14 + $0xbd4] sm:$0xf]  ;;  %5817 = vmatpush.bf16.msra.mxu0 %v9289_v17  ;;  %v8816_v17 = vld [vmem:[#allocation14 + $0x858] sm:$0xf] }
 0x299   :  { %v9261_v28 = vor.u32 %v10248_v32, %v9258_v21  ;;  %5812 = vmatmul.bf16.vlgmr.msrb.gmra.mxu3 %v10824_v26  ;;  %v9118_v32 = vld [vmem:[#allocation14 + $0xad4] sm:$0xf0]  ;;  %v8817_v25 = vor.u32 %v10140_v52, %v8816_v17 }
 0x29a   :  { %5856 = vmatpush.bf16.msra.mxu3 %v8173_v5  ;;  %v8845_v5 = vor.u32 %v10147_v8, %v8844_v7  ;;  %v9121_v36 = vor.u32 %v10213_v19, %v9118_v32  ;;  %v10119_v7 = vld [vmem:[#allocation14 + $0x7c8] sm:$0xf0]  ;;  %v8704_v52 = vld [vmem:[#allocation14 + $0x778] sm:$0xf] }
 0x29c   :  { %5798 = vmatpush.bf16.msrb.mxu2 %v8645_v39  ;;  %v2749_v31 = vpop.f32.mrf.mxu3  ;;  %v7808_v39 = vld [vmem:[#allocation14 + $0x78] sm:$0xf]  ;;  %5818 = vmatpush.bf16.msra.mxu0 %v9261_v28  ;;  %v7976_v28 = vld [vmem:[#allocation14 + $0x1c8] sm:$0xf] }
 0x29d   :  { %v7809_v49 = vor.u32 %v9888_v40, %v7808_v39  ;;  %v9068_v39 = vld [vmem:[#allocation14 + $0xa50] sm:$0xf]  ;;  %v10203_v40 = vld [vmem:[#allocation14 + $0xa68] sm:$0xf0] }
 0x29e   :  { %5857 = vmatpush.bf16.msra.mxu3 %v8145_v23  ;;  %v8005_v23 = vor.u32 %v9937_v44, %v8004_v15  ;;  %v9069_v43 = vor.u32 %v10203_v40, %v9068_v39  ;;  %v8733_v15 = vor.u32 %v10119_v7, %v8732_v4  ;;  %v9454_v44 = vld [vmem:[#allocation14 + $0xd74] sm:$0xf0]  ;;  %v8956_v40 = vld [vmem:[#allocation14 + $0x970] sm:$0xf] }
 0x29f   :  { %5799 = vmatmul.bf16.vlgmr.msrb.gmra.mxu2 %v10814_v55  ;;  %v9370_v4 = vld [vmem:[#allocation14 + $0xccc] sm:$0xf0] }
 0x2a0   :  { %5843 = vmatpush.bf16.msra.mxu2 %v7949_v45  ;;  %v9233_v45 = vor.u32 %v10241_v24, %v9230_v37  ;;  %v9930_v24 = vld [vmem:[#allocation14 + $0x1e0] sm:$0xf0]  ;;  %v8788_v37 = vld [vmem:[#allocation14 + $0x820] sm:$0xf] }
 0x2a1   :  { %v7977_v47 = vor.u32 %v9930_v24, %v7976_v28 }
 0x2a2   :  { %v2736_v50 = vpop.f32.mrf.mxu2  ;;  %5858 = vmatpush.bf16.msra.mxu3 %v8117_v38  ;;  %5819 = vmatpush.bf16.msra.mxu0 %v9233_v45  ;;  %v8396_v45 = vld [vmem:[#allocation14 + $0x510] sm:$0xf] }
 0x2a3   :  { %v8397_v56 = vor.u32 %v10035_v46, %v8396_v45  ;;  %v10175_v45 = vld [vmem:[#allocation14 + $0x988] sm:$0xf0] }
 0x2a4   :  { %5844 = vmatpush.bf16.msra.mxu2 %v7921_v57  ;;  %v1074_v57 = vperm.slane %v10819_v30, 7  ;;  %v2751_v61 = vpop.f32.mrf.mxu3  ;;  %v7753_v30 = vor.u32 %v9874_v58, %v7752_v1 }
 0x2a5   :  { %v10196_v61 = vld [vmem:[#allocation14 + $0xa30] sm:$0xf0] }
 0x2a6   :  { %5859 = vmatpush.bf16.msra.mxu3 %v8089_v51  ;;  %v2775_v2 = vpop.f32.mrf.mxu1  ;;  %5820 = vmatpush.bf16.msra.mxu0 %v9205_v53  ;;  %v2737_v42 = vadd.f32 %v2736_v50, %v1074_v57  ;;  %v9510_v50 = vld [vmem:[#allocation14 + $0xde4] sm:$0xf0]  ;;  %v10126_v53 = vld [vmem:[#allocation14 + $0x800] sm:$0xf0]  ;;  %v9040_v57 = vld [vmem:[#allocation14 + $0xa18] sm:$0xf] }
 0x2a7   :  { %5773 = vmatmul.bf16.vlgmr.msrb.gmra.mxu0 %v10810_v18  ;;  %v8761_v58 = vor.u32 %v10126_v53, %v8760_v29  ;;  %v8957_v29 = vor.u32 %v10175_v45, %v8956_v40  ;;  %v8648_v53 = vld [vmem:[#allocation14 + $0x708] sm:$0xf]  ;;  %v9292_v40 = vld [vmem:[#allocation14 + $0xc10] sm:$0xf]  ;;  %v10259_v45 = vld [vmem:[#allocation14 + $0xc28] sm:$0xf0] }
 0x2a8   :  { %5845 = vmatpush.bf16.msra.mxu2 %v7893_v9  ;;  %v10220_v9 = vld [vmem:[#allocation14 + $0xaf4] sm:$0xf]  ;;  %v2750_v10 = vadd.f32 %v2749_v31, %v2737_v42  ;;  %v9090_v31 = vld [vmem:[#allocation14 + $0xa9c] sm:$0xf0] }
 0x2a9   :  { %v9149_v16 = vor.u32 %v10220_v9, %v9146_v11  ;;  %v9093_v51 = vor.u32 %v10206_v27, %v9090_v31  ;;  %v9012_v42 = vld [vmem:[#allocation14 + $0x9e0] sm:$0xf]  ;;  %v10189_v9 = vld [vmem:[#allocation14 + $0x9f8] sm:$0xf0]  ;;  %v10014_v27 = vld [vmem:[#allocation14 + $0x480] sm:$0xf0] }
 0x2aa   :  { %v2738_v12 = vpop.f32.mrf.mxu2  ;;  %5860 = vmatpush.bf16.msra.mxu3 %v8061_v63  ;;  %5821 = vmatpush.bf16.msra.mxu0 %v9177_v3  ;;  %v10028_v63 = vld [vmem:[#allocation14 + $0x4f0] sm:$0xf0]  ;;  %v9041_v3 = vor.u32 %v10196_v61, %v9040_v57  ;;  %v9013_v17 = vor.u32 %v10189_v9, %v9012_v42  ;;  %v8900_v9 = vld [vmem:[#allocation14 + $0x900] sm:$0xf] }
 0x2ab   :  { %v8340_v12 = vld [vmem:[#allocation14 + $0x4a0] sm:$0xf]  ;;  %v10168_v61 = vld [vmem:[#allocation14 + $0x950] sm:$0xf0] }
 0x2ac   :  { %5846 = vmatpush.bf16.msra.mxu2 %v7865_v22  ;;  %v2762_v21 = vpop.f32.mrf.mxu0 }
 0x2ad   :  { %v2763_v22 = vadd.f32 %v2762_v21, %v2750_v10  ;;  %v10112_v10 = vld [vmem:[#allocation14 + $0x790] sm:$0xf0]  ;;  %v8984_v21 = vld [vmem:[#allocation14 + $0x9a8] sm:$0xf] }
 0x2ae   :  { %5861 = vmatpush.bf16.msra.mxu3 %v8033_v13  ;;  %v2777_v33 = vpop.f32.mrf.mxu1  ;;  %5822 = vmatpush.bf16.msra.mxu0 %v9149_v16  ;;  %v10021_v13 = vld [vmem:[#allocation14 + $0x4b8] sm:$0xf0]  ;;  %v8705_v28 = vor.u32 %v10112_v10, %v8704_v52  ;;  %v9342_v52 = vld [vmem:[#allocation14 + $0xc94] sm:$0xf0] }
 0x2af   :  { %v2776_v38 = vadd.f32 %v2775_v2, %v2763_v22  ;;  %v9482_v2 = vld [vmem:[#allocation14 + $0xdac] sm:$0xf0]  ;;  %v10297_v16 = vld [vmem:[#allocation14 + $0xd5c] sm:$0xf]  ;;  %v8341_v32 = vor.u32 %v10021_v13, %v8340_v12  ;;  %v10182_v22 = vld [vmem:[#allocation14 + $0x9c0] sm:$0xf0] }
 0x2b0   :  { %5847 = vmatpush.bf16.msra.mxu2 %v7837_v14  ;;  %v10133_v14 = vld [vmem:[#allocation14 + $0x838] sm:$0xf0]  ;;  %v9485_v11 = vor.u32 %v10304_v0, %v9482_v2  ;;  %v10290_v33 = vld [vmem:[#allocation14 + $0xd24] sm:$0xf]  ;;  %v10000_v0 = vld [vmem:[#allocation14 + $0x410] sm:$0xf0] }
 0x2b1   :  { %v2786_v60 = vmul.f32 0.2, %v2776_v38  ;;  %v8789_v48 = vor.u32 %v10133_v14, %v8788_v37  ;;  %v8985_v37 = vor.u32 %v10182_v22, %v8984_v21  ;;  %v8676_v14 = vld [vmem:[#allocation14 + $0x740] sm:$0xf]  ;;  %v9913_v12 = vld [vmem:[#allocation14 + $0x15c] sm:$0xf] }
 0x2b2   :  { %5862 = vmatpush.bf16.msra.mxu3 %v8005_v23  ;;  %5823 = vmatpush.bf16.msra.mxu0 %v9121_v36  ;;  %v9457_v23 = vor.u32 %v10297_v16, %v9454_v44  ;;  %v9426_v36 = vld [vmem:[#allocation14 + $0xd3c] sm:$0xf0]  ;;  %v7922_v13 = vld [vmem:[#allocation14 + $0x174] sm:$0xf0]  ;;  %v9993_v16 = vld [vmem:[#allocation14 + $0x3d8] sm:$0xf0] }
 0x2b3   :  { %v2794_v54 = vmax.f32 %v2776_v38, %v2786_v60  ;;  %v10105_v38 = vld [vmem:[#allocation14 + $0x758] sm:$0xf0]  ;;  %v9429_v46 = vor.u32 %v10290_v33, %v9426_v36  ;;  %v8284_v60 = vld [vmem:[#allocation14 + $0x430] sm:$0xf]  ;;  %v8200_v21 = vld [vmem:[#allocation14 + $0x388] sm:$0xf] }
 0x2b4   :  { %5848 = vmatpush.bf16.msra.mxu2 %v7809_v49  ;;  %v10311_v49 = vld [vmem:[#allocation14 + $0xdcc] sm:$0xf]  ;;  %v2764_v59 = vpop.f32.mrf.mxu0  ;;  %v8872_v22 = vld [vmem:[#allocation14 + $0x8c8] sm:$0xf]  ;;  %v7894_v33 = vld [vmem:[#allocation14 + $0x13c] sm:$0xf0] }
 0x2b5   :  { %v9513_v35 = vor.u32 %v10311_v49, %v9510_v50  ;;  %v10840_v1 = vpack.c.bf16 %v2794_v54, %v2794_v54  ;;  %v8677_v49 = vor.u32 %v10105_v38, %v8676_v14  ;;  %v10283_v50 = vld [vmem:[#allocation14 + $0xcec] sm:$0xf]  ;;  %v10098_v54 = vld [vmem:[#allocation14 + $0x720] sm:$0xf0]  ;;  %v9920_v59 = vld [vmem:[#allocation14 + $0x194] sm:$0xf] }
 0x2b6   :  { %5863 = vmatpush.bf16.msra.mxu3 %v7977_v47  ;;  %5824 = vmatpush.bf16.msra.mxu0 %v9093_v51  ;;  %v10007_v47 = vld [vmem:[#allocation14 + $0x448] sm:$0xf0]  ;;  %v9398_v51 = vld [vmem:[#allocation14 + $0xd04] sm:$0xf0]  ;;  %v8649_v2 = vor.u32 %v10098_v54, %v8648_v53  ;;  %v9976_v14 = vld [vmem:[#allocation14 + $0x354] sm:$0xf]  ;;  %v9293_v53 = vor.u32 %v10259_v45, %v9292_v40 }
 0x2b7   :  { %5734 = vmatmul.bf16.vlgmr.msra.gmra.mxu1 %v10840_v1  ;;  %v8285_v57 = vor.u32 %v10007_v47, %v8284_v60  ;;  %v8174_v38 = vld [vmem:[#allocation14 + $0x36c] sm:$0xf0]  ;;  %v9969_v54 = vld [vmem:[#allocation14 + $0x31c] sm:$0xf]  ;;  %v10063_v45 = vld [vmem:[#allocation14 + $0x608] sm:$0xf0] }
 0x2b8   :  { %5849 = vmatpush.bf16.msra.mxu2 %v7781_v62  ;;  %v8368_v62 = vld [vmem:[#allocation14 + $0x4d8] sm:$0xf]  ;;  %5830 = vmatpush.bf16.msra.mxu1 %v9513_v35  ;;  %v7950_v35 = vld [vmem:[#allocation14 + $0x1ac] sm:$0xf0] }
 0x2b9   :  { %v8369_v8 = vor.u32 %v10028_v63, %v8368_v62  ;;  %5864 = vmatmul.bf16.vlgmr.msra.gmra.mxu3 %v10795_v34  ;;  %5825 = vmatmul.bf16.vlgmr.msra.gmra.mxu0 %v10833_v20  ;;  %v9401_v63 = vor.u32 %v10283_v50, %v9398_v51  ;;  %v7953_v42 = vor.u32 %v9920_v59, %v7950_v35  ;;  %v8620_v47 = vld [vmem:[#allocation14 + $0x6d0] sm:$0xf]  ;;  %v9899_v51 = vld [vmem:[#allocation14 + $0xec] sm:$0xf]  ;;  %v9264_v59 = vld [vmem:[#allocation14 + $0xbd8] sm:$0xf] }
 0x2ba   :  { %5908 = vmatpush.bf16.msrb.mxu3 %v9069_v43  ;;  %5869 = vmatpush.bf16.msrb.mxu0 %v8397_v56  ;;  %v8928_v56 = vld [vmem:[#allocation14 + $0x938] sm:$0xf]  ;;  %v8177_v50 = vor.u32 %v9976_v14, %v8174_v38  ;;  %v10252_v35 = vld [vmem:[#allocation14 + $0xbf0] sm:$0xf0]  ;;  %v9180_v14 = vld [vmem:[#allocation14 + $0xb30] sm:$0xf] }
 0x2bb   :  { %v10231_v38 = vld [vmem:[#allocation14 + $0xb48] sm:$0xf0]  ;;  %v8508_v40 = vld [vmem:[#allocation14 + $0x5f0] sm:$0xf] }
 0x2bc   :  { %5850 = vmatpush.bf16.msra.mxu2 %v7753_v30  ;;  %v3315_v30 = vld [vmem:[#allocation16] sm:$0xff]  ;;  %5831 = vmatpush.bf16.msra.mxu1 %v9485_v11 }
 0x2bd   :  { %v3317_v19 = vperm.slane %v3315_v30, 0  ;;  %v10161_v30 = vld [vmem:[#allocation14 + $0x918] sm:$0xf0] }
 0x2be   :  { %5909 = vmatpush.bf16.msrb.mxu3 %v9041_v3  ;;  %5870 = vmatpush.bf16.msrb.mxu0 %v8369_v8  ;;  %v10276_v3 = vld [vmem:[#allocation14 + $0xcb4] sm:$0xf]  ;;  %v8929_v8 = vor.u32 %v10168_v61, %v8928_v56  ;;  %v8146_v56 = vld [vmem:[#allocation14 + $0x334] sm:$0xf0] }
 0x2bf   :  { %5851 = vmatmul.bf16.vlgmr.msra.gmra.mxu2 %v10799_v6 }
 0x2c0   :  { %5895 = vmatpush.bf16.msrb.mxu2 %v8845_v5  ;;  %v5657_v5 = vpop.f32.mrf.mxu3  ;;  %5832 = vmatpush.bf16.msra.mxu1 %v9457_v23 }
 0x2c2   :  { %v5644_v24 = vpop.f32.mrf.mxu2  ;;  %5910 = vmatpush.bf16.msrb.mxu3 %v9013_v17  ;;  %5871 = vmatpush.bf16.msrb.mxu0 %v8341_v32  ;;  %v10269_v17 = vld [vmem:[#allocation14 + $0xc7c] sm:$0xf]  ;;  %v7925_v32 = vor.u32 %v9913_v12, %v7922_v13  ;;  %v8564_v12 = vld [vmem:[#allocation14 + $0x660] sm:$0xf] }
 0x2c3   :  { %v5645_v31 = vadd.f32 %v5644_v24, %v3317_v19  ;;  %v8901_v19 = vor.u32 %v10161_v30, %v8900_v9  ;;  %v9345_v24 = vor.u32 %v10269_v17, %v9342_v52  ;;  %v9236_v9 = vld [vmem:[#allocation14 + $0xba0] sm:$0xf]  ;;  %v10077_v13 = vld [vmem:[#allocation14 + $0x678] sm:$0xf0]  ;;  %v9955_v17 = vld [vmem:[#allocation14 + $0x2ac] sm:$0xf] }
 0x2c4   :  { %5896 = vmatpush.bf16.msrb.mxu2 %v8817_v25  ;;  %v8312_v25 = vld [vmem:[#allocation14 + $0x468] sm:$0xf]  ;;  %5833 = vmatpush.bf16.msra.mxu1 %v9429_v46 }
 0x2c5   :  { %v8313_v39 = vor.u32 %v10014_v27, %v8312_v25  ;;  %v5658_v43 = vadd.f32 %v5657_v5, %v5645_v31  ;;  %v9373_v5 = vor.u32 %v10276_v3, %v9370_v4  ;;  %v10262_v25 = vld [vmem:[#allocation14 + $0xc44] sm:$0xf]  ;;  %v7838_v3 = vld [vmem:[#allocation14 + $0xcc] sm:$0xf0]  ;;  %v9265_v4 = vor.u32 %v10252_v35, %v9264_v59  ;;  %v8090_v52 = vld [vmem:[#allocation14 + $0x2c4] sm:$0xf0] }
 0x2c6   :  { %5911 = vmatpush.bf16.msrb.mxu3 %v8985_v37  ;;  %v5683_v62 = vpop.f32.mrf.mxu1  ;;  %v10154_v27 = vld [vmem:[#allocation14 + $0x8e0] sm:$0xf0]  ;;  %v8480_v59 = vld [vmem:[#allocation14 + $0x5b8] sm:$0xf]  ;;  %v10056_v35 = vld [vmem:[#allocation14 + $0x5d0] sm:$0xf0] }
 0x2c7   :  { %5872 = vmatpush.bf16.msrb.mxu0 %v8313_v39  ;;  %5786 = vmatmul.bf16.vlgmr.msrb.gmra.mxu1 %v10806_v41  ;;  %v9986_v37 = vld [vmem:[#allocation14 + $0x3a0] sm:$0xf0]  ;;  %v9314_v39 = vld [vmem:[#allocation14 + $0xc5c] sm:$0xf0]  ;;  %v8873_v46 = vor.u32 %v10154_v27, %v8872_v22  ;;  %v8536_v22 = vld [vmem:[#allocation14 + $0x628] sm:$0xf] }
 0x2c8   :  { %5897 = vmatpush.bf16.msrb.mxu2 %v8789_v48  ;;  %v5659_v48 = vpop.f32.mrf.mxu3  ;;  %5834 = vmatpush.bf16.msra.mxu1 %v9401_v63  ;;  %v8592_v63 = vld [vmem:[#allocation14 + $0x698] sm:$0xf]  ;;  %v9878_v27 = vld [vmem:[#allocation14 + $0x44] sm:$0xf] }
 0x2c9   :  { %v10091_v48 = vld [vmem:[#allocation14 + $0x6e8] sm:$0xf0] }
 0x2ca   :  { %v5646_v7 = vpop.f32.mrf.mxu2  ;;  %5912 = vmatpush.bf16.msrb.mxu3 %v8957_v29  ;;  %v9317_v29 = vor.u32 %v10262_v25, %v9314_v39  ;;  %v8621_v61 = vor.u32 %v10091_v48, %v8620_v47  ;;  %v8093_v25 = vor.u32 %v9955_v17, %v8090_v52  ;;  %v7754_v47 = vld [vmem:[#allocation14 + $0x24] sm:$0xf0]  ;;  %v9941_v48 = vld [vmem:[#allocation14 + $0x23c] sm:$0xf]  ;;  %v10130_v17 = vld [vmem:[#allocation14 + $0x824] sm:$0xf] }
 0x2cb   :  { %5873 = vmatpush.bf16.msrb.mxu0 %v8285_v57  ;;  %v9962_v7 = vld [vmem:[#allocation14 + $0x2e4] sm:$0xf]  ;;  %v8790_v52 = vld [vmem:[#allocation14 + $0x83c] sm:$0xf0] }
 0x2cc   :  { %5898 = vmatpush.bf16.msrb.mxu2 %v8761_v58  ;;  %v8256_v58 = vld [vmem:[#allocation14 + $0x3f8] sm:$0xf]  ;;  %v5670_v44 = vpop.f32.mrf.mxu0  ;;  %5835 = vmatpush.bf16.msra.mxu1 %v9373_v5 }
 0x2cd   :  { %v8257_v11 = vor.u32 %v10000_v0, %v8256_v58  ;;  %v5671_v10 = vadd.f32 %v5670_v44, %v5658_v43  ;;  %v7866_v43 = vld [vmem:[#allocation14 + $0x104] sm:$0xf0]  ;;  %v10084_v58 = vld [vmem:[#allocation14 + $0x6b0] sm:$0xf0]  ;;  %v8149_v0 = vor.u32 %v9969_v54, %v8146_v56  ;;  %v8509_v54 = vor.u32 %v10063_v45, %v8508_v40  ;;  %v9152_v56 = vld [vmem:[#allocation14 + $0xaf8] sm:$0xf] }
 0x2ce   :  { %5913 = vmatpush.bf16.msrb.mxu3 %v8929_v8  ;;  %v5685_v36 = vpop.f32.mrf.mxu1  ;;  %v8118_v8 = vld [vmem:[#allocation14 + $0x2fc] sm:$0xf0]  ;;  %v10193_v45 = vld [vmem:[#allocation14 + $0xa1c] sm:$0xf] }
 0x2cf   :  { %5874 = vmatpush.bf16.msrb.mxu0 %v8257_v11  ;;  %v10847_v31 = vadd.f32 %v5683_v62, %v5671_v10  ;;  %v7869_v62 = vor.u32 %v9899_v51, %v7866_v43  ;;  %v10245_v11 = vld [vmem:[#allocation14 + $0xbb8] sm:$0xf0]  ;;  %v8121_v5 = vor.u32 %v9962_v7, %v8118_v8  ;;  %v8565_v10 = vor.u32 %v10077_v13, %v8564_v12  ;;  %v9948_v36 = vld [vmem:[#allocation14 + $0x274] sm:$0xf]  ;;  %v8034_v51 = vld [vmem:[#allocation14 + $0x254] sm:$0xf0] }
 0x2d0   :  { %5899 = vmatpush.bf16.msrb.mxu2 %v8733_v15  ;;  %v8228_v15 = vld [vmem:[#allocation14 + $0x3c0] sm:$0xf]  ;;  %5836 = vmatpush.bf16.msra.mxu1 %v9345_v24  ;;  %v9237_v44 = vor.u32 %v10245_v11, %v9236_v9  ;;  %v8062_v24 = vld [vmem:[#allocation14 + $0x28c] sm:$0xf0]  ;;  %v10144_v43 = vld [vmem:[#allocation14 + $0x894] sm:$0xf]  ;;  %v8481_v7 = vor.u32 %v10056_v35, %v8480_v59 }
 0x2d1   :  { %v8229_v23 = vor.u32 %v9993_v16, %v8228_v15  ;;  %v9885_v15 = vld [vmem:[#allocation14 + $0x7c] sm:$0xf]  ;;  %v7810_v16 = vld [vmem:[#allocation14 + $0x94] sm:$0xf0]  ;;  %v9096_v12 = vld [vmem:[#allocation14 + $0xa88] sm:$0xf] }
 0x2d2   :  { %5914 = vmatpush.bf16.msrb.mxu3 %v8901_v19  ;;  %v9208_v19 = vld [vmem:[#allocation14 + $0xb68] sm:$0xf]  ;;  %v10217_v8 = vld [vmem:[#allocation14 + $0xad8] sm:$0xf0]  ;;  %v9927_v13 = vld [vmem:[#allocation14 + $0x1cc] sm:$0xf] }
 0x2d3   :  { %5875 = vmatpush.bf16.msrb.mxu0 %v8229_v23  ;;  %v10070_v23 = vld [vmem:[#allocation14 + $0x640] sm:$0xf0]  ;;  %v10049_v9 = vld [vmem:[#allocation14 + $0x598] sm:$0xf0] }
 0x2d4   :  { %5900 = vmatpush.bf16.msrb.mxu2 %v8705_v28  ;;  %v9906_v28 = vld [vmem:[#allocation14 + $0x124] sm:$0xf]  ;;  %v5672_v57 = vpop.f32.mrf.mxu0  ;;  %5837 = vmatpush.bf16.msra.mxu1 %v9317_v29  ;;  %v8846_v29 = vld [vmem:[#allocation14 + $0x8ac] sm:$0xf0] }
 0x2d5   :  { %v7897_v60 = vor.u32 %v9906_v28, %v7894_v33  ;;  %v7782_v28 = vld [vmem:[#allocation14 + $0x5c] sm:$0xf0]  ;;  %v10224_v57 = vld [vmem:[#allocation14 + $0xb10] sm:$0xf0]  ;;  %v10018_v35 = vld [vmem:[#allocation14 + $0x4a4] sm:$0xf] }
 0x2d6   :  { %5915 = vmatpush.bf16.msrb.mxu3 %v8873_v46  ;;  %v7785_v39 = vor.u32 %v9878_v27, %v7782_v28  ;;  %v8065_v46 = vor.u32 %v9948_v36, %v8062_v24  ;;  %v8793_v28 = vor.u32 %v10130_v17, %v8790_v52  ;;  %v10315_v36 = vld [vmem:[#allocation14 + $0xde8] sm:$0xf0]  ;;  %v10172_v52 = vld [vmem:[#allocation14 + $0x974] sm:$0xf] }
 0x2d7   :  { %5838 = vmatmul.bf16.vlgmr.msra.gmra.mxu1 %v10840_v1 }
 0x2d8   :  { %5901 = vmatpush.bf16.msrb.mxu2 %v8677_v49  ;;  %v8201_v49 = vor.u32 %v9986_v37, %v8200_v21  ;;  %5882 = vmatpush.bf16.msrb.mxu1 %v8621_v61  ;;  %v7813_v21 = vor.u32 %v9885_v15, %v7810_v16  ;;  %v8537_v37 = vor.u32 %v10070_v23, %v8536_v22  ;;  %v8424_v16 = vld [vmem:[#allocation14 + $0x548] sm:$0xf]  ;;  %v10042_v22 = vld [vmem:[#allocation14 + $0x560] sm:$0xf0]  ;;  %v10032_v23 = vld [vmem:[#allocation14 + $0x514] sm:$0xf] }
 0x2d9   :  { %5916 = vmatmul.bf16.vlgmr.msrb.gmra.mxu3 %v10824_v26 }
 0x2da   :  { %5876 = vmatpush.bf16.msrb.mxu0 %v8201_v49  ;;  %5960 = vmatpush.bf16.msra.mxu3 %v8177_v50  ;;  %v9181_v50 = vor.u32 %v10231_v38, %v9180_v14  ;;  %v10123_v14 = vld [vmem:[#allocation14 + $0x7ec] sm:$0xf]  ;;  %v8762_v38 = vld [vmem:[#allocation14 + $0x804] sm:$0xf0] }
 0x2dc   :  { %5902 = vmatpush.bf16.msrb.mxu2 %v8649_v2  ;;  %v9892_v2 = vld [vmem:[#allocation14 + $0xb4] sm:$0xf] }
 0x2dd   :  { %5877 = vmatmul.bf16.vlgmr.msrb.gmra.mxu0 %v10810_v18  ;;  %v7841_v30 = vor.u32 %v9892_v2, %v7838_v3  ;;  %v8006_v2 = vld [vmem:[#allocation14 + $0x21c] sm:$0xf0]  ;;  %v10137_v3 = vld [vmem:[#allocation14 + $0x85c] sm:$0xf] }
 0x2de   :  { %5921 = vmatpush.bf16.msra.mxu0 %v9293_v53  ;;  %5961 = vmatpush.bf16.msra.mxu3 %v8149_v0  ;;  %v9153_v0 = vor.u32 %v10224_v57, %v9152_v56  ;;  %v10186_v57 = vld [vmem:[#allocation14 + $0x9e4] sm:$0xf] }
 0x2df   :  { %5903 = vmatmul.bf16.vlgmr.msrb.gmra.mxu2 %v10814_v55 }
 0x2e0   :  { %5947 = vmatpush.bf16.msra.mxu2 %v7953_v42  ;;  %v8593_v42 = vor.u32 %v10084_v58, %v8592_v63  ;;  %v8849_v63 = vor.u32 %v10144_v43, %v8846_v29  ;;  %v9934_v58 = vld [vmem:[#allocation14 + $0x204] sm:$0xf]  ;;  %v10116_v29 = vld [vmem:[#allocation14 + $0x7b4] sm:$0xf] }
 0x2e1   :  { %v8009_v11 = vor.u32 %v9934_v58, %v8006_v2  ;;  %v9460_v58 = vld [vmem:[#allocation14 + $0xd60] sm:$0xf] }
 0x2e2   :  { %5922 = vmatpush.bf16.msra.mxu0 %v9265_v4  ;;  %5883 = vmatpush.bf16.msrb.mxu1 %v8593_v42  ;;  %v5696_v49 = vpop.f32.mrf.mxu2  ;;  %v8818_v4 = vld [vmem:[#allocation14 + $0x874] sm:$0xf0]  ;;  %v8452_v42 = vld [vmem:[#allocation14 + $0x580] sm:$0xf] }
 0x2e3   :  { %5962 = vmatpush.bf16.msra.mxu3 %v8121_v5  ;;  %v10853_v53 = vadd.f32 %v5696_v49, %v10847_v31  ;;  %v9124_v31 = vld [vmem:[#allocation14 + $0xac0] sm:$0xf]  ;;  %v8765_v49 = vor.u32 %v10123_v14, %v8762_v38  ;;  %v7956_v14 = vld [vmem:[#allocation14 + $0x198] sm:$0xf]  ;;  %v9924_v38 = vld [vmem:[#allocation14 + $0x1b0] sm:$0xf0] }
 0x2e4   :  { %5948 = vmatpush.bf16.msra.mxu2 %v7925_v32  ;;  %v10238_v32 = vld [vmem:[#allocation14 + $0xb80] sm:$0xf0]  ;;  %v9125_v15 = vor.u32 %v10217_v8, %v9124_v31  ;;  %v10179_v31 = vld [vmem:[#allocation14 + $0x9ac] sm:$0xf]  ;;  %v8986_v8 = vld [vmem:[#allocation14 + $0x9c4] sm:$0xf0] }
 0x2e5   :  { %v9209_v33 = vor.u32 %v10238_v32, %v9208_v19  ;;  %v10210_v19 = vld [vmem:[#allocation14 + $0xaa0] sm:$0xf0]  ;;  %v10200_v32 = vld [vmem:[#allocation14 + $0xa54] sm:$0xf] }
 0x2e6   :  { %5923 = vmatpush.bf16.msra.mxu0 %v9237_v44  ;;  %5884 = vmatpush.bf16.msrb.mxu1 %v8565_v10  ;;  %v7978_v44 = vld [vmem:[#allocation14 + $0x1e4] sm:$0xf0]  ;;  %v8453_v10 = vor.u32 %v10049_v9, %v8452_v42  ;;  %v9097_v24 = vor.u32 %v10210_v19, %v9096_v12  ;;  %v10011_v9 = vld [vmem:[#allocation14 + $0x46c] sm:$0xf] }
 0x2e7   :  { %5963 = vmatpush.bf16.msra.mxu3 %v8093_v25  ;;  %v8398_v25 = vld [vmem:[#allocation14 + $0x52c] sm:$0xf0]  ;;  %v7981_v27 = vor.u32 %v9927_v13, %v7978_v44  ;;  %v9432_v12 = vld [vmem:[#allocation14 + $0xd28] sm:$0xf]  ;;  %v10294_v13 = vld [vmem:[#allocation14 + $0xd40] sm:$0xf0] }
 0x2e8   :  { %5949 = vmatpush.bf16.msra.mxu2 %v7897_v60  ;;  %v9871_v60 = vld [vmem:[#allocation14 + $0xc] sm:$0xf]  ;;  %v8401_v40 = vor.u32 %v10032_v23, %v8398_v25  ;;  %v8678_v44 = vld [vmem:[#allocation14 + $0x75c] sm:$0xf0]  ;;  %v9433_v19 = vor.u32 %v10294_v13, %v9432_v12  ;;  %v9404_v23 = vld [vmem:[#allocation14 + $0xcf0] sm:$0xf] }
 0x2e9   :  { %v7757_v61 = vor.u32 %v9871_v60, %v7754_v47  ;;  %v10025_v47 = vld [vmem:[#allocation14 + $0x4dc] sm:$0xf]  ;;  %v10287_v25 = vld [vmem:[#allocation14 + $0xd08] sm:$0xf0]  ;;  %v8180_v12 = vld [vmem:[#allocation14 + $0x358] sm:$0xf] }
 0x2ea   :  { %5924 = vmatpush.bf16.msra.mxu0 %v9209_v33  ;;  %5885 = vmatpush.bf16.msrb.mxu1 %v8537_v37  ;;  %v5698_v5 = vpop.f32.mrf.mxu2  ;;  %v9516_v33 = vld [vmem:[#allocation14 + $0xdd0] sm:$0xf]  ;;  %v9980_v13 = vld [vmem:[#allocation14 + $0x370] sm:$0xf0] }
 0x2eb   :  { %5964 = vmatpush.bf16.msra.mxu3 %v8065_v46  ;;  %v9042_v46 = vld [vmem:[#allocation14 + $0xa34] sm:$0xf0]  ;;  %v9517_v60 = vor.u32 %v10315_v36, %v9516_v33  ;;  %v8650_v33 = vld [vmem:[#allocation14 + $0x724] sm:$0xf0]  ;;  %v10165_v36 = vld [vmem:[#allocation14 + $0x93c] sm:$0xf] }
 0x2ec   :  { %5950 = vmatpush.bf16.msra.mxu2 %v7869_v62  ;;  %v8037_v62 = vor.u32 %v9941_v48, %v8034_v51  ;;  %v8370_v48 = vld [vmem:[#allocation14 + $0x4f4] sm:$0xf0]  ;;  %v10308_v51 = vld [vmem:[#allocation14 + $0xdb0] sm:$0xf0]  ;;  %v9045_v43 = vor.u32 %v10193_v45, %v9042_v46  ;;  %v9997_v45 = vld [vmem:[#allocation14 + $0x3fc] sm:$0xf] }
 0x2ed   :  { %v8373_v56 = vor.u32 %v10025_v47, %v8370_v48  ;;  %v8258_v46 = vld [vmem:[#allocation14 + $0x414] sm:$0xf0]  ;;  %v10280_v48 = vld [vmem:[#allocation14 + $0xcd0] sm:$0xf0] }
 0x2ee   :  { %5925 = vmatpush.bf16.msra.mxu0 %v9181_v50  ;;  %5886 = vmatpush.bf16.msrb.mxu1 %v8509_v54  ;;  %v9488_v50 = vld [vmem:[#allocation14 + $0xd98] sm:$0xf]  ;;  %v8734_v54 = vld [vmem:[#allocation14 + $0x7cc] sm:$0xf0] }
 0x2ef   :  { %5965 = vmatpush.bf16.msra.mxu3 %v8037_v62  ;;  %v9489_v59 = vor.u32 %v10308_v51, %v9488_v50  ;;  %v8342_v62 = vld [vmem:[#allocation14 + $0x4bc] sm:$0xf0]  ;;  %v9376_v47 = vld [vmem:[#allocation14 + $0xcb8] sm:$0xf]  ;;  %v7957_v51 = vor.u32 %v9924_v38, %v7956_v14  ;;  %v10081_v38 = vld [vmem:[#allocation14 + $0x69c] sm:$0xf] }
 0x2f0   :  { %5951 = vmatpush.bf16.msra.mxu2 %v7841_v30  ;;  %v8821_v30 = vor.u32 %v10137_v3, %v8818_v4  ;;  %v10109_v3 = vld [vmem:[#allocation14 + $0x77c] sm:$0xf]  ;;  %v8706_v4 = vld [vmem:[#allocation14 + $0x794] sm:$0xf0] }
 0x2f2   :  { %5926 = vmatpush.bf16.msra.mxu0 %v9153_v0  ;;  %5887 = vmatpush.bf16.msrb.mxu1 %v8481_v7  ;;  %v10301_v0 = vld [vmem:[#allocation14 + $0xd78] sm:$0xf0]  ;;  %v8345_v7 = vor.u32 %v10018_v35, %v8342_v62  ;;  %v8230_v35 = vld [vmem:[#allocation14 + $0x3dc] sm:$0xf0] }
 0x2f3   :  { %5966 = vmatpush.bf16.msra.mxu3 %v8009_v11  ;;  %v9461_v42 = vor.u32 %v10301_v0, %v9460_v58  ;;  %v8314_v11 = vld [vmem:[#allocation14 + $0x484] sm:$0xf0]  ;;  %v9348_v62 = vld [vmem:[#allocation14 + $0xc80] sm:$0xf] }
 0x2f4   :  { %5952 = vmatpush.bf16.msra.mxu2 %v7813_v21  ;;  %v9070_v21 = vld [vmem:[#allocation14 + $0xa6c] sm:$0xf0]  ;;  %v8317_v17 = vor.u32 %v10011_v9, %v8314_v11 }
 0x2f5   :  { %v9073_v37 = vor.u32 %v10200_v32, %v9070_v21  ;;  %v10004_v32 = vld [vmem:[#allocation14 + $0x434] sm:$0xf]  ;;  %v8286_v21 = vld [vmem:[#allocation14 + $0x44c] sm:$0xf0] }
 0x2f6   :  { %5927 = vmatpush.bf16.msra.mxu0 %v9125_v15  ;;  %5888 = vmatpush.bf16.msrb.mxu1 %v8453_v10  ;;  %v8989_v15 = vor.u32 %v10179_v31, %v8986_v8  ;;  %v8958_v10 = vld [vmem:[#allocation14 + $0x98c] sm:$0xf0]  ;;  %v8874_v31 = vld [vmem:[#allocation14 + $0x8e4] sm:$0xf0] }
 0x2f7   :  { %5967 = vmatpush.bf16.msra.mxu3 %v7981_v27  ;;  %v8961_v27 = vor.u32 %v10172_v52, %v8958_v10  ;;  %v7900_v8 = vld [vmem:[#allocation14 + $0x128] sm:$0xf]  ;;  %v10088_v10 = vld [vmem:[#allocation14 + $0x6d4] sm:$0xf] }
 0x2f8   :  { %5953 = vmatpush.bf16.msra.mxu2 %v7785_v39  ;;  %v8425_v39 = vor.u32 %v10042_v22, %v8424_v16  ;;  %v10102_v16 = vld [vmem:[#allocation14 + $0x744] sm:$0xf] }
 0x2f9   :  { %v8681_v22 = vor.u32 %v10102_v16, %v8678_v44  ;;  %v10256_v16 = vld [vmem:[#allocation14 + $0xc14] sm:$0xf]  ;;  %v9294_v44 = vld [vmem:[#allocation14 + $0xc2c] sm:$0xf0] }
 0x2fa   :  { %5928 = vmatpush.bf16.msra.mxu0 %v9097_v24  ;;  %5889 = vmatpush.bf16.msrb.mxu1 %v8425_v39  ;;  %v8289_v24 = vor.u32 %v10004_v32, %v8286_v21  ;;  %v8181_v21 = vor.u32 %v9980_v13, %v8180_v12 }
 0x2fb   :  { %6012 = vmatpush.bf16.msrb.mxu3 %v9073_v37  ;;  %v8930_v37 = vld [vmem:[#allocation14 + $0x954] sm:$0xf0] }
 0x2fc   :  { %5954 = vmatpush.bf16.msra.mxu2 %v7757_v61  ;;  %v9014_v61 = vld [vmem:[#allocation14 + $0x9fc] sm:$0xf0]  ;;  %5968 = vmatmul.bf16.vlgmr.msra.gmra.mxu3 %v10795_v34  ;;  %v10861_v39 = vpop.f32.mrf.mxu3  ;;  %v8933_v50 = vor.u32 %v10165_v36, %v8930_v37  ;;  %v9266_v37 = vld [vmem:[#allocation14 + $0xbf4] sm:$0xf0] }
 0x2fd   :  { %5929 = vmatmul.bf16.vlgmr.msra.gmra.mxu0 %v10833_v20  ;;  %5890 = vmatmul.bf16.vlgmr.msrb.gmra.mxu1 %v10806_v41  ;;  %v9017_v2 = vor.u32 %v10186_v57, %v9014_v61  ;;  %v9917_v57 = vld [vmem:[#allocation14 + $0x178] sm:$0xf0]  ;;  %v9377_v61 = vor.u32 %v10280_v48, %v9376_v47 }
 0x2fe   :  { %5973 = vmatpush.bf16.msrb.mxu0 %v8401_v40  ;;  %5934 = vmatpush.bf16.msra.mxu1 %v9517_v60  ;;  %v9405_v40 = vor.u32 %v10287_v25, %v9404_v23  ;;  %v9903_v23 = vld [vmem:[#allocation14 + $0x108] sm:$0xf0] }
 0x2ff   :  { %5955 = vmatmul.bf16.vlgmr.msra.gmra.mxu2 %v10799_v6  ;;  %6013 = vmatpush.bf16.msrb.mxu3 %v9045_v43  ;;  %v10158_v43 = vld [vmem:[#allocation14 + $0x904] sm:$0xf] }
 0x300   :  { %5999 = vmatpush.bf16.msrb.mxu2 %v8849_v63  ;;  %v8737_v63 = vor.u32 %v10116_v29, %v8734_v54  ;;  %v8261_v29 = vor.u32 %v9997_v45, %v8258_v46  ;;  %v8902_v54 = vld [vmem:[#allocation14 + $0x91c] sm:$0xf0]  ;;  %v7844_v46 = vld [vmem:[#allocation14 + $0xb8] sm:$0xf] }
 0x301   :  { %v8905_v58 = vor.u32 %v10158_v43, %v8902_v54  ;;  %v10242_v43 = vld [vmem:[#allocation14 + $0xba4] sm:$0xf] }
 0x302   :  { %5974 = vmatpush.bf16.msrb.mxu0 %v8373_v56  ;;  %5935 = vmatpush.bf16.msra.mxu1 %v9489_v59  ;;  %v10859_v5 = vpop.f32.mrf.mxu2  ;;  %v7928_v56 = vld [vmem:[#allocation14 + $0x160] sm:$0xf]  ;;  %v9990_v59 = vld [vmem:[#allocation14 + $0x3c4] sm:$0xf] }
 0x303   :  { %6014 = vmatpush.bf16.msrb.mxu3 %v9017_v2  ;;  %v7929_v0 = vor.u32 %v9917_v57, %v7928_v56  ;;  %v9983_v2 = vld [vmem:[#allocation14 + $0x38c] sm:$0xf]  ;;  %v10074_v56 = vld [vmem:[#allocation14 + $0x664] sm:$0xf]  ;;  %v8566_v57 = vld [vmem:[#allocation14 + $0x67c] sm:$0xf0] }
 0x304   :  { %6000 = vmatpush.bf16.msrb.mxu2 %v8821_v30  ;;  %v8709_v30 = vor.u32 %v10109_v3, %v8706_v4  ;;  %v10151_v3 = vld [vmem:[#allocation14 + $0x8cc] sm:$0xf]  ;;  %v8233_v4 = vor.u32 %v9990_v59, %v8230_v35  ;;  %v5711_v9 = vpop.f32.mrf.mxu3  ;;  %v7816_v59 = vld [vmem:[#allocation14 + $0x80] sm:$0xf]  ;;  %v9889_v35 = vld [vmem:[#allocation14 + $0x98] sm:$0xf0] }
 0x305   :  { %v7788_v9 = vld [vmem:[#allocation14 + $0x48] sm:$0xf] }
 0x306   :  { %5975 = vmatpush.bf16.msrb.mxu0 %v8345_v7  ;;  %5936 = vmatpush.bf16.msra.mxu1 %v9461_v42  ;;  %v9320_v7 = vld [vmem:[#allocation14 + $0xc48] sm:$0xf]  ;;  %v9910_v42 = vld [vmem:[#allocation14 + $0x140] sm:$0xf0] }
 0x307   :  { %6015 = vmatpush.bf16.msrb.mxu3 %v8989_v15  ;;  %v10266_v15 = vld [vmem:[#allocation14 + $0xc60] sm:$0xf0]  ;;  %v7901_v52 = vor.u32 %v9910_v42, %v7900_v8 }
 0x308   :  { %6001 = vmatpush.bf16.msrb.mxu2 %v8793_v28  ;;  %v10095_v28 = vld [vmem:[#allocation14 + $0x70c] sm:$0xf]  ;;  %v9321_v25 = vor.u32 %v10266_v15, %v9320_v7  ;;  %v8068_v15 = vld [vmem:[#allocation14 + $0x278] sm:$0xf] }
 0x309   :  { %v8653_v60 = vor.u32 %v10095_v28, %v8650_v33  ;;  %v8152_v28 = vld [vmem:[#allocation14 + $0x320] sm:$0xf]  ;;  %v9973_v33 = vld [vmem:[#allocation14 + $0x338] sm:$0xf0]  ;;  %v10067_v7 = vld [vmem:[#allocation14 + $0x62c] sm:$0xf] }
 0x30a   :  { %5976 = vmatpush.bf16.msrb.mxu0 %v8317_v17  ;;  %5937 = vmatpush.bf16.msra.mxu1 %v9433_v19  ;;  %v8877_v17 = vor.u32 %v10151_v3, %v8874_v31  ;;  %v8622_v19 = vld [vmem:[#allocation14 + $0x6ec] sm:$0xf0]  ;;  %v8153_v45 = vor.u32 %v9973_v33, %v8152_v28  ;;  %v9210_v3 = vld [vmem:[#allocation14 + $0xb84] sm:$0xf0]  ;;  %v9945_v28 = vld [vmem:[#allocation14 + $0x258] sm:$0xf0] }
 0x30b   :  { %6016 = vmatpush.bf16.msrb.mxu3 %v8961_v27  ;;  %v9297_v27 = vor.u32 %v10256_v16, %v9294_v44  ;;  %v8625_v36 = vor.u32 %v10088_v10, %v8622_v19  ;;  %v8538_v31 = vld [vmem:[#allocation14 + $0x644] sm:$0xf0]  ;;  %v9952_v16 = vld [vmem:[#allocation14 + $0x290] sm:$0xf0]  ;;  %v8852_v33 = vld [vmem:[#allocation14 + $0x898] sm:$0xf] }
 0x30c   :  { %6002 = vmatpush.bf16.msrb.mxu2 %v8765_v49  ;;  %v5750_v49 = vpop.f32.mrf.mxu2  ;;  %v10864_v47 = vpop.f32.mrf.mxu3  ;;  %v8541_v44 = vor.u32 %v10067_v7, %v8538_v31  ;;  %v10060_v19 = vld [vmem:[#allocation14 + $0x5f4] sm:$0xf]  ;;  %v9931_v7 = vld [vmem:[#allocation14 + $0x1e8] sm:$0xf0]  ;;  %v8796_v31 = vld [vmem:[#allocation14 + $0x828] sm:$0xf] }
 0x30d   :  { %v8124_v49 = vld [vmem:[#allocation14 + $0x2e8] sm:$0xf] }
 0x30e   :  { %5977 = vmatpush.bf16.msrb.mxu0 %v8289_v24  ;;  %5938 = vmatpush.bf16.msra.mxu1 %v9405_v40  ;;  %v10249_v24 = vld [vmem:[#allocation14 + $0xbdc] sm:$0xf]  ;;  %v8594_v40 = vld [vmem:[#allocation14 + $0x6b4] sm:$0xf0] }
 0x30f   :  { %6017 = vmatpush.bf16.msrb.mxu3 %v8933_v50  ;;  %v9269_v48 = vor.u32 %v10249_v24, %v9266_v37  ;;  %v9966_v50 = vld [vmem:[#allocation14 + $0x300] sm:$0xf0]  ;;  %v10221_v37 = vld [vmem:[#allocation14 + $0xafc] sm:$0xf] }
 0x310   :  { %6003 = vmatpush.bf16.msrb.mxu2 %v8737_v63  ;;  %v10273_v63 = vld [vmem:[#allocation14 + $0xc98] sm:$0xf0] }
 0x311   :  { %v9349_v11 = vor.u32 %v10273_v63, %v9348_v62  ;;  %v8096_v63 = vld [vmem:[#allocation14 + $0x2b0] sm:$0xf] }
 0x312   :  { %5978 = vmatpush.bf16.msrb.mxu0 %v8261_v29  ;;  %5939 = vmatpush.bf16.msra.mxu1 %v9377_v61  ;;  %v9238_v29 = vld [vmem:[#allocation14 + $0xbbc] sm:$0xf0]  ;;  %v8125_v61 = vor.u32 %v9966_v50, %v8124_v49  ;;  %v8012_v49 = vld [vmem:[#allocation14 + $0x208] sm:$0xf] }
 0x313   :  { %6018 = vmatpush.bf16.msrb.mxu3 %v8905_v58  ;;  %v9241_v62 = vor.u32 %v10242_v43, %v9238_v29  ;;  %v9959_v58 = vld [vmem:[#allocation14 + $0x2c8] sm:$0xf0]  ;;  %v9938_v29 = vld [vmem:[#allocation14 + $0x220] sm:$0xf0] }
 0x314   :  { %6004 = vmatpush.bf16.msrb.mxu2 %v8709_v30  ;;  %v8202_v30 = vld [vmem:[#allocation14 + $0x3a4] sm:$0xf0]  ;;  %v8097_v42 = vor.u32 %v9959_v58, %v8096_v63  ;;  %v5763_v12 = vpop.f32.mrf.mxu3  ;;  %v8013_v63 = vor.u32 %v9938_v29, %v8012_v49  ;;  %v10120_v49 = vld [vmem:[#allocation14 + $0x7d0] sm:$0xf0]  ;;  %v10190_v29 = vld [vmem:[#allocation14 + $0xa00] sm:$0xf0] }
 0x315   :  { %v8205_v32 = vor.u32 %v9983_v2, %v8202_v30  ;;  %v10235_v2 = vld [vmem:[#allocation14 + $0xb6c] sm:$0xf]  ;;  %v10871_v30 = vpop.f32.mrf.mxu0  ;;  %v9076_v12 = vld [vmem:[#allocation14 + $0xa58] sm:$0xf] }
 0x316   :  { %5979 = vmatpush.bf16.msrb.mxu0 %v8233_v4  ;;  %5940 = vmatpush.bf16.msra.mxu1 %v9349_v11  ;;  %v7817_v4 = vor.u32 %v9889_v35, %v7816_v59  ;;  %v9882_v11 = vld [vmem:[#allocation14 + $0x60] sm:$0xf0]  ;;  %v9213_v13 = vor.u32 %v10235_v2, %v9210_v3  ;;  %v9126_v59 = vld [vmem:[#allocation14 + $0xadc] sm:$0xf0]  ;;  %v7984_v2 = vld [vmem:[#allocation14 + $0x1d0] sm:$0xf] }
 0x317   :  { %6019 = vmatpush.bf16.msrb.mxu3 %v8877_v17  ;;  %v10228_v17 = vld [vmem:[#allocation14 + $0xb34] sm:$0xf]  ;;  %v7789_v10 = vor.u32 %v9882_v11, %v7788_v9  ;;  %v10046_v35 = vld [vmem:[#allocation14 + $0x584] sm:$0xf]  ;;  %v9098_v11 = vld [vmem:[#allocation14 + $0xaa4] sm:$0xf0] }
 0x318   :  { %6005 = vmatpush.bf16.msrb.mxu2 %v8681_v22  ;;  %v7872_v22 = vld [vmem:[#allocation14 + $0xf0] sm:$0xf] }
 0x319   :  { %v7873_v14 = vor.u32 %v9903_v23, %v7872_v22  ;;  %v7760_v22 = vld [vmem:[#allocation14 + $0x10] sm:$0xf]  ;;  %v9875_v23 = vld [vmem:[#allocation14 + $0x28] sm:$0xf0] }
 0x31a   :  { %5980 = vmatpush.bf16.msrb.mxu0 %v8205_v32  ;;  %5941 = vmatpush.bf16.msra.mxu1 %v9321_v25  ;;  %v8510_v32 = vld [vmem:[#allocation14 + $0x60c] sm:$0xf0]  ;;  %v8040_v25 = vld [vmem:[#allocation14 + $0x240] sm:$0xf] }
 0x31b   :  { %6064 = vmatpush.bf16.msra.mxu3 %v8181_v21  ;;  %v8069_v21 = vor.u32 %v9952_v16, %v8068_v15  ;;  %v8513_v24 = vor.u32 %v10060_v19, %v8510_v32  ;;  %v8426_v15 = vld [vmem:[#allocation14 + $0x564] sm:$0xf0]  ;;  %v8404_v16 = vld [vmem:[#allocation14 + $0x518] sm:$0xf]  ;;  %v9518_v19 = vld [vmem:[#allocation14 + $0xdec] sm:$0xf0] }
 0x31c   :  { %6006 = vmatpush.bf16.msrb.mxu2 %v8653_v60  ;;  %v9896_v60 = vld [vmem:[#allocation14 + $0xd0] sm:$0xf0]  ;;  %6020 = vmatmul.bf16.vlgmr.msrb.gmra.mxu3 %v10824_v26 }
 0x31d   :  { %5981 = vmatmul.bf16.vlgmr.msrb.gmra.mxu0 %v10810_v18  ;;  %v7845_v54 = vor.u32 %v9896_v60, %v7844_v46  ;;  %5942 = vmatmul.bf16.vlgmr.msra.gmra.mxu1 %v10840_v1  ;;  %v8041_v60 = vor.u32 %v9945_v28, %v8040_v25  ;;  %v5724_v50 = vpop.f32.mrf.mxu0  ;;  %v8768_v25 = vld [vmem:[#allocation14 + $0x7f0] sm:$0xf] }
 0x31e   :  { %6025 = vmatpush.bf16.msra.mxu0 %v9297_v27  ;;  %5986 = vmatpush.bf16.msrb.mxu1 %v8625_v36  ;;  %v10148_v36 = vld [vmem:[#allocation14 + $0x8b0] sm:$0xf0] }
 0x31f   :  { %6007 = vmatmul.bf16.vlgmr.msrb.gmra.mxu2 %v10814_v55  ;;  %6065 = vmatpush.bf16.msra.mxu3 %v8153_v45  ;;  %v8482_v45 = vld [vmem:[#allocation14 + $0x5d4] sm:$0xf0] }
 0x320   :  { %6051 = vmatpush.bf16.msra.mxu2 %v7957_v51  ;;  %v8597_v51 = vor.u32 %v10081_v38, %v8594_v40  ;;  %v7761_v38 = vor.u32 %v9875_v23, %v7760_v22  ;;  %v10053_v40 = vld [vmem:[#allocation14 + $0x5bc] sm:$0xf] }
 0x322   :  { %6026 = vmatpush.bf16.msra.mxu0 %v9269_v48  ;;  %5987 = vmatpush.bf16.msrb.mxu1 %v8597_v51  ;;  %v10869_v8 = vpop.f32.mrf.mxu2  ;;  %v8853_v48 = vor.u32 %v10148_v36, %v8852_v33  ;;  %v10873_v51 = vpop.f32.mrf.mxu3  ;;  %v9048_v36 = vld [vmem:[#allocation14 + $0xa20] sm:$0xf] }
 0x323   :  { %6066 = vmatpush.bf16.msra.mxu3 %v8125_v61  ;;  %v10214_v61 = vld [vmem:[#allocation14 + $0xac4] sm:$0xf] }
 0x324   :  { %6052 = vmatpush.bf16.msra.mxu2 %v7929_v0  ;;  %v8569_v0 = vor.u32 %v10074_v56, %v8566_v57  ;;  %v10141_v56 = vld [vmem:[#allocation14 + $0x878] sm:$0xf0]  ;;  %v8485_v57 = vor.u32 %v10053_v40, %v8482_v45  ;;  %v9129_v3 = vor.u32 %v10214_v61, %v9126_v59  ;;  %v10298_v59 = vld [vmem:[#allocation14 + $0xd64] sm:$0xf] }
 0x325   :  { %v10876_v32 = vpop.f32.mrf.mxu0  ;;  %v10305_v45 = vld [vmem:[#allocation14 + $0xd9c] sm:$0xf] }
 0x326   :  { %6027 = vmatpush.bf16.msra.mxu0 %v9241_v62  ;;  %5988 = vmatpush.bf16.msrb.mxu1 %v8569_v0  ;;  %v8454_v62 = vld [vmem:[#allocation14 + $0x59c] sm:$0xf0]  ;;  %v10207_v0 = vld [vmem:[#allocation14 + $0xa8c] sm:$0xf] }
 0x327   :  { %6067 = vmatpush.bf16.msra.mxu3 %v8097_v42  ;;  %v10134_v42 = vld [vmem:[#allocation14 + $0x840] sm:$0xf0]  ;;  %v8457_v9 = vor.u32 %v10046_v35, %v8454_v62  ;;  %v9101_v22 = vor.u32 %v10207_v0, %v9098_v11  ;;  %v9462_v35 = vld [vmem:[#allocation14 + $0xd7c] sm:$0xf0]  ;;  %v10113_v0 = vld [vmem:[#allocation14 + $0x798] sm:$0xf0] }
 0x328   :  { %6053 = vmatpush.bf16.msra.mxu2 %v7901_v52  ;;  %v9182_v52 = vld [vmem:[#allocation14 + $0xb4c] sm:$0xf0] }
 0x329   :  { %v9185_v27 = vor.u32 %v10228_v17, %v9182_v52  ;;  %v7985_v17 = vor.u32 %v9931_v7, %v7984_v2  ;;  %v8797_v52 = vor.u32 %v10134_v42, %v8796_v31  ;;  %v9465_v7 = vor.u32 %v10298_v59, %v9462_v35  ;;  %v8320_v31 = vld [vmem:[#allocation14 + $0x470] sm:$0xf]  ;;  %v10015_v42 = vld [vmem:[#allocation14 + $0x488] sm:$0xf0] }
 0x32a   :  { %6028 = vmatpush.bf16.msra.mxu0 %v9213_v13  ;;  %5989 = vmatpush.bf16.msrb.mxu1 %v8541_v44  ;;  %v5802_v46 = vpop.f32.mrf.mxu2  ;;  %v10204_v13 = vld [vmem:[#allocation14 + $0xa70] sm:$0xf0] }
 0x32b   :  { %6068 = vmatpush.bf16.msra.mxu3 %v8069_v21  ;;  %v10036_v44 = vld [vmem:[#allocation14 + $0x530] sm:$0xf0]  ;;  %v5815_v21 = vpop.f32.mrf.mxu3  ;;  %v9077_v23 = vor.u32 %v10204_v13, %v9076_v12  ;;  %v9490_v46 = vld [vmem:[#allocation14 + $0xdb4] sm:$0xf0]  ;;  %v10291_v12 = vld [vmem:[#allocation14 + $0xd2c] sm:$0xf] }
 0x32c   :  { %6054 = vmatpush.bf16.msra.mxu2 %v7873_v14  ;;  %v9154_v14 = vld [vmem:[#allocation14 + $0xb14] sm:$0xf0]  ;;  %v8405_v33 = vor.u32 %v10036_v44, %v8404_v16  ;;  %v9434_v13 = vld [vmem:[#allocation14 + $0xd44] sm:$0xf0]  ;;  %v10176_v21 = vld [vmem:[#allocation14 + $0x990] sm:$0xf0] }
 0x32d   :  { %v9157_v43 = vor.u32 %v10221_v37, %v9154_v14  ;;  %v8376_v14 = vld [vmem:[#allocation14 + $0x4e0] sm:$0xf]  ;;  %v5776_v62 = vpop.f32.mrf.mxu0  ;;  %v8684_v44 = vld [vmem:[#allocation14 + $0x748] sm:$0xf] }
 0x32e   :  { %6029 = vmatpush.bf16.msra.mxu0 %v9185_v27  ;;  %5990 = vmatpush.bf16.msrb.mxu1 %v8513_v24  ;;  %v10127_v27 = vld [vmem:[#allocation14 + $0x808] sm:$0xf0]  ;;  %v10197_v24 = vld [vmem:[#allocation14 + $0xa38] sm:$0xf0]  ;;  %v8908_v62 = vld [vmem:[#allocation14 + $0x908] sm:$0xf] }
 0x32f   :  { %6069 = vmatpush.bf16.msra.mxu3 %v8041_v60  ;;  %v8769_v40 = vor.u32 %v10127_v27, %v8768_v25  ;;  %v9049_v60 = vor.u32 %v10197_v24, %v9048_v36  ;;  %v8292_v25 = vld [vmem:[#allocation14 + $0x438] sm:$0xf]  ;;  %v10284_v36 = vld [vmem:[#allocation14 + $0xcf4] sm:$0xf]  ;;  %v9406_v24 = vld [vmem:[#allocation14 + $0xd0c] sm:$0xf0] }
 0x330   :  { %6055 = vmatpush.bf16.msra.mxu2 %v7845_v54  ;;  %v8824_v54 = vld [vmem:[#allocation14 + $0x860] sm:$0xf] }
 0x331   :  { %v8825_v58 = vor.u32 %v10141_v56, %v8824_v54  ;;  %v9493_v54 = vor.u32 %v10305_v45, %v9490_v46  ;;  %v8348_v56 = vld [vmem:[#allocation14 + $0x4a8] sm:$0xf]  ;;  %v10169_v46 = vld [vmem:[#allocation14 + $0x958] sm:$0xf0] }
 0x332   :  { %6030 = vmatpush.bf16.msra.mxu0 %v9157_v43  ;;  %5991 = vmatpush.bf16.msrb.mxu1 %v8485_v57  ;;  %v9020_v43 = vld [vmem:[#allocation14 + $0x9e8] sm:$0xf]  ;;  %v10022_v57 = vld [vmem:[#allocation14 + $0x4c0] sm:$0xf0] }
 0x333   :  { %6070 = vmatpush.bf16.msra.mxu3 %v8013_v63  ;;  %v9021_v63 = vor.u32 %v10190_v29, %v9020_v43  ;;  %v8349_v2 = vor.u32 %v10022_v57, %v8348_v56  ;;  %v10001_v43 = vld [vmem:[#allocation14 + $0x418] sm:$0xf0]  ;;  %v9378_v56 = vld [vmem:[#allocation14 + $0xcd4] sm:$0xf0] }
 0x334   :  { %6056 = vmatpush.bf16.msra.mxu2 %v7817_v4  ;;  %v10039_v4 = vld [vmem:[#allocation14 + $0x54c] sm:$0xf] }
 0x335   :  { %v8429_v28 = vor.u32 %v10039_v4, %v8426_v15  ;;  %v10183_v4 = vld [vmem:[#allocation14 + $0x9c8] sm:$0xf0] }
 0x336   :  { %6031 = vmatpush.bf16.msra.mxu0 %v9129_v3  ;;  %5992 = vmatpush.bf16.msrb.mxu1 %v8457_v9  ;;  %v8992_v3 = vld [vmem:[#allocation14 + $0x9b0] sm:$0xf]  ;;  %v5710_v9 = vadd.f32 %v10861_v39, %v10853_v53  ;;  %v10008_v53 = vld [vmem:[#allocation14 + $0x450] sm:$0xf0]  ;;  %v10884_v39 = vld [vmem:[#allocation16] sm:$0xff] }
 0x337   :  { %6071 = vmatpush.bf16.msra.mxu3 %v7985_v17  ;;  %v8993_v16 = vor.u32 %v10183_v4, %v8992_v3  ;;  %v10106_v17 = vld [vmem:[#allocation14 + $0x760] sm:$0xf0]  ;;  %v3319_v27 = vperm.slane %v10884_v39, 2  ;;  %v8293_v45 = vor.u32 %v10008_v53, %v8292_v25  ;;  %v7930_v3 = vld [vmem:[#allocation14 + $0x17c] sm:$0xf0] }
 0x338   :  { %6057 = vmatpush.bf16.msra.mxu2 %v7789_v10  ;;  %v10312_v10 = vld [vmem:[#allocation14 + $0xdd4] sm:$0xf]  ;;  %v7902_v25 = vld [vmem:[#allocation14 + $0x144] sm:$0xf0] }
 0x339   :  { %v9521_v37 = vor.u32 %v10312_v10, %v9518_v19  ;;  %v8321_v10 = vor.u32 %v10015_v42, %v8320_v31  ;;  %v8964_v19 = vld [vmem:[#allocation14 + $0x978] sm:$0xf]  ;;  %v8236_v42 = vld [vmem:[#allocation14 + $0x3c8] sm:$0xf] }
 0x33a   :  { %6032 = vmatpush.bf16.msra.mxu0 %v9101_v22  ;;  %5993 = vmatpush.bf16.msrb.mxu1 %v8429_v28  ;;  %v5735_v22 = vpop.f32.mrf.mxu1 }
 0x33b   :  { %6116 = vmatpush.bf16.msrb.mxu3 %v9077_v23  ;;  %v9437_v23 = vor.u32 %v10291_v12, %v9434_v13  ;;  %v3318_v12 = vperm.slane %v10884_v39, 1  ;;  %v10270_v13 = vld [vmem:[#allocation14 + $0xc84] sm:$0xf] }
 0x33c   :  { %6058 = vmatpush.bf16.msra.mxu2 %v7761_v38  ;;  %v10029_v38 = vld [vmem:[#allocation14 + $0x4f8] sm:$0xf0]  ;;  %6072 = vmatmul.bf16.vlgmr.msra.gmra.mxu3 %v10795_v34 }
 0x33d   :  { %v8377_v50 = vor.u32 %v10029_v38, %v8376_v14  ;;  %6033 = vmatmul.bf16.vlgmr.msra.gmra.mxu0 %v10833_v20  ;;  %5994 = vmatmul.bf16.vlgmr.msrb.gmra.mxu1 %v10806_v41  ;;  %v8656_v14 = vld [vmem:[#allocation14 + $0x710] sm:$0xf]  ;;  %v10099_v38 = vld [vmem:[#allocation14 + $0x728] sm:$0xf0] }
 0x33e   :  { %6077 = vmatpush.bf16.msrb.mxu0 %v8405_v33  ;;  %6038 = vmatpush.bf16.msra.mxu1 %v9521_v37  ;;  %v8685_v33 = vor.u32 %v10106_v17, %v8684_v44  ;;  %v10887_v37 = vpop.f32.mrf.mxu0  ;;  %v8657_v29 = vor.u32 %v10099_v38, %v8656_v14  ;;  %v10260_v14 = vld [vmem:[#allocation14 + $0xc30] sm:$0xf0] }
 0x33f   :  { %6059 = vmatmul.bf16.vlgmr.msra.gmra.mxu2 %v10799_v6  ;;  %6117 = vmatpush.bf16.msrb.mxu3 %v9049_v60  ;;  %v9921_v60 = vld [vmem:[#allocation14 + $0x19c] sm:$0xf] }
 0x340   :  { %6103 = vmatpush.bf16.msrb.mxu2 %v8853_v48  ;;  %v8740_v48 = vld [vmem:[#allocation14 + $0x7b8] sm:$0xf] }
 0x341   :  { %v8741_v61 = vor.u32 %v10120_v49, %v8740_v48  ;;  %v7958_v48 = vld [vmem:[#allocation14 + $0x1b4] sm:$0xf0]  ;;  %v9409_v49 = vor.u32 %v10284_v36, %v9406_v24  ;;  %v5749_v36 = vadd.f32 %v10859_v5, %v3318_v12  ;;  %v9322_v24 = vld [vmem:[#allocation14 + $0xc64] sm:$0xf0] }
 0x342   :  { %6078 = vmatpush.bf16.msrb.mxu0 %v8377_v50  ;;  %6039 = vmatpush.bf16.msra.mxu1 %v9493_v54  ;;  %v5852_v15 = vpop.f32.mrf.mxu2  ;;  %v8264_v50 = vld [vmem:[#allocation14 + $0x400] sm:$0xf]  ;;  %v10277_v54 = vld [vmem:[#allocation14 + $0xcbc] sm:$0xf]  ;;  %v7961_v35 = vor.u32 %v9921_v60, %v7958_v48  ;;  %v5737_v4 = vpop.f32.mrf.mxu1  ;;  %v9244_v12 = vld [vmem:[#allocation14 + $0xba8] sm:$0xf] }
 0x343   :  { %6118 = vmatpush.bf16.msrb.mxu3 %v9021_v63  ;;  %v5853_v57 = vadd.f32 %v5852_v15, %v3319_v27  ;;  %v5865_v63 = vpop.f32.mrf.mxu3  ;;  %v9381_v31 = vor.u32 %v10277_v54, %v9378_v56  ;;  %v9350_v15 = vld [vmem:[#allocation14 + $0xc9c] sm:$0xf0]  ;;  %v9987_v27 = vld [vmem:[#allocation14 + $0x3a8] sm:$0xf0]  ;;  %v5762_v60 = vadd.f32 %v10864_v47, %v5749_v36  ;;  %v9893_v4 = vld [vmem:[#allocation14 + $0xbc] sm:$0xf] }
 0x344   :  { %6104 = vmatpush.bf16.msrb.mxu2 %v8825_v58  ;;  %v8712_v58 = vld [vmem:[#allocation14 + $0x780] sm:$0xf]  ;;  %v9353_v53 = vor.u32 %v10270_v13, %v9350_v15  ;;  %v10246_v13 = vld [vmem:[#allocation14 + $0xbc0] sm:$0xf0]  ;;  %v8544_v36 = vld [vmem:[#allocation14 + $0x630] sm:$0xf] }
 0x345   :  { %v8713_v11 = vor.u32 %v10113_v0, %v8712_v58  ;;  %v8265_v58 = vor.u32 %v10001_v43, %v8264_v50  ;;  %v10162_v0 = vld [vmem:[#allocation14 + $0x920] sm:$0xf0]  ;;  %v9900_v43 = vld [vmem:[#allocation14 + $0xf4] sm:$0xf] }
 0x346   :  { %6079 = vmatpush.bf16.msrb.mxu0 %v8349_v2  ;;  %6040 = vmatpush.bf16.msra.mxu1 %v9465_v7  ;;  %v9914_v2 = vld [vmem:[#allocation14 + $0x164] sm:$0xf]  ;;  %v10889_v7 = vadd.f32 %v5865_v63, %v5853_v57  ;;  %v8909_v44 = vor.u32 %v10162_v0, %v8908_v62  ;;  %v9272_v62 = vld [vmem:[#allocation14 + $0xbe0] sm:$0xf]  ;;  %v10253_v63 = vld [vmem:[#allocation14 + $0xbf8] sm:$0xf0] }
 0x347   :  { %6119 = vmatpush.bf16.msrb.mxu3 %v8993_v16  ;;  %v5828_v16 = vpop.f32.mrf.mxu0  ;;  %v7933_v17 = vor.u32 %v9914_v2, %v7930_v3  ;;  %v9970_v57 = vld [vmem:[#allocation14 + $0x324] sm:$0xf]  ;;  %v10085_v0 = vld [vmem:[#allocation14 + $0x6b8] sm:$0xf0] }
 0x348   :  { %6105 = vmatpush.bf16.msrb.mxu2 %v8797_v52  ;;  %v5723_v52 = vadd.f32 %v10871_v30, %v5710_v9  ;;  %v8965_v30 = vor.u32 %v10176_v21, %v8964_v19  ;;  %v9994_v9 = vld [vmem:[#allocation14 + $0x3e0] sm:$0xf0]  ;;  %v10263_v21 = vld [vmem:[#allocation14 + $0xc4c] sm:$0xf]  ;;  %v8572_v16 = vld [vmem:[#allocation14 + $0x668] sm:$0xf] }
 0x349   :  { %v8237_v19 = vor.u32 %v9994_v9, %v8236_v42  ;;  %v9325_v5 = vor.u32 %v10263_v21, %v9322_v24  ;;  %v9273_v42 = vor.u32 %v10253_v63, %v9272_v62  ;;  %v9963_v9 = vld [vmem:[#allocation14 + $0x2ec] sm:$0xf]  ;;  %v8042_v63 = vld [vmem:[#allocation14 + $0x25c] sm:$0xf0] }
 0x34a   :  { %v5736_v28 = vadd.f32 %v5735_v22, %v5723_v52  ;;  %6080 = vmatpush.bf16.msrb.mxu0 %v8321_v10  ;;  %6041 = vmatpush.bf16.msra.mxu1 %v9437_v23  ;;  %v8208_v52 = vld [vmem:[#allocation14 + $0x390] sm:$0xf]  ;;  %v10155_v22 = vld [vmem:[#allocation14 + $0x8e8] sm:$0xf0]  ;;  %v5787_v54 = vpop.f32.mrf.mxu1 }
 0x34b   :  { %6120 = vmatpush.bf16.msrb.mxu3 %v8965_v30  ;;  %v8880_v10 = vld [vmem:[#allocation14 + $0x8d0] sm:$0xf]  ;;  %v9907_v23 = vld [vmem:[#allocation14 + $0x12c] sm:$0xf]  ;;  %v9300_v30 = vld [vmem:[#allocation14 + $0xc18] sm:$0xf]  ;;  %v5867_v48 = vpop.f32.mrf.mxu3 }
 0x34c   :  { %6106 = vmatpush.bf16.msrb.mxu2 %v8769_v40  ;;  %v8936_v40 = vld [vmem:[#allocation14 + $0x940] sm:$0xf]  ;;  %10336 = vtanh.f32 %v5736_v28  ;;  %v9977_v28 = vld [vmem:[#allocation14 + $0x35c] sm:$0xf]  ;;  %v8881_v38 = vor.u32 %v10155_v22, %v8880_v10  ;;  %v9301_v56 = vor.u32 %v10260_v14, %v9300_v30  ;;  %v9886_v10 = vld [vmem:[#allocation14 + $0x84] sm:$0xf]  ;;  %v9245_v22 = vor.u32 %v10246_v13, %v9244_v12 }
 0x34d   :  { %v8937_v59 = vor.u32 %v10169_v46, %v8936_v40  ;;  %v7905_v40 = vor.u32 %v9907_v23, %v7902_v25  ;;  %v10092_v46 = vld [vmem:[#allocation14 + $0x6f0] sm:$0xf0]  ;;  %v8098_v25 = vld [vmem:[#allocation14 + $0x2cc] sm:$0xf0]  ;;  %v10071_v24 = vld [vmem:[#allocation14 + $0x648] sm:$0xf0] }
 0x34e   :  { %6081 = vmatpush.bf16.msrb.mxu0 %v8293_v45  ;;  %6042 = vmatpush.bf16.msra.mxu1 %v9409_v49  ;;  %v8628_v45 = vld [vmem:[#allocation14 + $0x6d8] sm:$0xf]  ;;  %v8209_v49 = vor.u32 %v9987_v27, %v8208_v52  ;;  %v9956_v23 = vld [vmem:[#allocation14 + $0x2b4] sm:$0xf]  ;;  %v9216_v27 = vld [vmem:[#allocation14 + $0xb70] sm:$0xf]  ;;  %v8545_v48 = vor.u32 %v10071_v24, %v8544_v36 }
 0x34f   :  { %6121 = vmatpush.bf16.msrb.mxu3 %v8937_v59  ;;  %v5775_v59 = vadd.f32 %v10876_v32, %v5762_v60  ;;  %v8101_v14 = vor.u32 %v9956_v23, %v8098_v25  ;;  %v8070_v60 = vld [vmem:[#allocation14 + $0x294] sm:$0xf0]  ;;  %v9935_v12 = vld [vmem:[#allocation14 + $0x20c] sm:$0xf]  ;;  %v8432_v24 = vld [vmem:[#allocation14 + $0x550] sm:$0xf] }
 0x350   :  { %6107 = vmatpush.bf16.msrb.mxu2 %v8741_v61  ;;  %v5854_v61 = vpop.f32.mrf.mxu2 }
 0x351   :  { %v8154_v61 = vld [vmem:[#allocation14 + $0x33c] sm:$0xf0]  ;;  %v5788_v2 = vadd.f32 %v5787_v54, %v5775_v59  ;;  %v10064_v54 = vld [vmem:[#allocation14 + $0x610] sm:$0xf0]  ;;  %v9942_v59 = vld [vmem:[#allocation14 + $0x244] sm:$0xf] }
 0x352   :  { %6082 = vmatpush.bf16.msrb.mxu0 %v8265_v58  ;;  %6043 = vmatpush.bf16.msra.mxu1 %v9381_v31  ;;  %v8600_v58 = vld [vmem:[#allocation14 + $0x6a0] sm:$0xf]  ;;  %v8157_v3 = vor.u32 %v9970_v57, %v8154_v61  ;;  %v7846_v31 = vld [vmem:[#allocation14 + $0xd4] sm:$0xf0]  ;;  %v5789_v21 = vpop.f32.mrf.mxu1  ;;  %v9872_v57 = vld [vmem:[#allocation14 + $0x14] sm:$0xf] }
 0x353   :  { %6122 = vmatpush.bf16.msrb.mxu3 %v8909_v44  ;;  %v8601_v32 = vor.u32 %v10085_v0, %v8600_v58  ;;  %v7849_v15 = vor.u32 %v9893_v4, %v7846_v31  ;;  %v10078_v44 = vld [vmem:[#allocation14 + $0x680] sm:$0xf0]  ;;  %v7762_v61 = vld [vmem:[#allocation14 + $0x2c] sm:$0xf0]  ;;  %v8854_v58 = vld [vmem:[#allocation14 + $0x8b4] sm:$0xf0] }
 0x354   :  { %6108 = vmatpush.bf16.msrb.mxu2 %v8713_v11  ;;  %v10337_v11 = vpop.eup %10336  ;;  %v10225_v4 = vld [vmem:[#allocation14 + $0xb18] sm:$0xf0]  ;;  %v7765_v31 = vor.u32 %v9872_v57, %v7762_v61  ;;  %v8460_v21 = vld [vmem:[#allocation14 + $0x588] sm:$0xf] }
 0x355   :  { %6370 = vst [vmem:[#allocation17] sm:$0xff] %v10337_v11  ;;  %v8126_v11 = vld [vmem:[#allocation14 + $0x304] sm:$0xf0] }
 0x356   :  { %6083 = vmatpush.bf16.msrb.mxu0 %v8237_v19  ;;  %6044 = vmatpush.bf16.msra.mxu1 %v9353_v53  ;;  %v8129_v52 = vor.u32 %v9963_v9, %v8126_v11  ;;  %v7818_v19 = vld [vmem:[#allocation14 + $0x9c] sm:$0xf0]  ;;  %v8573_v53 = vor.u32 %v10078_v44, %v8572_v16  ;;  %v8045_v11 = vor.u32 %v9942_v59, %v8042_v63  ;;  %v8014_v16 = vld [vmem:[#allocation14 + $0x224] sm:$0xf0]  ;;  %v10138_v44 = vld [vmem:[#allocation14 + $0x864] sm:$0xf] }
 0x357   :  { %6123 = vmatpush.bf16.msrb.mxu3 %v8881_v38  ;;  %v9879_v38 = vld [vmem:[#allocation14 + $0x4c] sm:$0xf]  ;;  %v8017_v25 = vor.u32 %v9935_v12, %v8014_v16  ;;  %v9022_v16 = vld [vmem:[#allocation14 + $0xa04] sm:$0xf0] }
 0x358   :  { %6109 = vmatpush.bf16.msrb.mxu2 %v8685_v33  ;;  %v8182_v33 = vld [vmem:[#allocation14 + $0x374] sm:$0xf0] }
 0x359   :  { %v8185_v50 = vor.u32 %v9977_v28, %v8182_v33  ;;  %v10239_v28 = vld [vmem:[#allocation14 + $0xb88] sm:$0xf0]  ;;  %v7821_v33 = vor.u32 %v9886_v10, %v7818_v19  ;;  %v9132_v10 = vld [vmem:[#allocation14 + $0xac8] sm:$0xf]  ;;  %v10218_v19 = vld [vmem:[#allocation14 + $0xae0] sm:$0xf0] }
 0x35a   :  { %6084 = vmatpush.bf16.msrb.mxu0 %v8209_v49  ;;  %6045 = vmatpush.bf16.msra.mxu1 %v9325_v5  ;;  %v9188_v49 = vld [vmem:[#allocation14 + $0xb38] sm:$0xf]  ;;  %v10903_v5 = vpop.f32.mrf.mxu0  ;;  %v9133_v36 = vor.u32 %v10218_v19, %v9132_v10  ;;  %v9468_v19 = vld [vmem:[#allocation14 + $0xd68] sm:$0xf] }
 0x35b   :  { %6168 = vmatpush.bf16.msra.mxu3 %v8185_v50  ;;  %v10232_v50 = vld [vmem:[#allocation14 + $0xb50] sm:$0xf0] }
 0x35c   :  { %6110 = vmatpush.bf16.msrb.mxu2 %v8657_v29  ;;  %v7874_v29 = vld [vmem:[#allocation14 + $0x10c] sm:$0xf0]  ;;  %6124 = vmatmul.bf16.vlgmr.msrb.gmra.mxu3 %v10824_v26  ;;  %v9189_v62 = vor.u32 %v10232_v50, %v9188_v49  ;;  %v10906_v13 = vpop.f32.mrf.mxu3  ;;  %v9078_v49 = vld [vmem:[#allocation14 + $0xa74] sm:$0xf0]  ;;  %v10033_v50 = vld [vmem:[#allocation14 + $0x51c] sm:$0xf] }
 0x35d   :  { %v7877_v47 = vor.u32 %v9900_v43, %v7874_v29  ;;  %6085 = vmatmul.bf16.vlgmr.msrb.gmra.mxu0 %v10810_v18  ;;  %6046 = vmatmul.bf16.vlgmr.msra.gmra.mxu1 %v10840_v1  ;;  %v8516_v29 = vld [vmem:[#allocation14 + $0x5f8] sm:$0xf] }
 0x35e   :  { %6129 = vmatpush.bf16.msra.mxu0 %v9301_v56 }
 0x35f   :  { %6111 = vmatmul.bf16.vlgmr.msrb.gmra.mxu2 %v10814_v55  ;;  %6169 = vmatpush.bf16.msra.mxu3 %v8157_v3  ;;  %v9160_v3 = vld [vmem:[#allocation14 + $0xb00] sm:$0xf] }
 0x360   :  { %6155 = vmatpush.bf16.msra.mxu2 %v7961_v35  ;;  %v8629_v35 = vor.u32 %v10092_v46, %v8628_v45  ;;  %v9217_v45 = vor.u32 %v10239_v28, %v9216_v27  ;;  %v9949_v46 = vld [vmem:[#allocation14 + $0x27c] sm:$0xf]  ;;  %v9104_v27 = vld [vmem:[#allocation14 + $0xa90] sm:$0xf]  ;;  %v9928_v28 = vld [vmem:[#allocation14 + $0x1d4] sm:$0xf] }
 0x362   :  { %6090 = vmatpush.bf16.msrb.mxu1 %v8629_v35  ;;  %6130 = vmatpush.bf16.msra.mxu0 %v9273_v42  ;;  %v5839_v35 = vpop.f32.mrf.mxu1  ;;  %v8488_v42 = vld [vmem:[#allocation14 + $0x5c0] sm:$0xf]  ;;  %v5880_v23 = vpop.f32.mrf.mxu0 }
 0x363   :  { %6170 = vmatpush.bf16.msra.mxu3 %v8129_v52  ;;  %v10110_v23 = vld [vmem:[#allocation14 + $0x784] sm:$0xf] }
 0x364   :  { %6156 = vmatpush.bf16.msra.mxu2 %v7933_v17  ;;  %v5801_v17 = vadd.f32 %v10869_v8, %v5788_v2  ;;  %v10900_v8 = vpop.f32.mrf.mxu2  ;;  %v8517_v2 = vor.u32 %v10064_v54, %v8516_v29  ;;  %v5919_v57 = vpop.f32.mrf.mxu3 }
 0x365   :  { %v9412_v57 = vld [vmem:[#allocation14 + $0xcf8] sm:$0xf] }
 0x366   :  { %6091 = vmatpush.bf16.msrb.mxu1 %v8601_v32  ;;  %v5814_v30 = vadd.f32 %v10873_v51, %v5801_v17  ;;  %6131 = vmatpush.bf16.msra.mxu0 %v9245_v22  ;;  %v8073_v51 = vor.u32 %v9949_v46, %v8070_v60  ;;  %v8826_v17 = vld [vmem:[#allocation14 + $0x87c] sm:$0xf0]  ;;  %v10050_v22 = vld [vmem:[#allocation14 + $0x5a0] sm:$0xf0]  ;;  %v10211_v60 = vld [vmem:[#allocation14 + $0xaa8] sm:$0xf0] }
 0x367   :  { %6171 = vmatpush.bf16.msra.mxu3 %v8101_v14  ;;  %v7986_v14 = vld [vmem:[#allocation14 + $0x1ec] sm:$0xf0]  ;;  %v8461_v46 = vor.u32 %v10050_v22, %v8460_v21  ;;  %v9105_v61 = vor.u32 %v10211_v60, %v9104_v27  ;;  %v10302_v21 = vld [vmem:[#allocation14 + $0xd80] sm:$0xf0]  ;;  %v10180_v27 = vld [vmem:[#allocation14 + $0x9b4] sm:$0xf] }
 0x368   :  { %6157 = vmatpush.bf16.msra.mxu2 %v7905_v40  ;;  %v7790_v40 = vld [vmem:[#allocation14 + $0x64] sm:$0xf0]  ;;  %v5827_v56 = vadd.f32 %v10887_v37, %v5814_v30  ;;  %v10057_v37 = vld [vmem:[#allocation14 + $0x5d8] sm:$0xf0]  ;;  %v10043_v30 = vld [vmem:[#allocation14 + $0x568] sm:$0xf0]  ;;  %v7989_v29 = vor.u32 %v9928_v28, %v7986_v14 }
 0x369   :  { %v7793_v43 = vor.u32 %v9879_v38, %v7790_v40  ;;  %v8489_v52 = vor.u32 %v10057_v37, %v8488_v42  ;;  %v10131_v38 = vld [vmem:[#allocation14 + $0x82c] sm:$0xf]  ;;  %v8798_v40 = vld [vmem:[#allocation14 + $0x844] sm:$0xf0]  ;;  %v8433_v63 = vor.u32 %v10043_v30, %v8432_v24  ;;  %v9496_v42 = vld [vmem:[#allocation14 + $0xda0] sm:$0xf] }
 0x36a   :  { %6092 = vmatpush.bf16.msrb.mxu1 %v8573_v53  ;;  %6132 = vmatpush.bf16.msra.mxu0 %v9217_v45  ;;  %v5840_v0 = vadd.f32 %v5839_v35, %v5827_v56  ;;  %v8829_v53 = vor.u32 %v10138_v44, %v8826_v17  ;;  %v8801_v54 = vor.u32 %v10131_v38, %v8798_v40  ;;  %v9524_v56 = vld [vmem:[#allocation14 + $0xdd8] sm:$0xf]  ;;  %v10124_v35 = vld [vmem:[#allocation14 + $0x7f4] sm:$0xf]  ;;  %v10309_v37 = vld [vmem:[#allocation14 + $0xdb8] sm:$0xf0] }
 0x36b   :  { %6172 = vmatpush.bf16.msra.mxu3 %v8073_v51  ;;  %v10316_v51 = vld [vmem:[#allocation14 + $0xdf0] sm:$0xf0]  ;;  %v9497_v44 = vor.u32 %v10309_v37, %v9496_v42  ;;  %v10019_v17 = vld [vmem:[#allocation14 + $0x4ac] sm:$0xf]  ;;  %v8994_v28 = vld [vmem:[#allocation14 + $0x9cc] sm:$0xf0] }
 0x36c   :  { %6158 = vmatpush.bf16.msra.mxu2 %v7877_v47  ;;  %v10145_v47 = vld [vmem:[#allocation14 + $0x89c] sm:$0xf]  ;;  %10338 = vtanh.f32 %v5840_v0  ;;  %v5906_v9 = vpop.f32.mrf.mxu2  ;;  %v9050_v0 = vld [vmem:[#allocation14 + $0xa3c] sm:$0xf0]  ;;  %v8322_v24 = vld [vmem:[#allocation14 + $0x48c] sm:$0xf0] }
 0x36d   :  { %v8857_v32 = vor.u32 %v10145_v47, %v8854_v58  ;;  %v10194_v58 = vld [vmem:[#allocation14 + $0xa24] sm:$0xf]  ;;  %v9440_v14 = vld [vmem:[#allocation14 + $0xd30] sm:$0xf]  ;;  %v10295_v38 = vld [vmem:[#allocation14 + $0xd48] sm:$0xf0] }
 0x36e   :  { %6093 = vmatpush.bf16.msrb.mxu1 %v8545_v48  ;;  %6133 = vmatpush.bf16.msra.mxu0 %v9189_v62  ;;  %v10201_v48 = vld [vmem:[#allocation14 + $0xa5c] sm:$0xf]  ;;  %v8770_v62 = vld [vmem:[#allocation14 + $0x80c] sm:$0xf0]  ;;  %v9053_v9 = vor.u32 %v10194_v58, %v9050_v0  ;;  %v8686_v60 = vld [vmem:[#allocation14 + $0x764] sm:$0xf0] }
 0x36f   :  { %6173 = vmatpush.bf16.msra.mxu3 %v8045_v11  ;;  %v9081_v59 = vor.u32 %v10201_v48, %v9078_v49  ;;  %v10117_v11 = vld [vmem:[#allocation14 + $0x7bc] sm:$0xf]  ;;  %v8266_v42 = vld [vmem:[#allocation14 + $0x41c] sm:$0xf0] }
 0x370   :  { %6159 = vmatpush.bf16.msra.mxu2 %v7849_v15  ;;  %v9161_v15 = vor.u32 %v10225_v4, %v9160_v3  ;;  %v10026_v3 = vld [vmem:[#allocation14 + $0x4e4] sm:$0xf]  ;;  %v8378_v4 = vld [vmem:[#allocation14 + $0x4fc] sm:$0xf0]  ;;  %v10173_v49 = vld [vmem:[#allocation14 + $0x97c] sm:$0xf] }
 0x371   :  { %v8381_v12 = vor.u32 %v10026_v3, %v8378_v4  ;;  %v7964_v3 = vld [vmem:[#allocation14 + $0x1a0] sm:$0xf]  ;;  %v9925_v4 = vld [vmem:[#allocation14 + $0x1b8] sm:$0xf0] }
 0x372   :  { %6094 = vmatpush.bf16.msrb.mxu1 %v8517_v2  ;;  %6134 = vmatpush.bf16.msra.mxu0 %v9161_v15  ;;  %v10339_v45 = vpop.eup %10338  ;;  %v9525_v2 = vor.u32 %v10316_v51, %v9524_v56  ;;  %v10187_v15 = vld [vmem:[#allocation14 + $0x9ec] sm:$0xf]  ;;  %v3320_v56 = vperm.slane %v10884_v39, 3 }
 0x373   :  { %6371 = vst [vmem:[#allocation17 + $0x8] sm:$0xff] %v10339_v45  ;;  %6174 = vmatpush.bf16.msra.mxu3 %v8017_v25  ;;  %v9025_v22 = vor.u32 %v10187_v15, %v9022_v16  ;;  %v8714_v25 = vld [vmem:[#allocation14 + $0x79c] sm:$0xf0]  ;;  %v8997_v45 = vor.u32 %v10180_v27, %v8994_v28  ;;  %v7965_v16 = vor.u32 %v9925_v4, %v7964_v3  ;;  %v9356_v27 = vld [vmem:[#allocation14 + $0xc88] sm:$0xf] }
 0x374   :  { %6160 = vmatpush.bf16.msra.mxu2 %v7821_v33  ;;  %v5841_v33 = vpop.f32.mrf.mxu1  ;;  %v8717_v30 = vor.u32 %v10110_v23, %v8714_v25  ;;  %v9991_v25 = vld [vmem:[#allocation14 + $0x3cc] sm:$0xf]  ;;  %v10274_v28 = vld [vmem:[#allocation14 + $0xca0] sm:$0xf0]  ;;  %v9904_v3 = vld [vmem:[#allocation14 + $0x110] sm:$0xf0] }
 0x375   :  { %v9469_v33 = vor.u32 %v10302_v21, %v9468_v19  ;;  %v7936_v19 = vld [vmem:[#allocation14 + $0x168] sm:$0xf]  ;;  %v9918_v21 = vld [vmem:[#allocation14 + $0x180] sm:$0xf0] }
 0x376   :  { %6095 = vmatpush.bf16.msrb.mxu1 %v8489_v52  ;;  %6135 = vmatpush.bf16.msra.mxu0 %v9133_v36  ;;  %v8350_v52 = vld [vmem:[#allocation14 + $0x4c4] sm:$0xf0]  ;;  %v10012_v36 = vld [vmem:[#allocation14 + $0x474] sm:$0xf] }
 0x377   :  { %6175 = vmatpush.bf16.msra.mxu3 %v7989_v29  ;;  %v8325_v48 = vor.u32 %v10012_v36, %v8322_v24  ;;  %v10005_v29 = vld [vmem:[#allocation14 + $0x43c] sm:$0xf]  ;;  %v7937_v24 = vor.u32 %v9918_v21, %v7936_v19  ;;  %v8132_v21 = vld [vmem:[#allocation14 + $0x2f0] sm:$0xf] }
 0x378   :  { %6161 = vmatpush.bf16.msra.mxu2 %v7793_v43  ;;  %v8406_v43 = vld [vmem:[#allocation14 + $0x534] sm:$0xf0] }
 0x379   :  { %v8409_v47 = vor.u32 %v10033_v50, %v8406_v43  ;;  %v8966_v50 = vld [vmem:[#allocation14 + $0x994] sm:$0xf0]  ;;  %v9441_v43 = vor.u32 %v10295_v38, %v9440_v14  ;;  %v10152_v14 = vld [vmem:[#allocation14 + $0x8d4] sm:$0xf] }
 0x37a   :  { %6096 = vmatpush.bf16.msrb.mxu1 %v8461_v46  ;;  %6136 = vmatpush.bf16.msra.mxu0 %v9105_v61  ;;  %v10103_v46 = vld [vmem:[#allocation14 + $0x74c] sm:$0xf]  ;;  %v10288_v61 = vld [vmem:[#allocation14 + $0xd10] sm:$0xf0] }
 0x37b   :  { %6220 = vmatpush.bf16.msrb.mxu3 %v9081_v59  ;;  %v8689_v51 = vor.u32 %v10103_v46, %v8686_v60  ;;  %v10913_v59 = vpop.f32.mrf.mxu0  ;;  %v9413_v39 = vor.u32 %v10288_v61, %v9412_v57  ;;  %v8882_v46 = vld [vmem:[#allocation14 + $0x8ec] sm:$0xf0] }
 0x37c   :  { %6162 = vmatpush.bf16.msra.mxu2 %v7765_v31  ;;  %v8773_v31 = vor.u32 %v10124_v35, %v8770_v62  ;;  %6176 = vmatmul.bf16.vlgmr.msra.gmra.mxu3 %v10795_v34  ;;  %v8969_v35 = vor.u32 %v10173_v49, %v8966_v50  ;;  %v10096_v62 = vld [vmem:[#allocation14 + $0x714] sm:$0xf]  ;;  %v10915_v58 = vpop.f32.mrf.mxu1  ;;  %v7908_v60 = vld [vmem:[#allocation14 + $0x130] sm:$0xf]  ;;  %v9357_v49 = vor.u32 %v10274_v28, %v9356_v27  ;;  %v8574_v27 = vld [vmem:[#allocation14 + $0x684] sm:$0xf0] }
 0x37d   :  { %6137 = vmatmul.bf16.vlgmr.msra.gmra.mxu0 %v10833_v20  ;;  %v8210_v50 = vld [vmem:[#allocation14 + $0x3ac] sm:$0xf0]  ;;  %v8885_v57 = vor.u32 %v10152_v14, %v8882_v46  ;;  %v8104_v14 = vld [vmem:[#allocation14 + $0x2b8] sm:$0xf] }
 0x37e   :  { %6097 = vmatpush.bf16.msrb.mxu1 %v8433_v63  ;;  %6181 = vmatpush.bf16.msrb.mxu0 %v8409_v47  ;;  %v8658_v63 = vld [vmem:[#allocation14 + $0x72c] sm:$0xf0]  ;;  %v10166_v47 = vld [vmem:[#allocation14 + $0x944] sm:$0xf] }
 0x37f   :  { %6163 = vmatmul.bf16.vlgmr.msra.gmra.mxu2 %v10799_v6  ;;  %6221 = vmatpush.bf16.msrb.mxu3 %v9053_v9  ;;  %v8661_v37 = vor.u32 %v10096_v62, %v8658_v63  ;;  %v9384_v9 = vld [vmem:[#allocation14 + $0xcc0] sm:$0xf]  ;;  %v8630_v62 = vld [vmem:[#allocation14 + $0x6f4] sm:$0xf0]  ;;  %v9218_v46 = vld [vmem:[#allocation14 + $0xb8c] sm:$0xf0] }
 0x380   :  { %6207 = vmatpush.bf16.msrb.mxu2 %v8857_v32  ;;  %v8742_v32 = vld [vmem:[#allocation14 + $0x7d4] sm:$0xf0] }
 0x381   :  { %v8745_v10 = vor.u32 %v10117_v11, %v8742_v32  ;;  %6098 = vmatmul.bf16.vlgmr.msrb.gmra.mxu1 %v10806_v41  ;;  %v10281_v11 = vld [vmem:[#allocation14 + $0xcd8] sm:$0xf0] }
 0x382   :  { %6142 = vmatpush.bf16.msra.mxu1 %v9525_v2  ;;  %6182 = vmatpush.bf16.msrb.mxu0 %v8381_v12  ;;  %v5956_v40 = vpop.f32.mrf.mxu2  ;;  %v8938_v2 = vld [vmem:[#allocation14 + $0x95c] sm:$0xf0]  ;;  %v9385_v23 = vor.u32 %v10281_v11, %v9384_v9  ;;  %v10250_v11 = vld [vmem:[#allocation14 + $0xbe4] sm:$0xf] }
 0x383   :  { %6222 = vmatpush.bf16.msrb.mxu3 %v9025_v22  ;;  %v5957_v32 = vadd.f32 %v5956_v40, %v3320_v56  ;;  %v8941_v15 = vor.u32 %v10166_v47, %v8938_v2  ;;  %v10257_v56 = vld [vmem:[#allocation14 + $0xc1c] sm:$0xf]  ;;  %v7880_v2 = vld [vmem:[#allocation14 + $0xf8] sm:$0xf] }
 0x384   :  { %6208 = vmatpush.bf16.msrb.mxu2 %v8829_v53  ;;  %v8353_v53 = vor.u32 %v10019_v17, %v8350_v52  ;;  %v5969_v17 = vpop.f32.mrf.mxu3  ;;  %v5893_v38 = vpop.f32.mrf.mxu1 }
 0x385   :  { %v10917_v22 = vadd.f32 %v5969_v17, %v5957_v32  ;;  %v9274_v32 = vld [vmem:[#allocation14 + $0xbfc] sm:$0xf0]  ;;  %v9960_v38 = vld [vmem:[#allocation14 + $0x2d0] sm:$0xf0] }
 0x386   :  { %6143 = vmatpush.bf16.msra.mxu1 %v9497_v44  ;;  %6183 = vmatpush.bf16.msrb.mxu0 %v8353_v53  ;;  %v10159_v44 = vld [vmem:[#allocation14 + $0x90c] sm:$0xf]  ;;  %v8238_v53 = vld [vmem:[#allocation14 + $0x3e4] sm:$0xf0]  ;;  %v9277_v19 = vor.u32 %v10250_v11, %v9274_v32  ;;  %v8860_v11 = vld [vmem:[#allocation14 + $0x8a0] sm:$0xf] }
 0x387   :  { %6223 = vmatpush.bf16.msrb.mxu3 %v8997_v45  ;;  %v8241_v40 = vor.u32 %v9991_v25, %v8238_v53  ;;  %v9328_v45 = vld [vmem:[#allocation14 + $0xc50] sm:$0xf]  ;;  %v9246_v25 = vld [vmem:[#allocation14 + $0xbc4] sm:$0xf0]  ;;  %v10075_v53 = vld [vmem:[#allocation14 + $0x66c] sm:$0xf] }
 0x388   :  { %6209 = vmatpush.bf16.msrb.mxu2 %v8801_v54  ;;  %v8294_v54 = vld [vmem:[#allocation14 + $0x454] sm:$0xf0]  ;;  %v10149_v32 = vld [vmem:[#allocation14 + $0x8b8] sm:$0xf0] }
 0x389   :  { %v8297_v0 = vor.u32 %v10005_v29, %v8294_v54  ;;  %v9981_v29 = vld [vmem:[#allocation14 + $0x378] sm:$0xf0]  ;;  %v10267_v54 = vld [vmem:[#allocation14 + $0xc68] sm:$0xf0] }
 0x38a   :  { %6144 = vmatpush.bf16.msra.mxu1 %v9469_v33  ;;  %6184 = vmatpush.bf16.msrb.mxu0 %v8325_v48  ;;  %v5958_v12 = vpop.f32.mrf.mxu2  ;;  %v5932_v33 = vpop.f32.mrf.mxu0  ;;  %v9911_v48 = vld [vmem:[#allocation14 + $0x148] sm:$0xf0]  ;;  %v9329_v4 = vor.u32 %v10267_v54, %v9328_v45  ;;  %v10236_v45 = vld [vmem:[#allocation14 + $0xb74] sm:$0xf] }
 0x38b   :  { %6224 = vmatpush.bf16.msrb.mxu3 %v8969_v35  ;;  %v7909_v61 = vor.u32 %v9911_v48, %v7908_v60  ;;  %v10089_v35 = vld [vmem:[#allocation14 + $0x6dc] sm:$0xf]  ;;  %v7881_v12 = vor.u32 %v9904_v3, %v7880_v2  ;;  %v10068_v48 = vld [vmem:[#allocation14 + $0x634] sm:$0xf]  ;;  %v9883_v54 = vld [vmem:[#allocation14 + $0x68] sm:$0xf0] }
 0x38c   :  { %6210 = vmatpush.bf16.msrb.mxu2 %v8773_v31  ;;  %v9998_v31 = vld [vmem:[#allocation14 + $0x404] sm:$0xf]  ;;  %v5971_v63 = vpop.f32.mrf.mxu3  ;;  %v8633_v9 = vor.u32 %v10089_v35, %v8630_v62  ;;  %v10229_v35 = vld [vmem:[#allocation14 + $0xb3c] sm:$0xf]  ;;  %v9190_v62 = vld [vmem:[#allocation14 + $0xb54] sm:$0xf0] }
 0x38d   :  { %v8269_v52 = vor.u32 %v9998_v31, %v8266_v42  ;;  %v8160_v31 = vld [vmem:[#allocation14 + $0x328] sm:$0xf]  ;;  %v9974_v42 = vld [vmem:[#allocation14 + $0x340] sm:$0xf0] }
 0x38e   :  { %6145 = vmatpush.bf16.msra.mxu1 %v9441_v43  ;;  %6185 = vmatpush.bf16.msrb.mxu0 %v8297_v0  ;;  %v8188_v43 = vld [vmem:[#allocation14 + $0x360] sm:$0xf]  ;;  %v8161_v17 = vor.u32 %v9974_v42, %v8160_v31  ;;  %v8048_v31 = vld [vmem:[#allocation14 + $0x248] sm:$0xf] }
 0x38f   :  { %6225 = vmatpush.bf16.msrb.mxu3 %v8941_v15  ;;  %v8189_v0 = vor.u32 %v9981_v29, %v8188_v43  ;;  %v10082_v15 = vld [vmem:[#allocation14 + $0x6a4] sm:$0xf]  ;;  %v8105_v43 = vor.u32 %v9960_v38, %v8104_v14  ;;  %v7796_v29 = vld [vmem:[#allocation14 + $0x50] sm:$0xf] }
 0x390   :  { %6211 = vmatpush.bf16.msrb.mxu2 %v8745_v10  ;;  %v8910_v10 = vld [vmem:[#allocation14 + $0x924] sm:$0xf0]  ;;  %v7797_v63 = vor.u32 %v9883_v54, %v7796_v29  ;;  %v10135_v29 = vld [vmem:[#allocation14 + $0x848] sm:$0xf0] }
 0x391   :  { %v8913_v36 = vor.u32 %v10159_v44, %v8910_v10  ;;  %v9897_v10 = vld [vmem:[#allocation14 + $0xd8] sm:$0xf0] }
 0x392   :  { %6146 = vmatpush.bf16.msra.mxu1 %v9413_v39  ;;  %6186 = vmatpush.bf16.msrb.mxu0 %v8269_v52  ;;  %v7852_v52 = vld [vmem:[#allocation14 + $0xc0] sm:$0xf] }
 0x393   :  { %6226 = vmatpush.bf16.msrb.mxu3 %v8913_v36  ;;  %v7824_v36 = vld [vmem:[#allocation14 + $0x88] sm:$0xf] }
 0x394   :  { %6212 = vmatpush.bf16.msrb.mxu2 %v8717_v30  ;;  %v9984_v30 = vld [vmem:[#allocation14 + $0x394] sm:$0xf] }
 0x395   :  { %v8213_v47 = vor.u32 %v9984_v30, %v8210_v50 }
 0x396   :  { %6147 = vmatpush.bf16.msra.mxu1 %v9385_v23  ;;  %6187 = vmatpush.bf16.msrb.mxu0 %v8241_v40  ;;  %v10243_v23 = vld [vmem:[#allocation14 + $0xbac] sm:$0xf]  ;;  %v8577_v40 = vor.u32 %v10075_v53, %v8574_v27  ;;  %v10142_v53 = vld [vmem:[#allocation14 + $0x880] sm:$0xf0] }
 0x397   :  { %6227 = vmatpush.bf16.msrb.mxu3 %v8885_v57  ;;  %v9249_v30 = vor.u32 %v10243_v23, %v9246_v25  ;;  %v9953_v57 = vld [vmem:[#allocation14 + $0x298] sm:$0xf0]  ;;  %v9939_v25 = vld [vmem:[#allocation14 + $0x228] sm:$0xf0] }
 0x398   :  { %6213 = vmatpush.bf16.msrb.mxu2 %v8689_v51  ;;  %v9302_v51 = vld [vmem:[#allocation14 + $0xc34] sm:$0xf0] }
 0x399   :  { %v9305_v39 = vor.u32 %v10257_v56, %v9302_v51  ;;  %v9221_v56 = vor.u32 %v10236_v45, %v9218_v46  ;;  %v8076_v51 = vld [vmem:[#allocation14 + $0x280] sm:$0xf]  ;;  %v7992_v45 = vld [vmem:[#allocation14 + $0x1d8] sm:$0xf] }
 0x39a   :  { %6148 = vmatpush.bf16.msra.mxu1 %v9357_v49  ;;  %6188 = vmatpush.bf16.msrb.mxu0 %v8213_v47  ;;  %v8546_v49 = vld [vmem:[#allocation14 + $0x64c] sm:$0xf0]  ;;  %v10061_v47 = vld [vmem:[#allocation14 + $0x5fc] sm:$0xf]  ;;  %v10931_v2 = vpop.f32.mrf.mxu0  ;;  %v8077_v3 = vor.u32 %v9953_v57, %v8076_v51  ;;  %v5943_v42 = vpop.f32.mrf.mxu1  ;;  %v9084_v57 = vld [vmem:[#allocation14 + $0xa60] sm:$0xf] }
 0x39b   :  { %6272 = vmatpush.bf16.msra.mxu3 %v8189_v0  ;;  %v8518_v0 = vld [vmem:[#allocation14 + $0x614] sm:$0xf0]  ;;  %v9106_v51 = vld [vmem:[#allocation14 + $0xaac] sm:$0xf0] }
 0x39c   :  { %6214 = vmatpush.bf16.msrb.mxu2 %v8661_v37  ;;  %v5879_v37 = vadd.f32 %v10903_v5, %v10889_v7  ;;  %v9967_v7 = vld [vmem:[#allocation14 + $0x308] sm:$0xf0]  ;;  %6228 = vmatmul.bf16.vlgmr.msrb.gmra.mxu3 %v10824_v26 }
 0x39d   :  { %6189 = vmatmul.bf16.vlgmr.msrb.gmra.mxu0 %v10810_v18  ;;  %v8133_v33 = vor.u32 %v9967_v7, %v8132_v21  ;;  %v8861_v21 = vor.u32 %v10149_v32, %v8860_v11  ;;  %v8020_v7 = vld [vmem:[#allocation14 + $0x210] sm:$0xf]  ;;  %v10198_v11 = vld [vmem:[#allocation14 + $0xa40] sm:$0xf0] }
 0x39e   :  { %v5892_v44 = vadd.f32 %v10915_v58, %v5879_v37  ;;  %6149 = vmatpush.bf16.msra.mxu1 %v9329_v4  ;;  %6233 = vmatpush.bf16.msra.mxu0 %v9305_v39  ;;  %v7853_v58 = vor.u32 %v9897_v10, %v7852_v52  ;;  %v7768_v4 = vld [vmem:[#allocation14 + $0x18] sm:$0xf]  ;;  %v9876_v39 = vld [vmem:[#allocation14 + $0x30] sm:$0xf0]  ;;  %v9193_v37 = vor.u32 %v10229_v35, %v9190_v62  ;;  %v8490_v52 = vld [vmem:[#allocation14 + $0x5dc] sm:$0xf0] }
 0x39f   :  { %6215 = vmatmul.bf16.vlgmr.msrb.gmra.mxu2 %v10814_v55  ;;  %6273 = vmatpush.bf16.msra.mxu3 %v8161_v17  ;;  %v10054_v17 = vld [vmem:[#allocation14 + $0x5c4] sm:$0xf]  ;;  %v8021_v14 = vor.u32 %v9939_v25, %v8020_v7  ;;  %v8412_v35 = vld [vmem:[#allocation14 + $0x520] sm:$0xf]  ;;  %v10037_v62 = vld [vmem:[#allocation14 + $0x538] sm:$0xf0] }
 0x3a0   :  { %6259 = vmatpush.bf16.msra.mxu2 %v7965_v16  ;;  %v8602_v16 = vld [vmem:[#allocation14 + $0x6bc] sm:$0xf0]  ;;  %v5905_v28 = vadd.f32 %v10900_v8, %v5892_v44  ;;  %v8493_v27 = vor.u32 %v10054_v17, %v8490_v52  ;;  %v10191_v7 = vld [vmem:[#allocation14 + $0xa08] sm:$0xf0]  ;;  %v8356_v25 = vld [vmem:[#allocation14 + $0x4b0] sm:$0xf] }
 0x3a1   :  { %v8605_v5 = vor.u32 %v10082_v15, %v8602_v16  ;;  %6150 = vmatmul.bf16.vlgmr.msra.gmra.mxu1 %v10840_v1  ;;  %v8521_v15 = vor.u32 %v10061_v47, %v8518_v0  ;;  %v10222_v16 = vld [vmem:[#allocation14 + $0xb04] sm:$0xf]  ;;  %v9162_v44 = vld [vmem:[#allocation14 + $0xb1c] sm:$0xf0]  ;;  %v10313_v0 = vld [vmem:[#allocation14 + $0xddc] sm:$0xf] }
 0x3a2   :  { %6194 = vmatpush.bf16.msrb.mxu1 %v8633_v9  ;;  %6234 = vmatpush.bf16.msra.mxu0 %v9277_v19  ;;  %v5918_v8 = vadd.f32 %v10906_v13, %v5905_v28  ;;  %v10928_v50 = vpop.f32.mrf.mxu2  ;;  %v9946_v9 = vld [vmem:[#allocation14 + $0x260] sm:$0xf0]  ;;  %v9165_v23 = vor.u32 %v10222_v16, %v9162_v44  ;;  %v10215_v28 = vld [vmem:[#allocation14 + $0xacc] sm:$0xf]  ;;  %v5945_v46 = vpop.f32.mrf.mxu1  ;;  %v8748_v52 = vld [vmem:[#allocation14 + $0x7c0] sm:$0xf] }
 0x3a3   :  { %6274 = vmatpush.bf16.msra.mxu3 %v8133_v33  ;;  %v8049_v19 = vor.u32 %v9946_v9, %v8048_v31  ;;  %v9134_v33 = vld [vmem:[#allocation14 + $0xae4] sm:$0xf0]  ;;  %v8776_v31 = vld [vmem:[#allocation14 + $0x7f8] sm:$0xf]  ;;  %v10306_v44 = vld [vmem:[#allocation14 + $0xda4] sm:$0xf] }
 0x3a4   :  { %6260 = vmatpush.bf16.msra.mxu2 %v7937_v24  ;;  %v9890_v24 = vld [vmem:[#allocation14 + $0xa0] sm:$0xf0]  ;;  %v5931_v13 = vadd.f32 %v10913_v59, %v5918_v8  ;;  %v7769_v59 = vor.u32 %v9876_v39, %v7768_v4  ;;  %v9932_v8 = vld [vmem:[#allocation14 + $0x1f0] sm:$0xf0]  ;;  %v9056_v9 = vld [vmem:[#allocation14 + $0xa28] sm:$0xf] }
 0x3a5   :  { %v7825_v60 = vor.u32 %v9890_v24, %v7824_v36  ;;  %v10047_v36 = vld [vmem:[#allocation14 + $0x58c] sm:$0xf]  ;;  %v8462_v24 = vld [vmem:[#allocation14 + $0x5a4] sm:$0xf0]  ;;  %v9057_v17 = vor.u32 %v10198_v11, %v9056_v9  ;;  %v10170_v9 = vld [vmem:[#allocation14 + $0x960] sm:$0xf0] }
 0x3a6   :  { %6195 = vmatpush.bf16.msrb.mxu1 %v8605_v5  ;;  %6235 = vmatpush.bf16.msra.mxu0 %v9249_v30  ;;  %v10933_v5 = vpop.f32.mrf.mxu3  ;;  %v5984_v30 = vpop.f32.mrf.mxu0 }
 0x3a7   :  { %6275 = vmatpush.bf16.msra.mxu3 %v8105_v43  ;;  %v8804_v43 = vld [vmem:[#allocation14 + $0x830] sm:$0xf] }
 0x3a8   :  { %6261 = vmatpush.bf16.msra.mxu2 %v7909_v61  ;;  %v8549_v61 = vor.u32 %v10068_v48, %v8546_v49  ;;  %v10040_v48 = vld [vmem:[#allocation14 + $0x554] sm:$0xf]  ;;  %v8434_v49 = vld [vmem:[#allocation14 + $0x56c] sm:$0xf0]  ;;  %v8805_v47 = vor.u32 %v10135_v29, %v8804_v43  ;;  %v10107_v29 = vld [vmem:[#allocation14 + $0x768] sm:$0xf0] }
 0x3a9   :  { %v8692_v43 = vld [vmem:[#allocation14 + $0x750] sm:$0xf] }
 0x3aa   :  { %6196 = vmatpush.bf16.msrb.mxu1 %v8577_v40  ;;  %6236 = vmatpush.bf16.msra.mxu0 %v9221_v56  ;;  %v6010_v10 = vpop.f32.mrf.mxu2  ;;  %v10208_v40 = vld [vmem:[#allocation14 + $0xa94] sm:$0xf]  ;;  %v8465_v56 = vor.u32 %v10047_v36, %v8462_v24  ;;  %v8720_v36 = vld [vmem:[#allocation14 + $0x788] sm:$0xf]  ;;  %v10114_v24 = vld [vmem:[#allocation14 + $0x7a0] sm:$0xf0] }
 0x3ab   :  { %6276 = vmatpush.bf16.msra.mxu3 %v8077_v3  ;;  %v9109_v4 = vor.u32 %v10208_v40, %v9106_v51  ;;  %v10121_v10 = vld [vmem:[#allocation14 + $0x7d8] sm:$0xf0]  ;;  %v8328_v40 = vld [vmem:[#allocation14 + $0x478] sm:$0xf]  ;;  %v8721_v46 = vor.u32 %v10114_v24, %v8720_v36 }
 0x3ac   :  { %6262 = vmatpush.bf16.msra.mxu2 %v7881_v12  ;;  %v5944_v12 = vadd.f32 %v5943_v42, %v5931_v13  ;;  %v9526_v13 = vld [vmem:[#allocation14 + $0xdf4] sm:$0xf0]  ;;  %v10128_v42 = vld [vmem:[#allocation14 + $0x810] sm:$0xf0]  ;;  %v10177_v51 = vld [vmem:[#allocation14 + $0x998] sm:$0xf0] }
 0x3ad   :  { %v9529_v32 = vor.u32 %v10313_v0, %v9526_v13  ;;  %v8777_v16 = vor.u32 %v10128_v42, %v8776_v31  ;;  %v10939_v0 = vld [vmem:[#allocation16] sm:$0xff]  ;;  %v10100_v31 = vld [vmem:[#allocation14 + $0x730] sm:$0xf0] }
 0x3ae   :  { %6197 = vmatpush.bf16.msrb.mxu1 %v8549_v61  ;;  %10340 = vtanh.f32 %v5944_v12  ;;  %6237 = vmatpush.bf16.msra.mxu0 %v9193_v37  ;;  %v10205_v61 = vld [vmem:[#allocation14 + $0xa78] sm:$0xf0]  ;;  %v6023_v3 = vpop.f32.mrf.mxu3  ;;  %v8413_v37 = vor.u32 %v10037_v62, %v8412_v35  ;;  %v8384_v12 = vld [vmem:[#allocation14 + $0x4e8] sm:$0xf]  ;;  %v8693_v62 = vor.u32 %v10107_v29, %v8692_v43  ;;  %v3321_v13 = vperm.slane %v10939_v0, 4 }
 0x3af   :  { %6277 = vmatpush.bf16.msra.mxu3 %v8049_v19  ;;  %v9085_v39 = vor.u32 %v10205_v61, %v9084_v57  ;;  %v8300_v61 = vld [vmem:[#allocation14 + $0x440] sm:$0xf]  ;;  %v10009_v35 = vld [vmem:[#allocation14 + $0x458] sm:$0xf0] }
 0x3b0   :  { %6263 = vmatpush.bf16.msra.mxu2 %v7853_v58  ;;  %v8832_v58 = vld [vmem:[#allocation14 + $0x868] sm:$0xf]  ;;  %v8636_v43 = vld [vmem:[#allocation14 + $0x6e0] sm:$0xf]  ;;  %v10093_v29 = vld [vmem:[#allocation14 + $0x6f8] sm:$0xf0] }
 0x3b1   :  { %v8833_v38 = vor.u32 %v10142_v53, %v8832_v58  ;;  %v10023_v58 = vld [vmem:[#allocation14 + $0x4c8] sm:$0xf0]  ;;  %v8749_v53 = vor.u32 %v10121_v10, %v8748_v52 }
 0x3b2   :  { %6198 = vmatpush.bf16.msrb.mxu1 %v8521_v15  ;;  %6238 = vmatpush.bf16.msra.mxu0 %v9165_v23  ;;  %v10030_v15 = vld [vmem:[#allocation14 + $0x500] sm:$0xf0]  ;;  %v8357_v30 = vor.u32 %v10023_v58, %v8356_v25  ;;  %v8244_v58 = vld [vmem:[#allocation14 + $0x3d0] sm:$0xf] }
 0x3b3   :  { %6278 = vmatpush.bf16.msra.mxu3 %v8021_v14  ;;  %v8385_v19 = vor.u32 %v10030_v15, %v8384_v12  ;;  %v9000_v14 = vld [vmem:[#allocation14 + $0x9b8] sm:$0xf]  ;;  %v10002_v12 = vld [vmem:[#allocation14 + $0x420] sm:$0xf0] }
 0x3b4   :  { %6264 = vmatpush.bf16.msra.mxu2 %v7825_v60  ;;  %v9137_v60 = vor.u32 %v10215_v28, %v9134_v33  ;;  %v10341_v54 = vpop.eup %10340  ;;  %v9470_v28 = vld [vmem:[#allocation14 + $0xd84] sm:$0xf0] }
 0x3b5   :  { %6372 = vst [vmem:[#allocation17 + $0x10] sm:$0xff] %v10341_v54 }
 0x3b6   :  { %6199 = vmatpush.bf16.msrb.mxu1 %v8493_v27  ;;  %6239 = vmatpush.bf16.msra.mxu0 %v9137_v60  ;;  %v10299_v27 = vld [vmem:[#allocation14 + $0xd6c] sm:$0xf]  ;;  %v10292_v60 = vld [vmem:[#allocation14 + $0xd34] sm:$0xf] }
 0x3b8   :  { %6265 = vmatpush.bf16.msra.mxu2 %v7797_v63  ;;  %v7993_v63 = vor.u32 %v9932_v8, %v7992_v45  ;;  %v10016_v45 = vld [vmem:[#allocation14 + $0x490] sm:$0xf0] }
 0x3b9   :  { %v8329_v54 = vor.u32 %v10016_v45, %v8328_v40  ;;  %v10264_v40 = vld [vmem:[#allocation14 + $0xc54] sm:$0xf]  ;;  %v8216_v45 = vld [vmem:[#allocation14 + $0x398] sm:$0xf] }
 0x3ba   :  { %6200 = vmatpush.bf16.msrb.mxu1 %v8465_v56  ;;  %6279 = vmatpush.bf16.msra.mxu3 %v7993_v63  ;;  %v8972_v56 = vld [vmem:[#allocation14 + $0x980] sm:$0xf]  ;;  %v10285_v63 = vld [vmem:[#allocation14 + $0xcfc] sm:$0xf]  ;;  %v10942_v3 = vpop.f32.mrf.mxu0  ;;  %v10944_v42 = vpop.f32.mrf.mxu1 }
 0x3bb   :  { %6240 = vmatpush.bf16.msra.mxu0 %v9109_v4  ;;  %v8973_v4 = vor.u32 %v10177_v51, %v8972_v56 }
 0x3bc   :  { %6266 = vmatpush.bf16.msra.mxu2 %v7769_v59  ;;  %v9498_v59 = vld [vmem:[#allocation14 + $0xdbc] sm:$0xf0] }
 0x3bd   :  { %6280 = vmatmul.bf16.vlgmr.msra.gmra.mxu3 %v10795_v34  ;;  %v9501_v23 = vor.u32 %v10306_v44, %v9498_v59  ;;  %v9473_v34 = vor.u32 %v10299_v27, %v9470_v28  ;;  %v9386_v44 = vld [vmem:[#allocation14 + $0xcdc] sm:$0xf0]  ;;  %v10271_v27 = vld [vmem:[#allocation14 + $0xc8c] sm:$0xf]  ;;  %v9358_v28 = vld [vmem:[#allocation14 + $0xca4] sm:$0xf0] }
 0x3be   :  { %6324 = vmatpush.bf16.msrb.mxu3 %v9085_v39  ;;  %6241 = vmatmul.bf16.vlgmr.msra.gmra.mxu0 %v10833_v20  ;;  %v8664_v39 = vld [vmem:[#allocation14 + $0x718] sm:$0xf] }
 0x3bf   :  { %6267 = vmatmul.bf16.vlgmr.msra.gmra.mxu2 %v10799_v6  ;;  %v8437_v6 = vor.u32 %v10040_v48, %v8434_v49  ;;  %6285 = vmatpush.bf16.msrb.mxu0 %v8413_v37  ;;  %v9442_v48 = vld [vmem:[#allocation14 + $0xd4c] sm:$0xf0]  ;;  %v8944_v37 = vld [vmem:[#allocation14 + $0x948] sm:$0xf]  ;;  %v8665_v15 = vor.u32 %v10100_v31, %v8664_v39  ;;  %v6073_v10 = vpop.f32.mrf.mxu3 }
 0x3c0   :  { %6311 = vmatpush.bf16.msrb.mxu2 %v8861_v21  ;;  %v9028_v21 = vld [vmem:[#allocation14 + $0x9f0] sm:$0xf]  ;;  %v9445_v57 = vor.u32 %v10292_v60, %v9442_v48  ;;  %v8945_v52 = vor.u32 %v10170_v9, %v8944_v37  ;;  %v9308_v48 = vld [vmem:[#allocation14 + $0xc20] sm:$0xf] }
 0x3c1   :  { %6201 = vmatpush.bf16.msrb.mxu1 %v8437_v6  ;;  %v9029_v33 = vor.u32 %v10191_v7, %v9028_v21  ;;  %v8301_v6 = vor.u32 %v10009_v35, %v8300_v61  ;;  %v8916_v21 = vld [vmem:[#allocation14 + $0x910] sm:$0xf]  ;;  %v10163_v7 = vld [vmem:[#allocation14 + $0x928] sm:$0xf0]  ;;  %v8637_v61 = vor.u32 %v10093_v29, %v8636_v43  ;;  %v9280_v35 = vld [vmem:[#allocation14 + $0xbe8] sm:$0xf] }
 0x3c2   :  { %6325 = vmatpush.bf16.msrb.mxu3 %v9057_v17  ;;  %v6060_v49 = vpop.f32.mrf.mxu2  ;;  %v8917_v36 = vor.u32 %v10163_v7, %v8916_v21  ;;  %v5997_v24 = vpop.f32.mrf.mxu1  ;;  %v9330_v60 = vld [vmem:[#allocation14 + $0xc6c] sm:$0xf0]  ;;  %v8440_v43 = vld [vmem:[#allocation14 + $0x558] sm:$0xf]  ;;  %v10044_v29 = vld [vmem:[#allocation14 + $0x570] sm:$0xf0] }
 0x3c3   :  { %6286 = vmatpush.bf16.msrb.mxu0 %v8385_v19  ;;  %v6061_v59 = vadd.f32 %v6060_v49, %v3321_v13  ;;  %v10261_v49 = vld [vmem:[#allocation14 + $0xc38] sm:$0xf0]  ;;  %v9333_v51 = vor.u32 %v10264_v40, %v9330_v60  ;;  %v9252_v31 = vld [vmem:[#allocation14 + $0xbb0] sm:$0xf] }
 0x3c4   :  { %6312 = vmatpush.bf16.msrb.mxu2 %v8833_v38  ;;  %6202 = vmatmul.bf16.vlgmr.msrb.gmra.mxu1 %v10806_v41  ;;  %v10184_v38 = vld [vmem:[#allocation14 + $0x9d0] sm:$0xf0] }
 0x3c5   :  { %6246 = vmatpush.bf16.msra.mxu1 %v9529_v32  ;;  %v9001_v8 = vor.u32 %v10184_v38, %v9000_v14  ;;  %v8272_v32 = vld [vmem:[#allocation14 + $0x408] sm:$0xf]  ;;  %v8888_v14 = vld [vmem:[#allocation14 + $0x8d8] sm:$0xf]  ;;  %v10156_v38 = vld [vmem:[#allocation14 + $0x8f0] sm:$0xf0] }
 0x3c6   :  { %6326 = vmatpush.bf16.msrb.mxu3 %v9029_v33  ;;  %v8273_v19 = vor.u32 %v10002_v12, %v8272_v32  ;;  %v6036_v33 = vpop.f32.mrf.mxu0  ;;  %v10240_v32 = vld [vmem:[#allocation14 + $0xb90] sm:$0xf0]  ;;  %v8552_v12 = vld [vmem:[#allocation14 + $0x638] sm:$0xf] }
 0x3c7   :  { %6287 = vmatpush.bf16.msrb.mxu0 %v8357_v30 }
 0x3c8   :  { %6313 = vmatpush.bf16.msrb.mxu2 %v8805_v47  ;;  %v9414_v47 = vld [vmem:[#allocation14 + $0xd14] sm:$0xf0] }
 0x3c9   :  { %6247 = vmatpush.bf16.msra.mxu1 %v9501_v23  ;;  %v9417_v11 = vor.u32 %v10285_v63, %v9414_v47  ;;  %v10946_v23 = vadd.f32 %v6073_v10, %v6061_v59  ;;  %v8608_v63 = vld [vmem:[#allocation14 + $0x6a8] sm:$0xf]  ;;  %v10086_v47 = vld [vmem:[#allocation14 + $0x6c0] sm:$0xf0]  ;;  %v9196_v59 = vld [vmem:[#allocation14 + $0xb40] sm:$0xf] }
 0x3ca   :  { %6327 = vmatpush.bf16.msrb.mxu3 %v9001_v8  ;;  %v6062_v17 = vpop.f32.mrf.mxu2  ;;  %v8889_v8 = vor.u32 %v10156_v38, %v8888_v14  ;;  %v8609_v39 = vor.u32 %v10086_v47, %v8608_v63  ;;  %v10219_v14 = vld [vmem:[#allocation14 + $0xae8] sm:$0xf0]  ;;  %v8468_v38 = vld [vmem:[#allocation14 + $0x590] sm:$0xf] }
 0x3cb   :  { %6288 = vmatpush.bf16.msrb.mxu0 %v8329_v54  ;;  %v6075_v54 = vpop.f32.mrf.mxu3  ;;  %v8524_v17 = vld [vmem:[#allocation14 + $0x600] sm:$0xf]  ;;  %v9476_v47 = vld [vmem:[#allocation14 + $0xd70] sm:$0xf] }
 0x3cc   :  { %6314 = vmatpush.bf16.msrb.mxu2 %v8777_v16  ;;  %v10278_v16 = vld [vmem:[#allocation14 + $0xcc4] sm:$0xf]  ;;  %v9532_v54 = vld [vmem:[#allocation14 + $0xde0] sm:$0xf] }
 0x3cd   :  { %6248 = vmatpush.bf16.msra.mxu1 %v9473_v34  ;;  %v9389_v25 = vor.u32 %v10278_v16, %v9386_v44  ;;  %v9361_v34 = vor.u32 %v10271_v27, %v9358_v28  ;;  %v8496_v27 = vld [vmem:[#allocation14 + $0x5c8] sm:$0xf]  ;;  %v10058_v28 = vld [vmem:[#allocation14 + $0x5e0] sm:$0xf0] }
 0x3ce   :  { %6328 = vmatpush.bf16.msrb.mxu3 %v8973_v4 }
 0x3cf   :  { %6289 = vmatpush.bf16.msrb.mxu0 %v8301_v6  ;;  %v10247_v6 = vld [vmem:[#allocation14 + $0xbc8] sm:$0xf0] }
 0x3d0   :  { %6315 = vmatpush.bf16.msrb.mxu2 %v8749_v53  ;;  %v9995_v53 = vld [vmem:[#allocation14 + $0x3e8] sm:$0xf0] }
 0x3d1   :  { %6249 = vmatpush.bf16.msra.mxu1 %v9445_v57  ;;  %v8245_v30 = vor.u32 %v9995_v53, %v8244_v58  ;;  %v9309_v57 = vor.u32 %v10261_v49, %v9308_v48  ;;  %v9168_v58 = vld [vmem:[#allocation14 + $0xb08] sm:$0xf]  ;;  %v10226_v53 = vld [vmem:[#allocation14 + $0xb20] sm:$0xf0]  ;;  %v9112_v49 = vld [vmem:[#allocation14 + $0xa98] sm:$0xf] }
 0x3d2   :  { %6329 = vmatpush.bf16.msrb.mxu3 %v8945_v52  ;;  %v10065_v52 = vld [vmem:[#allocation14 + $0x618] sm:$0xf0]  ;;  %v9169_v24 = vor.u32 %v10226_v53, %v9168_v58 }
 0x3d3   :  { %6290 = vmatpush.bf16.msrb.mxu0 %v8273_v19 }
 0x3d4   :  { %6316 = vmatpush.bf16.msrb.mxu2 %v8721_v46  ;;  %v9988_v46 = vld [vmem:[#allocation14 + $0x3b0] sm:$0xf0] }
 0x3d5   :  { %6250 = vmatpush.bf16.msra.mxu1 %v9417_v11  ;;  %v8217_v56 = vor.u32 %v9988_v46, %v8216_v45  ;;  %v9224_v11 = vld [vmem:[#allocation14 + $0xb78] sm:$0xf] }
 0x3d6   :  { %6330 = vmatpush.bf16.msrb.mxu3 %v8917_v36 }
 0x3d7   :  { %6291 = vmatpush.bf16.msrb.mxu0 %v8245_v30  ;;  %v9140_v30 = vld [vmem:[#allocation14 + $0xad0] sm:$0xf] }
 0x3d8   :  { %6317 = vmatpush.bf16.msrb.mxu2 %v8693_v62  ;;  %v10254_v62 = vld [vmem:[#allocation14 + $0xc00] sm:$0xf0]  ;;  %v9141_v46 = vor.u32 %v10219_v14, %v9140_v30 }
 0x3d9   :  { %6251 = vmatpush.bf16.msra.mxu1 %v9389_v25  ;;  %v9281_v4 = vor.u32 %v10254_v62, %v9280_v35  ;;  %v9504_v35 = vld [vmem:[#allocation14 + $0xda8] sm:$0xf]  ;;  %v10310_v62 = vld [vmem:[#allocation14 + $0xdc0] sm:$0xf0] }
 0x3da   :  { %6331 = vmatpush.bf16.msrb.mxu3 %v8889_v8  ;;  %v10960_v19 = vpop.f32.mrf.mxu0  ;;  %v6047_v21 = vpop.f32.mrf.mxu1  ;;  %v10212_v8 = vld [vmem:[#allocation14 + $0xab0] sm:$0xf0]  ;;  %v9505_v63 = vor.u32 %v10310_v62, %v9504_v35 }
 0x3db   :  { %6292 = vmatpush.bf16.msrb.mxu0 %v8217_v56  ;;  %v10317_v56 = vld [vmem:[#allocation14 + $0xdf8] sm:$0xf0]  ;;  %v6087_v58 = vadd.f32 %v10960_v19, %v10946_v23 }
 0x3dc   :  { %6318 = vmatpush.bf16.msrb.mxu2 %v8665_v15  ;;  %v10072_v15 = vld [vmem:[#allocation14 + $0x650] sm:$0xf0] }
 0x3dd   :  { %6252 = vmatpush.bf16.msra.mxu1 %v9361_v34  ;;  %6332 = vmatmul.bf16.vlgmr.msrb.gmra.mxu3 %v10824_v26  ;;  %v8553_v44 = vor.u32 %v10072_v15, %v8552_v12  ;;  %v10051_v34 = vld [vmem:[#allocation14 + $0x5a8] sm:$0xf0]  ;;  %v10282_v12 = vld [vmem:[#allocation14 + $0xce0] sm:$0xf0] }
 0x3de   :  { %6293 = vmatmul.bf16.vlgmr.msrb.gmra.mxu0 %v10810_v18  ;;  %v9225_v18 = vor.u32 %v10240_v32, %v9224_v11  ;;  %v8469_v48 = vor.u32 %v10051_v34, %v8468_v38 }
 0x3df   :  { %6319 = vmatmul.bf16.vlgmr.msrb.gmra.mxu2 %v10814_v55  ;;  %v5983_v55 = vadd.f32 %v10931_v2, %v10917_v22  ;;  %6337 = vmatpush.bf16.msra.mxu0 %v9309_v57  ;;  %v8580_v22 = vld [vmem:[#allocation14 + $0x670] sm:$0xf]  ;;  %v10079_v2 = vld [vmem:[#allocation14 + $0x688] sm:$0xf0]  ;;  %v10962_v36 = vpop.f32.mrf.mxu3  ;;  %v9113_v57 = vor.u32 %v10212_v8, %v9112_v49 }
 0x3e0   :  { %v8581_v9 = vor.u32 %v10079_v2, %v8580_v22  ;;  %v9420_v2 = vld [vmem:[#allocation14 + $0xd00] sm:$0xf] }
 0x3e1   :  { %v5996_v13 = vadd.f32 %v10944_v42, %v5983_v55  ;;  %6253 = vmatpush.bf16.msra.mxu1 %v9333_v51  ;;  %v9253_v42 = vor.u32 %v10247_v6, %v9252_v31  ;;  %v8441_v55 = vor.u32 %v10044_v29, %v8440_v43  ;;  %v10296_v31 = vld [vmem:[#allocation14 + $0xd50] sm:$0xf0] }
 0x3e2   :  { %v10957_v16 = vpop.f32.mrf.mxu2  ;;  %v6088_v40 = vpop.f32.mrf.mxu0 }
 0x3e3   :  { %v6009_v37 = vadd.f32 %v10928_v50, %v5996_v13  ;;  %6338 = vmatpush.bf16.msra.mxu0 %v9281_v4  ;;  %v10233_v50 = vld [vmem:[#allocation14 + $0xb58] sm:$0xf0]  ;;  %v6049_v45 = vpop.f32.mrf.mxu1  ;;  %v10303_v13 = vld [vmem:[#allocation14 + $0xd88] sm:$0xf0] }
 0x3e4   :  { %6254 = vmatmul.bf16.vlgmr.msra.gmra.mxu1 %v10840_v1  ;;  %v9197_v7 = vor.u32 %v10233_v50, %v9196_v59  ;;  %v9477_v4 = vor.u32 %v10303_v13, %v9476_v47  ;;  %v9364_v59 = vld [vmem:[#allocation14 + $0xc90] sm:$0xf]  ;;  %v10275_v50 = vld [vmem:[#allocation14 + $0xca8] sm:$0xf0] }
 0x3e5   :  { %6298 = vmatpush.bf16.msrb.mxu1 %v8637_v61  ;;  %v6022_v26 = vadd.f32 %v10933_v5, %v6009_v37  ;;  %v8525_v5 = vor.u32 %v10065_v52, %v8524_v17  ;;  %v9533_v61 = vor.u32 %v10317_v56, %v9532_v54  ;;  %v10289_v37 = vld [vmem:[#allocation14 + $0xd18] sm:$0xf0] }
 0x3e6   :  { %v9421_v32 = vor.u32 %v10289_v37, %v9420_v2 }
 0x3e7   :  { %6339 = vmatpush.bf16.msra.mxu0 %v9253_v42  ;;  %v6035_v10 = vadd.f32 %v10942_v3, %v6022_v26  ;;  %v8497_v3 = vor.u32 %v10058_v28, %v8496_v27  ;;  %v6127_v51 = vpop.f32.mrf.mxu3  ;;  %v3322_v42 = vperm.slane %v10939_v0, 5 }
 0x3e9   :  { %6299 = vmatpush.bf16.msrb.mxu1 %v8609_v39  ;;  %v6048_v25 = vadd.f32 %v6047_v21, %v6035_v10  ;;  %v9448_v39 = vld [vmem:[#allocation14 + $0xd38] sm:$0xf]  ;;  %v9365_v10 = vor.u32 %v10275_v50, %v9364_v59 }
 0x3ea   :  { %v6114_v33 = vpop.f32.mrf.mxu2  ;;  %v9449_v22 = vor.u32 %v10296_v31, %v9448_v39  ;;  %v9336_v21 = vld [vmem:[#allocation14 + $0xc58] sm:$0xf] }
 0x3eb   :  { %6340 = vmatpush.bf16.msra.mxu0 %v9225_v18  ;;  %10342 = vtanh.f32 %v6048_v25 }
 0x3ed   :  { %6300 = vmatpush.bf16.msrb.mxu1 %v8581_v9 }
 0x3ef   :  { %6341 = vmatpush.bf16.msra.mxu0 %v9197_v7  ;;  %v10268_v7 = vld [vmem:[#allocation14 + $0xc70] sm:$0xf0] }
 0x3f1   :  { %6301 = vmatpush.bf16.msrb.mxu1 %v8553_v44  ;;  %v10343_v60 = vpop.eup %10342 }
 0x3f2   :  { %6373 = vst [vmem:[#allocation17 + $0x18] sm:$0xff] %v10343_v60 }
 0x3f3   :  { %6342 = vmatpush.bf16.msra.mxu0 %v9169_v24 }
 0x3f5   :  { %6302 = vmatpush.bf16.msrb.mxu1 %v8525_v5  ;;  %v9337_v5 = vor.u32 %v10268_v7, %v9336_v21 }
 0x3f7   :  { %6343 = vmatpush.bf16.msra.mxu0 %v9141_v46 }
 0x3f9   :  { %6303 = vmatpush.bf16.msrb.mxu1 %v8497_v3 }
 0x3fa   :  { %v6138_v9 = vpop.f32.mrf.mxu0 }
 0x3fb   :  { %6344 = vmatpush.bf16.msra.mxu0 %v9113_v57 }
 0x3fd   :  { %6304 = vmatpush.bf16.msrb.mxu1 %v8469_v48 }
 0x3fe   :  { %6345 = vmatmul.bf16.vlgmr.msra.gmra.mxu0 %v10833_v20  ;;  %v6099_v11 = vpop.f32.mrf.mxu1  ;;  %v9392_v20 = vld [vmem:[#allocation14 + $0xcc8] sm:$0xf] }
 0x3ff   :  { %v9393_v44 = vor.u32 %v10282_v12, %v9392_v20  ;;  %v6100_v53 = vadd.f32 %v6099_v11, %v6087_v58 }
 0x401   :  { %6305 = vmatpush.bf16.msrb.mxu1 %v8441_v55  ;;  %v6113_v27 = vadd.f32 %v10957_v16, %v6100_v53  ;;  %v3323_v16 = vperm.slane %v10939_v0, 6 }
 0x402   :  { %v6164_v6 = vpop.f32.mrf.mxu2  ;;  %v6140_v17 = vpop.f32.mrf.mxu0 }
 0x403   :  { %v6165_v15 = vadd.f32 %v6164_v6, %v3322_v42  ;;  %v6126_v28 = vadd.f32 %v10962_v36, %v6113_v27 }
 0x404   :  { %6306 = vmatmul.bf16.vlgmr.msrb.gmra.mxu1 %v10806_v41  ;;  %v6177_v41 = vpop.f32.mrf.mxu3 }
 0x405   :  { %6350 = vmatpush.bf16.msra.mxu1 %v9533_v61  ;;  %v6178_v18 = vadd.f32 %v6177_v41, %v6165_v15  ;;  %v6139_v24 = vadd.f32 %v6138_v9, %v6126_v28 }
 0x406   :  { %v6101_v52 = vpop.f32.mrf.mxu1 }
 0x409   :  { %6351 = vmatpush.bf16.msra.mxu1 %v9505_v63 }
 0x40a   :  { %v6166_v26 = vpop.f32.mrf.mxu2 }
 0x40c   :  { %v6179_v25 = vpop.f32.mrf.mxu3 }
 0x40d   :  { %6352 = vmatpush.bf16.msra.mxu1 %v9477_v4 }
 0x411   :  { %6353 = vmatpush.bf16.msra.mxu1 %v9449_v22 }
 0x415   :  { %6354 = vmatpush.bf16.msra.mxu1 %v9421_v32 }
 0x419   :  { %6355 = vmatpush.bf16.msra.mxu1 %v9393_v44 }
 0x41a   :  { %v6190_v3 = vpop.f32.mrf.mxu0 }
 0x41b   :  { %v6191_v56 = vadd.f32 %v6190_v3, %v6178_v18 }
 0x41d   :  { %6356 = vmatpush.bf16.msra.mxu1 %v9365_v10 }
 0x41e   :  { %v6151_v30 = vpop.f32.mrf.mxu1 }
 0x41f   :  { %v6152_v14 = vadd.f32 %v6151_v30, %v6139_v24  ;;  %v6229_v34 = vpop.f32.mrf.mxu3 }
 0x421   :  { %6357 = vmatpush.bf16.msra.mxu1 %v9337_v5  ;;  %10344 = vtanh.f32 %v6152_v14 }
 0x422   :  { %v6216_v33 = vpop.f32.mrf.mxu2  ;;  %v6192_v40 = vpop.f32.mrf.mxu0 }
 0x424   :  { %6358 = vmatmul.bf16.vlgmr.msra.gmra.mxu1 %v10840_v1 }
 0x426   :  { %v6153_v45 = vpop.f32.mrf.mxu1 }
 0x427   :  { %v10345_v46 = vpop.eup %10344  ;;  %v6231_v23 = vpop.f32.mrf.mxu3 }
 0x428   :  { %6374 = vst [vmem:[#allocation17 + $0x20] sm:$0xff] %v10345_v46 }
 0x42a   :  { %v6218_v38 = vpop.f32.mrf.mxu2 }
 0x43b   :  { %v6242_v60 = vpop.f32.mrf.mxu0 }
 0x440   :  { %v6281_v49 = vpop.f32.mrf.mxu3 }
 0x441   :  { %v6203_v1 = vpop.f32.mrf.mxu1 }
 0x442   :  { %v6268_v19 = vpop.f32.mrf.mxu2  ;;  %v6204_v51 = vadd.f32 %v6203_v1, %v6191_v56 }
 0x443   :  { %v6269_v48 = vadd.f32 %v6268_v19, %v3323_v16  ;;  %v6244_v43 = vpop.f32.mrf.mxu0 }
 0x444   :  { %v6217_v57 = vadd.f32 %v6216_v33, %v6204_v51 }
 0x445   :  { %v6282_v8 = vadd.f32 %v6281_v49, %v6269_v48 }
 0x446   :  { %v6230_v55 = vadd.f32 %v6229_v34, %v6217_v57 }
 0x448   :  { %v6283_v54 = vpop.f32.mrf.mxu3  ;;  %v6243_v35 = vadd.f32 %v6242_v60, %v6230_v55 }
 0x449   :  { %v6205_v29 = vpop.f32.mrf.mxu1 }
 0x44a   :  { %v6270_v36 = vpop.f32.mrf.mxu2 }
 0x45b   :  { %v6294_v62 = vpop.f32.mrf.mxu0 }
 0x45c   :  { %v6295_v9 = vadd.f32 %v6294_v62, %v6282_v8 }
 0x460   :  { %v6333_v13 = vpop.f32.mrf.mxu3 }
 0x461   :  { %v6255_v63 = vpop.f32.mrf.mxu1 }
 0x462   :  { %v6320_v61 = vpop.f32.mrf.mxu2  ;;  %v6256_v47 = vadd.f32 %v6255_v63, %v6243_v35 }
 0x463   :  { %v6296_v4 = vpop.f32.mrf.mxu0 }
 0x464   :  { %10346 = vtanh.f32 %v6256_v47 }
 0x468   :  { %v6335_v6 = vpop.f32.mrf.mxu3 }
 0x469   :  { %v6257_v39 = vpop.f32.mrf.mxu1 }
 0x46a   :  { %v6322_v0 = vpop.f32.mrf.mxu2  ;;  %v10347_v31 = vpop.eup %10346 }
 0x46b   :  { %6375 = vst [vmem:[#allocation17 + $0x28] sm:$0xff] %v10347_v31 }
 0x47b   :  { %v6346_v22 = vpop.f32.mrf.mxu0 }
 0x481   :  { %v6307_v2 = vpop.f32.mrf.mxu1 }
 0x482   :  { %v6308_v11 = vadd.f32 %v6307_v2, %v6295_v9 }
 0x483   :  { %v6348_v37 = vpop.f32.mrf.mxu0 }
 0x484   :  { %v6321_v32 = vadd.f32 %v6320_v61, %v6308_v11 }
 0x486   :  { %v6334_v20 = vadd.f32 %v6333_v13, %v6321_v32 }
 0x488   :  { %v6347_v12 = vadd.f32 %v6346_v22, %v6334_v20 }
 0x489   :  { %v6309_v42 = vpop.f32.mrf.mxu1 }
 0x4a1   :  { %v6359_v15 = vpop.f32.mrf.mxu1 }
 0x4a2   :  { %v6360_v26 = vadd.f32 %v6359_v15, %v6347_v12 }
 0x4a4   :  { %10348 = vtanh.f32 %v6360_v26 }
 0x4a9   :  { %v6361_v41 = vpop.f32.mrf.mxu1 }
 0x4aa   :  { %v10349_v18 = vpop.eup %10348 }
 0x4ab   :  { %6376 = vst [vmem:[#allocation17 + $0x30] sm:$0xff] %v10349_v18 }
 0x4ac   :  { %6387 = dma.vmem_to_hbm [thread:$0]  %s6383_s8, 896, %s6385_s13, [#allocation4]  }
 0x4ad   :  { %10603 = dma.done.wait [#allocation4], 896  }
 0x4ae   :  { %10604 = vsyncadd [#allocation4], 4294966400 }
 0x4af   :  { %6392 = vsyncpa [#allocation3], 1 }
 0x4b0   :  { %6393 = vsyncpa [#allocation6], 1 }
 0x4b1   :  { %6394 = vsyncpa [#allocation9], 1 }
 0x4b2   :  { %6395 = vsyncpa [#allocation12], 1 }
 0x4b3   :  { %6396 = vsyncpa [#allocation15], 1 }
 0x4b4   :  { %6397 = vsyncpa [#allocation4], 1 }

</bundles_post_ra>
